<compile_context>
chip_gen: v5e
topology: v5e:2x2
jax: 0.10.0
libtpu: 0.0.40
codegen_flags: <defaults>
</compile_context>

<pallas_src>
import functools

import jax
import jax.numpy as jnp
from jax.experimental import pallas as pl
from jax.experimental.pallas import tpu as pltpu

_MIN_SPLIT_TILE = 256  # only force a 2-way row split when M >= 2 * this


def _round_up(x, m):
    return (x + m - 1) // m * m


def _cdiv(a, b):
    return (a + b - 1) // b


def _vmem_capacity_bytes():
    """Physical VMEM per core; conservative 64 MiB (v7x) fallback."""
    try:
        info = pltpu.get_tpu_info()
        return int(getattr(info, "vmem_capacity_bytes", 64 * 1024 * 1024))
    except Exception:  # pragma: no cover - CPU / interpret fallback
        return 64 * 1024 * 1024


def _th_candidates(h_padded):
    """Divisors of H (already a multiple of 128) that are multiples of 128."""
    return sorted(
        (d for d in range(128, h_padded + 1, 128) if h_padded % d == 0),
        reverse=True)


def _tile_vmem_bytes(tm, th, c, x_itemsize, out_itemsize, need_acc):
    """Rough per-kernel VMEM footprint (double-buffered tiles + temporaries)."""
    b = 2 * tm * c * x_itemsize        # x tiles, native dtype
    b += 2 * c * th * 2                # W1 tiles (bf16)
    b += 2 * th * 4                    # b1 tiles (f32)
    b += 2 * th * c * 2                # W2 tiles (bf16)
    b += 2 * c * 4                     # b2 tiles (f32)
    b += 2 * tm * c * out_itemsize     # output tiles
    if need_acc:
        b += tm * c * 4                # f32 accumulator scratch
    b += tm * th * 6                   # live hidden tile (f32 + bf16 copy)
    b += tm * c * 4                    # second-dot f32 result temporary
    return b


def _select_tiles(m, c, h_padded, x_itemsize, out_itemsize, need_acc,
                  tm_target, th_req, budget):
    """Pick (tm, th): keep tm as large as the budget allows, shrink th first."""
    m8 = _round_up(max(m, 1), 8)
    tm = _round_up(min(tm_target, m8), 8)
    # Guarantee >= 2 row blocks when there is enough work, so the "parallel"
    # axis shards across both TensorCores on v7x (harmless on v5e/v6e).
    if m8 >= 2 * _MIN_SPLIT_TILE and _cdiv(m, tm) < 2:
        tm = _round_up(_cdiv(m, 2), 8)

    cands = _th_candidates(h_padded)
    if th_req is not None:
        cands = [d for d in cands if d <= th_req] or [cands[-1]]

    while True:
        for th in cands:
            if _tile_vmem_bytes(tm, th, c, x_itemsize, out_itemsize,
                                need_acc) <= budget:
                return tm, th
        if tm <= 8:
            return tm, cands[-1]
        tm = max(8, _round_up(tm // 2, 8))


def _ffn_kernel(x_ref, w1_ref, b1_ref, w2_ref, b2_ref, o_ref, *scratch,
                acc_into_out):
    """One (tm, C) token tile x one th-wide hidden chunk of the fused MLP.

      h_j  = relu(x @ W1[:, chunk] + b1[chunk])   (tm, th)  MXU + VPU
      acc += h_j @ W2[chunk, :]                   (tm, C)   MXU, f32 acc
      acc is initialized with b2 at the first chunk (added exactly once).
    """
    j = pl.program_id(1)
    acc_ref = o_ref if acc_into_out else scratch[0]

    @pl.when(j == 0)
    def _():
        acc_ref[...] = jnp.broadcast_to(b2_ref[...], acc_ref.shape)

    # Cast x to bf16 in-kernel (native dtype stays in HBM); f32 accumulation.
    xb = x_ref[...].astype(jnp.bfloat16)
    h = jnp.dot(xb, w1_ref[...], preferred_element_type=jnp.float32)
    h = jnp.maximum(h + b1_ref[...], 0.0)          # bias + ReLU in f32 (VPU)
    acc_ref[...] += jnp.dot(h.astype(w2_ref.dtype), w2_ref[...],
                            preferred_element_type=jnp.float32)

    if not acc_into_out:
        @pl.when(j == pl.num_programs(1) - 1)
        def _():
            o_ref[...] = acc_ref[...].astype(o_ref.dtype)


@functools.partial(jax.jit, static_argnames=("tm", "th"))
def feed_forward(x, w1, b1, w2, b2, *, tm=None, th=None):
    """x: (B, T, C); w1: (C, H); b1: (H,); w2: (H, C); b2: (C,) -> (B, T, C)."""
    B, T, C = x.shape
    H = w1.shape[1]
    M = B * T

    out_dtype = x.dtype
    acc_into_out = (jnp.dtype(out_dtype) == jnp.float32)

    # Pad hidden dim to a lane multiple with zeros: relu(x@0 + 0) = 0, and
    # 0 @ W2_pad contributes nothing, so results are unchanged.
    H_p = _round_up(H, 128)
    if H_p != H:
        w1 = jnp.pad(w1, ((0, 0), (0, H_p - H)))
        b1 = jnp.pad(b1, ((0, H_p - H),))
        w2 = jnp.pad(w2, ((0, H_p - H), (0, 0)))

    # Per-generation VMEM budget: ~80% of physical (v5e/v6e: 128 MiB -> ~102,
    # v7x: 64 MiB -> ~51), minus a small internal-scratch margin for tiles.
    vmem_cap = _vmem_capacity_bytes()
    vmem_limit = int(vmem_cap * 0.8)
    budget = vmem_limit - (2 << 20)

    x_itemsize = jnp.dtype(x.dtype).itemsize
    out_itemsize = jnp.dtype(out_dtype).itemsize
    tm_target = 1024 if tm is None else tm
    tm_sel, th_sel = _select_tiles(M, C, H_p, x_itemsize, out_itemsize,
                                   not acc_into_out, tm_target, th, budget)

    n_row = _cdiv(M, tm_sel)          # cdiv grid: no padded x copy, no slicing
    n_h = H_p // th_sel
    grid = (n_row, n_h)

    x2d = x.reshape(M, C)                       # native dtype; cast in-kernel
    w1b = w1.astype(jnp.bfloat16)
    w2b = w2.astype(jnp.bfloat16)
    b1_2d = b1.reshape(1, H_p).astype(jnp.float32)
    b2_2d = b2.reshape(1, C).astype(jnp.float32)

    # Cost estimate: weights are re-streamed once per row tile.
    flops = 4 * M * C * H
    bytes_accessed = (M * C * x_itemsize
                      + n_row * (C * H_p + H_p * C) * 2
                      + H_p * 4 + C * 4
                      + M * C * out_itemsize)

    kernel = functools.partial(_ffn_kernel, acc_into_out=acc_into_out)
    scratch_shapes = ([] if acc_into_out
                      else [pltpu.VMEM((tm_sel, C), jnp.float32)])

    out = pl.pallas_call(
        kernel,
        out_shape=jax.ShapeDtypeStruct((M, C), out_dtype),
        grid_spec=pltpu.PrefetchScalarGridSpec(
            num_scalar_prefetch=0,
            grid=grid,
            in_specs=[
                pl.BlockSpec((tm_sel, C), lambda i, j: (i, 0)),    # x rows
                pl.BlockSpec((C, th_sel), lambda i, j: (0, j)),    # W1 chunk
                pl.BlockSpec((1, th_sel), lambda i, j: (0, j)),    # b1 chunk
                pl.BlockSpec((th_sel, C), lambda i, j: (j, 0)),    # W2 chunk
                pl.BlockSpec((1, C), lambda i, j: (0, 0)),         # b2
            ],
            out_specs=pl.BlockSpec((tm_sel, C), lambda i, j: (i, 0)),
            scratch_shapes=scratch_shapes,
        ),
        compiler_params=pltpu.CompilerParams(
            # token axis parallel (megacore), hidden axis is a reduction
            dimension_semantics=("parallel", "arbitrary"),
            vmem_limit_bytes=vmem_limit,
        ),
        cost_estimate=pl.CostEstimate(
            flops=int(flops), transcendentals=0,
            bytes_accessed=int(bytes_accessed)),
    )(x2d, w1b, b1_2d, w2b, b2_2d)

    return out.reshape(B, T, C)


def _reference(x, w1, b1, w2, b2):
    """Same math, same bf16 operand precision, plain XLA."""
    xb = x.astype(jnp.bfloat16)
    h = jnp.einsum("btc,ch->bth", xb, w1.astype(jnp.bfloat16),
                   preferred_element_type=jnp.float32) + b1
    h = jnp.maximum(h, 0.0)
    y = jnp.einsum("bth,hc->btc", h.astype(jnp.bfloat16),
                   w2.astype(jnp.bfloat16),
                   preferred_element_type=jnp.float32) + b2
    return y.astype(x.dtype)


if __name__ == "__main__":
    # Small shapes consistent with the module (n_embd = 384, hidden = 4*384).
    B, T, C = 2, 8, 384
    H = 4 * C

    key = jax.random.PRNGKey(0)
    kx, k1, k2, k3, k4 = jax.random.split(key, 5)

    # PyTorch-Linear-style init: U(-1/sqrt(fan_in), 1/sqrt(fan_in)).
    lim1 = 1.0 / jnp.sqrt(jnp.float32(C))
    lim2 = 1.0 / jnp.sqrt(jnp.float32(H))
    x = jax.random.normal(kx, (B, T, C), dtype=jnp.float32)
    w1 = jax.random.uniform(k1, (C, H), jnp.float32, -lim1, lim1)
    b1 = jax.random.uniform(k2, (H,), jnp.float32, -lim1, lim1)
    w2 = jax.random.uniform(k3, (H, C), jnp.float32, -lim2, lim2)
    b2 = jax.random.uniform(k4, (C,), jnp.float32, -lim2, lim2)

    y = feed_forward(x, w1, b1, w2, b2)
    y = jax.block_until_ready(y)

    y_ref = _reference(x, w1, b1, w2, b2)
    assert y.shape == (B, T, C)
    assert jnp.allclose(y, y_ref, atol=1e-2, rtol=1e-2), "mismatch vs reference"

    print("KERNEL_OK")
</pallas_src>

<mosaic_0001>
module attributes {stable_mosaic.version = 11 : i64} {
  func.func @_ffn_kernel(%arg0: i32, %arg1: i32, %arg2: memref<16x384xf32, #tpu.memory_space<vmem>>, %arg3: memref<384x1536xbf16, #tpu.memory_space<vmem>>, %arg4: memref<1x1536xf32, #tpu.memory_space<vmem>>, %arg5: memref<1536x384xbf16, #tpu.memory_space<vmem>>, %arg6: memref<1x384xf32, #tpu.memory_space<vmem>>, %arg7: memref<16x384xf32, #tpu.memory_space<vmem>>) attributes {dimension_semantics = [#tpu.dimension_semantics<parallel>, #tpu.dimension_semantics<arbitrary>], iteration_bounds = array<i64: 1, 1>, scalar_prefetch = 0 : i64, scratch_operands = 0 : i64, tpu.core_type = #tpu.core_type<tc>, window_params = [{transform_indices = @transform_0, window_bounds = array<i64: 16, 384>}, {transform_indices = @transform_1, window_bounds = array<i64: 384, 1536>}, {transform_indices = @transform_2, window_bounds = array<i64: 1, 1536>}, {transform_indices = @transform_3, window_bounds = array<i64: 1536, 384>}, {pipeline_mode = #tpu.pipeline_mode<synchronous>, transform_indices = @transform_4, window_bounds = array<i64: 1, 384>}, {transform_indices = @transform_5, window_bounds = array<i64: 16, 384>}]} {
    %c0_i32 = arith.constant 0 : i32
    %0 = arith.cmpi eq, %arg1, %c0_i32 : i32
    %1 = arith.extui %0 : i1 to i32
    %c0_i32_0 = arith.constant 0 : i32
    %2 = arith.cmpi ne, %1, %c0_i32_0 : i32
    scf.if %2 {
      %c0_14 = arith.constant 0 : index
      %c0_15 = arith.constant 0 : index
      %18 = vector.load %arg6[%c0_14, %c0_15] : memref<1x384xf32, #tpu.memory_space<vmem>>, vector<1x384xf32>
      %19 = vector.shape_cast %18 : vector<1x384xf32> to vector<1x384xf32>
      %20 = vector.broadcast %19 : vector<1x384xf32> to vector<16x384xf32>
      %c0_16 = arith.constant 0 : index
      %c0_17 = arith.constant 0 : index
      %21 = vector.load %arg7[%c0_16, %c0_17] : memref<16x384xf32, #tpu.memory_space<vmem>>, vector<16x384xf32>
      tpu.vector_store %arg7[%c0_16, %c0_17], %20 {strides = array<i32>} : memref<16x384xf32, #tpu.memory_space<vmem>>, vector<16x384xf32>,
    } else {
    }
    %c0 = arith.constant 0 : index
    %c0_1 = arith.constant 0 : index
    %3 = vector.load %arg2[%c0, %c0_1] : memref<16x384xf32, #tpu.memory_space<vmem>>, vector<16x384xf32>
    %4 = arith.truncf %3 : vector<16x384xf32> to vector<16x384xbf16>
    %c0_2 = arith.constant 0 : index
    %c0_3 = arith.constant 0 : index
    %5 = vector.load %arg3[%c0_2, %c0_3] : memref<384x1536xbf16, #tpu.memory_space<vmem>>, vector<384x1536xbf16>
    %cst = arith.constant dense<0.000000e+00> : vector<16x1536xf32>
    %6 = tpu.matmul %4, %5, %cst {dimension_numbers = #tpu.dot_dimension_numbers<[1], [0], [0], [1], [0, 0, 1, 1], [], []>} : vector<16x384xbf16>, vector<384x1536xbf16>, vector<16x1536xf32> -> vector<16x1536xf32>
    %c0_4 = arith.constant 0 : index
    %c0_5 = arith.constant 0 : index
    %7 = vector.load %arg4[%c0_4, %c0_5] : memref<1x1536xf32, #tpu.memory_space<vmem>>, vector<1x1536xf32>
    %8 = vector.broadcast %7 : vector<1x1536xf32> to vector<16x1536xf32>
    %9 = arith.addf %6, %8 : vector<16x1536xf32>
    %cst_6 = arith.constant 0.000000e+00 : f32
    %10 = vector.broadcast %cst_6 : f32 to vector<16x1536xf32>
    %11 = arith.maximumf %9, %10 : vector<16x1536xf32>
    %c0_7 = arith.constant 0 : index
    %c0_8 = arith.constant 0 : index
    %12 = vector.load %arg7[%c0_7, %c0_8] : memref<16x384xf32, #tpu.memory_space<vmem>>, vector<16x384xf32>
    %13 = arith.truncf %11 : vector<16x1536xf32> to vector<16x1536xbf16>
    %c0_9 = arith.constant 0 : index
    %c0_10 = arith.constant 0 : index
    %14 = vector.load %arg5[%c0_9, %c0_10] : memref<1536x384xbf16, #tpu.memory_space<vmem>>, vector<1536x384xbf16>
    %cst_11 = arith.constant dense<0.000000e+00> : vector<16x384xf32>
    %15 = tpu.matmul %13, %14, %cst_11 {dimension_numbers = #tpu.dot_dimension_numbers<[1], [0], [0], [1], [0, 0, 1, 1], [], []>} : vector<16x1536xbf16>, vector<1536x384xbf16>, vector<16x384xf32> -> vector<16x384xf32>
    %16 = arith.addf %12, %15 : vector<16x384xf32>
    %c0_12 = arith.constant 0 : index
    %c0_13 = arith.constant 0 : index
    %17 = vector.load %arg7[%c0_12, %c0_13] : memref<16x384xf32, #tpu.memory_space<vmem>>, vector<16x384xf32>
    tpu.vector_store %arg7[%c0_12, %c0_13], %16 {strides = array<i32>} : memref<16x384xf32, #tpu.memory_space<vmem>>, vector<16x384xf32>,
    return
  }
  func.func @transform_0(%arg0: i32, %arg1: i32) -> (i32, i32) {
    %c0_i32 = arith.constant 0 : i32
    %c0_i32_0 = arith.constant 0 : i32
    return %arg0, %c0_i32 : i32, i32
  }
  func.func @transform_1(%arg0: i32, %arg1: i32) -> (i32, i32) {
    %c0_i32 = arith.constant 0 : i32
    %c0_i32_0 = arith.constant 0 : i32
    return %c0_i32, %arg1 : i32, i32
  }
  func.func @transform_2(%arg0: i32, %arg1: i32) -> (i32, i32) {
    %c0_i32 = arith.constant 0 : i32
    %c0_i32_0 = arith.constant 0 : i32
    return %c0_i32, %arg1 : i32, i32
  }
  func.func @transform_3(%arg0: i32, %arg1: i32) -> (i32, i32) {
    %c0_i32 = arith.constant 0 : i32
    %c0_i32_0 = arith.constant 0 : i32
    return %arg1, %c0_i32 : i32, i32
  }
  func.func @transform_4(%arg0: i32, %arg1: i32) -> (i32, i32) {
    %c0_i32 = arith.constant 0 : i32
    %c0_i32_0 = arith.constant 0 : i32
    %c0_i32_1 = arith.constant 0 : i32
    return %c0_i32, %c0_i32_0 : i32, i32
  }
  func.func @transform_5(%arg0: i32, %arg1: i32) -> (i32, i32) {
    %c0_i32 = arith.constant 0 : i32
    %c0_i32_0 = arith.constant 0 : i32
    return %arg0, %c0_i32 : i32, i32
  }
}

</mosaic_0001>

<bundles_post_ra>
// kernel: feed_forward.1
= control target key start
LH: loop header
LB: loop body
LE: loop exit
PB: predicated region body
PF: predicated region fallthrough
CT: control target
= control target key end

     0   :  { %s11519_s0 = inlined_call_operand.vmem [shape: f32[16,384], index: 0, kind: input, shape index: {}]   ;;  %s11520_s1 = inlined_call_operand.vmem [shape: bf16[384,1536], index: 1, kind: input, shape index: {}]   ;;  %s11521_s2 = inlined_call_operand.vmem [shape: f32[1,1536], index: 2, kind: input, shape index: {}]   ;;  %s11522_s3 = inlined_call_operand.vmem [shape: bf16[1536,384], index: 3, kind: input, shape index: {}]   ;;  %s11523_s4 = inlined_call_operand.vmem [shape: f32[1,384], index: 4, kind: input, shape index: {}]   ;;  %s11524_s5 = inlined_call_operand.hbm [shape: f32[16,384], index: 5, kind: output, shape index: {}]  }
   0x1   :  { %v5142_v0 = vld [vmem:[%s11520_s1 + $0x2a0] sm:$0xf]  ;;  %v7198_v1 = vld [vmem:[%s11520_s1 + $0x2cc] sm:$0xf0]  ;;  %v7192_v9 = vld [vmem:[%s11520_s1 + $0x2a4] sm:$0xf] }
   0x2   :  { %v5526_v2 = vld [vmem:[%s11520_s1 + $0x5a0] sm:$0xf]  ;;  %v5143_v3 = vor.u32 %v7198_v1, %v5142_v0  ;;  %v7294_v4 = vld [vmem:[%s11520_s1 + $0x5cc] sm:$0xf0]  ;;  %v5144_v10 = vld [vmem:[%s11520_s1 + $0x2d0] sm:$0xf0] }
   0x3   :  { %v5910_v5 = vld [vmem:[%s11520_s1 + $0x8a0] sm:$0xf]  ;;  %v7390_v6 = vld [vmem:[%s11520_s1 + $0x8cc] sm:$0xf0]  ;;  %v5527_v7 = vor.u32 %v7294_v4, %v5526_v2  ;;  %v5147_v12 = vor.u32 %v7192_v9, %v5144_v10  ;;  %v7180_v20 = vld [vmem:[%s11520_s1 + $0x244] sm:$0xf] }
   0x4   :  { %v5911_v8 = vor.u32 %v7390_v6, %v5910_v5  ;;  %v5094_v11 = vld [vmem:[%s11520_s1 + $0x240] sm:$0xf]  ;;  %1804 = vmatpush.bf16.msra.mxu0 %v5143_v3  ;;  %v7186_v13 = vld [vmem:[%s11520_s1 + $0x26c] sm:$0xf0]  ;;  %v5096_v22 = vld [vmem:[%s11520_s1 + $0x270] sm:$0xf0] }
   0x5   :  { %v5478_v14 = vld [vmem:[%s11520_s1 + $0x540] sm:$0xf]  ;;  %v7282_v15 = vld [vmem:[%s11520_s1 + $0x56c] sm:$0xf0]  ;;  %1818 = vmatpush.bf16.msra.mxu1 %v5527_v7  ;;  %v5095_v16 = vor.u32 %v7186_v13, %v5094_v11  ;;  %1846 = vmatpush.bf16.msra.mxu3 %v5147_v12  ;;  %v5099_v25 = vor.u32 %v7180_v20, %v5096_v22  ;;  %v7168_v31 = vld [vmem:[%s11520_s1 + $0x1e4] sm:$0xf] }
   0x6   :  { %1832 = vmatpush.bf16.msra.mxu2 %v5911_v8  ;;  %v5479_v17 = vor.u32 %v7282_v15, %v5478_v14  ;;  %v5862_v18 = vld [vmem:[%s11520_s1 + $0x840] sm:$0xf]  ;;  %v7378_v19 = vld [vmem:[%s11520_s1 + $0x86c] sm:$0xf0]  ;;  %v5048_v32 = vld [vmem:[%s11520_s1 + $0x210] sm:$0xf0] }
   0x7   :  { %v5863_v21 = vor.u32 %v7378_v19, %v5862_v18  ;;  %v5046_v23 = vld [vmem:[%s11520_s1 + $0x1e0] sm:$0xf]  ;;  %v7174_v24 = vld [vmem:[%s11520_s1 + $0x20c] sm:$0xf0]  ;;  %v5051_v38 = vor.u32 %v7168_v31, %v5048_v32  ;;  %v7156_v42 = vld [vmem:[%s11520_s1 + $0x184] sm:$0xf] }
   0x8   :  { %v5430_v26 = vld [vmem:[%s11520_s1 + $0x4e0] sm:$0xf]  ;;  %v7270_v27 = vld [vmem:[%s11520_s1 + $0x50c] sm:$0xf0]  ;;  %1805 = vmatpush.bf16.msra.mxu0 %v5095_v16  ;;  %v5047_v29 = vor.u32 %v7174_v24, %v5046_v23  ;;  %v5000_v43 = vld [vmem:[%s11520_s1 + $0x1b0] sm:$0xf0] }
   0x9   :  { %v5814_v28 = vld [vmem:[%s11520_s1 + $0x7e0] sm:$0xf]  ;;  %v7366_v30 = vld [vmem:[%s11520_s1 + $0x80c] sm:$0xf0]  ;;  %1819 = vmatpush.bf16.msra.mxu1 %v5479_v17  ;;  %v5431_v33 = vor.u32 %v7270_v27, %v5430_v26  ;;  %1847 = vmatpush.bf16.msra.mxu3 %v5099_v25  ;;  %v5003_v50 = vor.u32 %v7156_v42, %v5000_v43  ;;  %v7144_v54 = vld [vmem:[%s11520_s1 + $0x124] sm:$0xf] }
   0xa   :  { %1833 = vmatpush.bf16.msra.mxu2 %v5863_v21  ;;  %v5815_v34 = vor.u32 %v7366_v30, %v5814_v28  ;;  %v4998_v35 = vld [vmem:[%s11520_s1 + $0x180] sm:$0xf]  ;;  %v7162_v36 = vld [vmem:[%s11520_s1 + $0x1ac] sm:$0xf0]  ;;  %v4952_v55 = vld [vmem:[%s11520_s1 + $0x150] sm:$0xf0] }
   0xb   :  { %v5382_v37 = vld [vmem:[%s11520_s1 + $0x480] sm:$0xf]  ;;  %v7258_v39 = vld [vmem:[%s11520_s1 + $0x4ac] sm:$0xf0]  ;;  %v4999_v44 = vor.u32 %v7162_v36, %v4998_v35  ;;  %v4955_v62 = vor.u32 %v7144_v54, %v4952_v55  ;;  %v7132_v2 = vld [vmem:[%s11520_s1 + $0xc4] sm:$0xf] }
   0xc   :  { %v5766_v40 = vld [vmem:[%s11520_s1 + $0x780] sm:$0xf]  ;;  %v7354_v41 = vld [vmem:[%s11520_s1 + $0x7ac] sm:$0xf0]  ;;  %1806 = vmatpush.bf16.msra.mxu0 %v5047_v29  ;;  %v5383_v45 = vor.u32 %v7258_v39, %v5382_v37  ;;  %v4904_v3 = vld [vmem:[%s11520_s1 + $0xf0] sm:$0xf0] }
   0xd   :  { %1820 = vmatpush.bf16.msra.mxu1 %v5431_v33  ;;  %v5767_v46 = vor.u32 %v7354_v41, %v5766_v40  ;;  %v4950_v47 = vld [vmem:[%s11520_s1 + $0x120] sm:$0xf]  ;;  %v7150_v48 = vld [vmem:[%s11520_s1 + $0x14c] sm:$0xf0]  ;;  %1848 = vmatpush.bf16.msra.mxu3 %v5051_v38  ;;  %v4907_v10 = vor.u32 %v7132_v2, %v4904_v3  ;;  %v7120_v14 = vld [vmem:[%s11520_s1 + $0x64] sm:$0xf] }
   0xe   :  { %1834 = vmatpush.bf16.msra.mxu2 %v5815_v34  ;;  %v5334_v49 = vld [vmem:[%s11520_s1 + $0x420] sm:$0xf]  ;;  %v7246_v51 = vld [vmem:[%s11520_s1 + $0x44c] sm:$0xf0]  ;;  %v4951_v56 = vor.u32 %v7150_v48, %v4950_v47  ;;  %v4856_v15 = vld [vmem:[%s11520_s1 + $0x90] sm:$0xf0] }
   0xf   :  { %v5718_v52 = vld [vmem:[%s11520_s1 + $0x720] sm:$0xf]  ;;  %v7342_v53 = vld [vmem:[%s11520_s1 + $0x74c] sm:$0xf0]  ;;  %v5335_v57 = vor.u32 %v7246_v51, %v5334_v49  ;;  %v4859_v24 = vor.u32 %v7120_v14, %v4856_v15  ;;  %v7108_v26 = vld [vmem:[%s11520_s1 + $0x4] sm:$0xf] }
  0x10   :  { %1807 = vmatpush.bf16.msra.mxu0 %v4999_v44  ;;  %v5719_v58 = vor.u32 %v7342_v53, %v5718_v52  ;;  %v4902_v59 = vld [vmem:[%s11520_s1 + $0xc0] sm:$0xf]  ;;  %v7138_v60 = vld [vmem:[%s11520_s1 + $0xec] sm:$0xf0]  ;;  %v4808_v27 = vld [vmem:[%s11520_s1 + $0x30] sm:$0xf0] }
  0x11   :  { %1821 = vmatpush.bf16.msra.mxu1 %v5383_v45  ;;  %v5286_v61 = vld [vmem:[%s11520_s1 + $0x3c0] sm:$0xf]  ;;  %1849 = vmatpush.bf16.msra.mxu3 %v5003_v50  ;;  %v7234_v63 = vld [vmem:[%s11520_s1 + $0x3ec] sm:$0xf0]  ;;  %v4903_v4 = vor.u32 %v7138_v60, %v4902_v59  ;;  %v7288_v28 = vld [vmem:[%s11520_s1 + $0x5a4] sm:$0xf]  ;;  %v4811_v39 = vor.u32 %v7108_v26, %v4808_v27 }
  0x12   :  { %1835 = vmatpush.bf16.msra.mxu2 %v5767_v46  ;;  %v5670_v0 = vld [vmem:[%s11520_s1 + $0x6c0] sm:$0xf]  ;;  %v7330_v1 = vld [vmem:[%s11520_s1 + $0x6ec] sm:$0xf0]  ;;  %v5287_v5 = vor.u32 %v7234_v63, %v5286_v61  ;;  %v5528_v29 = vld [vmem:[%s11520_s1 + $0x5d0] sm:$0xf0] }
  0x13   :  { %v5671_v6 = vor.u32 %v7330_v1, %v5670_v0  ;;  %v4854_v7 = vld [vmem:[%s11520_s1 + $0x60] sm:$0xf]  ;;  %v7126_v8 = vld [vmem:[%s11520_s1 + $0x8c] sm:$0xf0]  ;;  %v7384_v30 = vld [vmem:[%s11520_s1 + $0x8a4] sm:$0xf]  ;;  %v5531_v40 = vor.u32 %v7288_v28, %v5528_v29 }
  0x14   :  { %1808 = vmatpush.bf16.msra.mxu0 %v4951_v56  ;;  %v5238_v9 = vld [vmem:[%s11520_s1 + $0x360] sm:$0xf]  ;;  %v7222_v11 = vld [vmem:[%s11520_s1 + $0x38c] sm:$0xf0]  ;;  %v4855_v16 = vor.u32 %v7126_v8, %v4854_v7  ;;  %v5912_v32 = vld [vmem:[%s11520_s1 + $0x8d0] sm:$0xf0] }
  0x15   :  { %1822 = vmatpush.bf16.msra.mxu1 %v5335_v57  ;;  %1850 = vmatpush.bf16.msra.mxu3 %v4955_v62  ;;  %v5622_v12 = vld [vmem:[%s11520_s1 + $0x660] sm:$0xf]  ;;  %v7318_v13 = vld [vmem:[%s11520_s1 + $0x68c] sm:$0xf0]  ;;  %v5239_v19 = vor.u32 %v7222_v11, %v5238_v9  ;;  %v5150_v33 = vld [vmem:[%s11520_s1 + $0x2a8] sm:$0xf]  ;;  %v5915_v42 = vor.u32 %v7384_v30, %v5912_v32 }
  0x16   :  { %1836 = vmatpush.bf16.msra.mxu2 %v5719_v58  ;;  %v4806_v17 = vld [vmem:[%s11520_s1] sm:$0xf]  ;;  %v7114_v18 = vld [vmem:[%s11520_s1 + $0x2c] sm:$0xf0]  ;;  %v5623_v20 = vor.u32 %v7318_v13, %v5622_v12  ;;  %v7199_v34 = vld [vmem:[%s11520_s1 + $0x2d4] sm:$0xf0] }
  0x17   :  { %v5190_v21 = vld [vmem:[%s11520_s1 + $0x300] sm:$0xf]  ;;  %v7210_v22 = vld [vmem:[%s11520_s1 + $0x32c] sm:$0xf0]  ;;  %v4807_v31 = vor.u32 %v7114_v18, %v4806_v17  ;;  %v5534_v37 = vld [vmem:[%s11520_s1 + $0x5a8] sm:$0xf]  ;;  %v5151_v43 = vor.u32 %v7199_v34, %v5150_v33 }
  0x18   :  { %1809 = vmatpush.bf16.msra.mxu0 %v4903_v4  ;;  %v5574_v23 = vld [vmem:[%s11520_s1 + $0x600] sm:$0xf]  ;;  %v7306_v25 = vld [vmem:[%s11520_s1 + $0x62c] sm:$0xf0]  ;;  %v5191_v35 = vor.u32 %v7210_v22, %v5190_v21  ;;  %v7295_v38 = vld [vmem:[%s11520_s1 + $0x5d4] sm:$0xf0] }
  0x19   :  { %1823 = vmatpush.bf16.msra.mxu1 %v5287_v5  ;;  %1851 = vmatpush.bf16.msra.mxu3 %v4907_v10  ;;  %v5575_v36 = vor.u32 %v7306_v25, %v5574_v23  ;;  %v7276_v41 = vld [vmem:[%s11520_s1 + $0x544] sm:$0xf]  ;;  %v5480_v44 = vld [vmem:[%s11520_s1 + $0x570] sm:$0xf0]  ;;  %v5535_v47 = vor.u32 %v7295_v38, %v5534_v37  ;;  %v5102_v48 = vld [vmem:[%s11520_s1 + $0x248] sm:$0xf] }
  0x1a   :  { %1837 = vmatpush.bf16.msra.mxu2 %v5671_v6  ;;  %v7372_v45 = vld [vmem:[%s11520_s1 + $0x844] sm:$0xf]  ;;  %v5864_v46 = vld [vmem:[%s11520_s1 + $0x870] sm:$0xf0]  ;;  %v7187_v49 = vld [vmem:[%s11520_s1 + $0x274] sm:$0xf0]  ;;  %v5483_v54 = vor.u32 %v7276_v41, %v5480_v44 }
  0x1b   :  { %v5486_v50 = vld [vmem:[%s11520_s1 + $0x548] sm:$0xf]  ;;  %v7283_v51 = vld [vmem:[%s11520_s1 + $0x574] sm:$0xf0]  ;;  %v39_v52 = vld [vmem:[%s11519_s0] sm:$0xff]  ;;  %v5867_v58 = vor.u32 %v7372_v45, %v5864_v46  ;;  %v5103_v59 = vor.u32 %v7187_v49, %v5102_v48 }
  0x1c   :  { %1810 = vmatpush.bf16.msra.mxu0 %v4855_v16  ;;  %v42_v53 = vld [vmem:[%s11519_s0 + $0x18] sm:$0xff]  ;;  %v7264_v55 = vld [vmem:[%s11520_s1 + $0x4e4] sm:$0xf]  ;;  %v5432_v56 = vld [vmem:[%s11520_s1 + $0x510] sm:$0xf0]  ;;  %v5487_v63 = vor.u32 %v7283_v51, %v5486_v50 }
  0x1d   :  { %1824 = vmatpush.bf16.msra.mxu1 %v5239_v19  ;;  %1852 = vmatpush.bf16.msra.mxu3 %v4859_v24  ;;  %v7998_v57 = vpack.c.bf16 %v42_v53, %v39_v52  ;;  %v7360_v60 = vld [vmem:[%s11520_s1 + $0x7e4] sm:$0xf]  ;;  %v5816_v61 = vld [vmem:[%s11520_s1 + $0x810] sm:$0xf0]  ;;  %v5054_v62 = vld [vmem:[%s11520_s1 + $0x1e8] sm:$0xf]  ;;  %v5435_v6 = vor.u32 %v7264_v55, %v5432_v56 }
  0x1e   :  { %1838 = vmatpush.bf16.msra.mxu2 %v5623_v20  ;;  %v7175_v0 = vld [vmem:[%s11520_s1 + $0x214] sm:$0xf0]  ;;  %v40_v1 = vld [vmem:[%s11519_s0 + $0x8] sm:$0xff]  ;;  %v43_v2 = vld [vmem:[%s11519_s0 + $0x20] sm:$0xff]  ;;  %v5819_v9 = vor.u32 %v7360_v60, %v5816_v61 }
  0x1f   :  { %v5438_v3 = vld [vmem:[%s11520_s1 + $0x4e8] sm:$0xf]  ;;  %v7271_v4 = vld [vmem:[%s11520_s1 + $0x514] sm:$0xf0]  ;;  %v8025_v5 = vpack.c.bf16 %v43_v2, %v40_v1  ;;  %v7252_v7 = vld [vmem:[%s11520_s1 + $0x484] sm:$0xf]  ;;  %v5055_v10 = vor.u32 %v7175_v0, %v5054_v62 }
  0x20   :  { %1811 = vmatpush.bf16.msra.mxu0 %v4807_v31  ;;  %v5384_v8 = vld [vmem:[%s11520_s1 + $0x4b0] sm:$0xf0]  ;;  %v7348_v11 = vld [vmem:[%s11520_s1 + $0x784] sm:$0xf]  ;;  %v5439_v14 = vor.u32 %v7271_v4, %v5438_v3  ;;  %v5006_v15 = vld [vmem:[%s11520_s1 + $0x188] sm:$0xf] }
  0x21   :  { %1825 = vmatpush.bf16.msra.mxu1 %v5191_v35  ;;  %1853 = vmatpush.bf16.msra.mxu3 %v4811_v39  ;;  %v5768_v12 = vld [vmem:[%s11520_s1 + $0x7b0] sm:$0xf0]  ;;  %v7163_v16 = vld [vmem:[%s11520_s1 + $0x1b4] sm:$0xf0]  ;;  %v44_v17 = vld [vmem:[%s11519_s0 + $0x28] sm:$0xff]  ;;  %v5387_v21 = vor.u32 %v7252_v7, %v5384_v8 }
  0x22   :  { %1839 = vmatpush.bf16.msra.mxu2 %v5575_v36  ;;  %v41_v13 = vld [vmem:[%s11519_s0 + $0x10] sm:$0xff]  ;;  %v5390_v18 = vld [vmem:[%s11520_s1 + $0x488] sm:$0xf]  ;;  %v7259_v19 = vld [vmem:[%s11520_s1 + $0x4b4] sm:$0xf0]  ;;  %v5771_v22 = vor.u32 %v7348_v11, %v5768_v12  ;;  %v5007_v23 = vor.u32 %v7163_v16, %v5006_v15 }
  0x23   :  { %1812 = vmatmul.bf16.vlgmr.msra.gmra.mxu0 %v7998_v57  ;;  %v8059_v20 = vpack.c.bf16 %v44_v17, %v41_v13  ;;  %v7240_v24 = vld [vmem:[%s11520_s1 + $0x424] sm:$0xf]  ;;  %v5336_v25 = vld [vmem:[%s11520_s1 + $0x450] sm:$0xf0]  ;;  %v5391_v27 = vor.u32 %v7259_v19, %v5390_v18  ;;  %v4958_v29 = vld [vmem:[%s11520_s1 + $0x128] sm:$0xf] }
  0x24   :  { %1860 = vmatpush.bf16.msrb.mxu0 %v5531_v40  ;;  %1854 = vmatmul.bf16.vlgmr.msra.gmra.mxu3 %v7998_v57  ;;  %v7336_v26 = vld [vmem:[%s11520_s1 + $0x724] sm:$0xf]  ;;  %v5720_v28 = vld [vmem:[%s11520_s1 + $0x750] sm:$0xf0]  ;;  %v7151_v30 = vld [vmem:[%s11520_s1 + $0x154] sm:$0xf0]  ;;  %v5339_v33 = vor.u32 %v7240_v24, %v5336_v25 }
  0x25   :  { %1874 = vmatpush.bf16.msrb.mxu1 %v5915_v42  ;;  %1902 = vmatpush.bf16.msrb.mxu3 %v5535_v47  ;;  %v5342_v31 = vld [vmem:[%s11520_s1 + $0x428] sm:$0xf]  ;;  %v7247_v32 = vld [vmem:[%s11520_s1 + $0x454] sm:$0xf0]  ;;  %v5723_v34 = vor.u32 %v7336_v26, %v5720_v28  ;;  %v4959_v35 = vor.u32 %v7151_v30, %v4958_v29  ;;  %v7228_v36 = vld [vmem:[%s11520_s1 + $0x3c4] sm:$0xf] }
  0x26   :  { %1888 = vmatpush.bf16.msrb.mxu2 %v5151_v43  ;;  %1826 = vmatmul.bf16.vlgmr.msra.gmra.mxu1 %v8025_v5  ;;  %v5288_v37 = vld [vmem:[%s11520_s1 + $0x3f0] sm:$0xf0]  ;;  %v7324_v38 = vld [vmem:[%s11520_s1 + $0x6c4] sm:$0xf]  ;;  %v5343_v39 = vor.u32 %v7247_v32, %v5342_v31  ;;  %v4910_v41 = vld [vmem:[%s11520_s1 + $0xc8] sm:$0xf] }
  0x27   :  { %1840 = vmatmul.bf16.vlgmr.msra.gmra.mxu2 %v8059_v20  ;;  %v5672_v40 = vld [vmem:[%s11520_s1 + $0x6f0] sm:$0xf0]  ;;  %v7139_v42 = vld [vmem:[%s11520_s1 + $0xf4] sm:$0xf0]  ;;  %v5294_v43 = vld [vmem:[%s11520_s1 + $0x3c8] sm:$0xf]  ;;  %v5291_v45 = vor.u32 %v7228_v36, %v5288_v37 }
  0x28   :  { %1861 = vmatpush.bf16.msrb.mxu0 %v5483_v54  ;;  %v7235_v44 = vld [vmem:[%s11520_s1 + $0x3f4] sm:$0xf0]  ;;  %v5675_v46 = vor.u32 %v7324_v38, %v5672_v40  ;;  %v4911_v47 = vor.u32 %v7139_v42, %v4910_v41  ;;  %v7216_v48 = vld [vmem:[%s11520_s1 + $0x364] sm:$0xf]  ;;  %v5240_v49 = vld [vmem:[%s11520_s1 + $0x390] sm:$0xf0] }
  0x29   :  { %1875 = vmatpush.bf16.msrb.mxu1 %v5867_v58  ;;  %1903 = vmatpush.bf16.msrb.mxu3 %v5487_v63  ;;  %v7312_v50 = vld [vmem:[%s11520_s1 + $0x664] sm:$0xf]  ;;  %v5295_v51 = vor.u32 %v7235_v44, %v5294_v43  ;;  %v5624_v52 = vld [vmem:[%s11520_s1 + $0x690] sm:$0xf0]  ;;  %v4862_v53 = vld [vmem:[%s11520_s1 + $0x68] sm:$0xf]  ;;  %v5243_v58 = vor.u32 %v7216_v48, %v5240_v49 }
  0x2a   :  { %1889 = vmatpush.bf16.msrb.mxu2 %v5103_v59  ;;  %v7127_v54 = vld [vmem:[%s11520_s1 + $0x94] sm:$0xf0]  ;;  %v5246_v55 = vld [vmem:[%s11520_s1 + $0x368] sm:$0xf]  ;;  %v7204_v59 = vld [vmem:[%s11520_s1 + $0x304] sm:$0xf]  ;;  %v5627_v61 = vor.u32 %v7312_v50, %v5624_v52 }
  0x2b   :  { %v7223_v56 = vld [vmem:[%s11520_s1 + $0x394] sm:$0xf0]  ;;  %v5192_v60 = vld [vmem:[%s11520_s1 + $0x330] sm:$0xf0]  ;;  %v4863_v62 = vor.u32 %v7127_v54, %v4862_v53  ;;  %v7300_v63 = vld [vmem:[%s11520_s1 + $0x604] sm:$0xf] }
  0x2c   :  { %1862 = vmatpush.bf16.msrb.mxu0 %v5435_v6  ;;  %v5576_v0 = vld [vmem:[%s11520_s1 + $0x630] sm:$0xf0]  ;;  %v4814_v1 = vld [vmem:[%s11520_s1 + $0x8] sm:$0xf]  ;;  %v5247_v2 = vor.u32 %v7223_v56, %v5246_v55  ;;  %v7115_v3 = vld [vmem:[%s11520_s1 + $0x34] sm:$0xf0] }
  0x2d   :  { %1876 = vmatpush.bf16.msrb.mxu1 %v5819_v9  ;;  %1904 = vmatpush.bf16.msrb.mxu3 %v5439_v14  ;;  %v5198_v4 = vld [vmem:[%s11520_s1 + $0x308] sm:$0xf]  ;;  %v7211_v6 = vld [vmem:[%s11520_s1 + $0x334] sm:$0xf0]  ;;  %v7193_v9 = vld [vmem:[%s11520_s1 + $0x2ac] sm:$0xf]  ;;  %v5579_v14 = vor.u32 %v7300_v63, %v5576_v0  ;;  %v4815_v15 = vor.u32 %v7115_v3, %v4814_v1 }
  0x2e   :  { %1890 = vmatpush.bf16.msrb.mxu2 %v5055_v10  ;;  %v5918_v7 = vld [vmem:[%s11520_s1 + $0x8a8] sm:$0xf]  ;;  %v7391_v8 = vld [vmem:[%s11520_s1 + $0x8d4] sm:$0xf0]  ;;  %v5195_v10 = vor.u32 %v7204_v59, %v5192_v60  ;;  %v5152_v11 = vld [vmem:[%s11520_s1 + $0x2d8] sm:$0xf0]  ;;  %v5199_v18 = vor.u32 %v7211_v6, %v5198_v4 }
  0x2f   :  { %v7289_v12 = vld [vmem:[%s11520_s1 + $0x5ac] sm:$0xf]  ;;  %v5536_v13 = vld [vmem:[%s11520_s1 + $0x5d8] sm:$0xf0]  ;;  %v5919_v19 = vor.u32 %v7391_v8, %v5918_v7  ;;  %v7379_v24 = vld [vmem:[%s11520_s1 + $0x874] sm:$0xf0] }
  0x30   :  { %1863 = vmatpush.bf16.msrb.mxu0 %v5387_v21  ;;  %v7385_v16 = vld [vmem:[%s11520_s1 + $0x8ac] sm:$0xf]  ;;  %v5920_v17 = vld [vmem:[%s11520_s1 + $0x8d8] sm:$0xf0]  ;;  %v5155_v21 = vor.u32 %v7193_v9, %v5152_v11  ;;  %v7367_v36 = vld [vmem:[%s11520_s1 + $0x814] sm:$0xf0] }
  0x31   :  { %1877 = vmatpush.bf16.msrb.mxu1 %v5771_v22  ;;  %1905 = vmatpush.bf16.msrb.mxu3 %v5391_v27  ;;  %v5539_v22 = vor.u32 %v7289_v12, %v5536_v13  ;;  %v7181_v25 = vld [vmem:[%s11520_s1 + $0x24c] sm:$0xf]  ;;  %v5923_v26 = vor.u32 %v7385_v16, %v5920_v17  ;;  %v5104_v27 = vld [vmem:[%s11520_s1 + $0x278] sm:$0xf0]  ;;  %v7355_v48 = vld [vmem:[%s11520_s1 + $0x7b4] sm:$0xf0] }
  0x32   :  { %1891 = vmatpush.bf16.msrb.mxu2 %v5007_v23  ;;  %v5870_v23 = vld [vmem:[%s11520_s1 + $0x848] sm:$0xf]  ;;  %v7277_v28 = vld [vmem:[%s11520_s1 + $0x54c] sm:$0xf]  ;;  %v5488_v29 = vld [vmem:[%s11520_s1 + $0x578] sm:$0xf0] }
  0x33   :  { %v7373_v30 = vld [vmem:[%s11520_s1 + $0x84c] sm:$0xf]  ;;  %v5872_v31 = vld [vmem:[%s11520_s1 + $0x878] sm:$0xf0]  ;;  %v5871_v32 = vor.u32 %v7379_v24, %v5870_v23  ;;  %v5726_v60 = vld [vmem:[%s11520_s1 + $0x728] sm:$0xf] }
  0x34   :  { %1864 = vmatpush.bf16.msrb.mxu0 %v5339_v33  ;;  %v5107_v33 = vor.u32 %v7181_v25, %v5104_v27  ;;  %v7169_v37 = vld [vmem:[%s11520_s1 + $0x1ec] sm:$0xf]  ;;  %v5875_v38 = vor.u32 %v7373_v30, %v5872_v31  ;;  %v5440_v41 = vld [vmem:[%s11520_s1 + $0x518] sm:$0xf0]  ;;  %v5678_v9 = vld [vmem:[%s11520_s1 + $0x6c8] sm:$0xf] }
  0x35   :  { %1878 = vmatpush.bf16.msrb.mxu1 %v5723_v34  ;;  %1906 = vmatpush.bf16.msrb.mxu3 %v5343_v39  ;;  %v5491_v34 = vor.u32 %v7277_v28, %v5488_v29  ;;  %v5056_v39 = vld [vmem:[%s11520_s1 + $0x218] sm:$0xf0]  ;;  %v7265_v40 = vld [vmem:[%s11520_s1 + $0x4ec] sm:$0xf]  ;;  %v7319_v23 = vld [vmem:[%s11520_s1 + $0x694] sm:$0xf0] }
  0x36   :  { %1892 = vmatpush.bf16.msrb.mxu2 %v4959_v35  ;;  %v5822_v35 = vld [vmem:[%s11520_s1 + $0x7e8] sm:$0xf]  ;;  %v7361_v42 = vld [vmem:[%s11520_s1 + $0x7ec] sm:$0xf]  ;;  %v5824_v43 = vld [vmem:[%s11520_s1 + $0x818] sm:$0xf0] }
  0x37   :  { %v5823_v44 = vor.u32 %v7367_v36, %v5822_v35  ;;  %v7157_v49 = vld [vmem:[%s11520_s1 + $0x18c] sm:$0xf]  ;;  %v5827_v50 = vor.u32 %v7361_v42, %v5824_v43  ;;  %v5392_v53 = vld [vmem:[%s11520_s1 + $0x4b8] sm:$0xf0] }
  0x38   :  { %1865 = vmatpush.bf16.msrb.mxu0 %v5291_v45  ;;  %v5059_v45 = vor.u32 %v7169_v37, %v5056_v39  ;;  %v7253_v52 = vld [vmem:[%s11520_s1 + $0x48c] sm:$0xf]  ;;  %v5776_v55 = vld [vmem:[%s11520_s1 + $0x7b8] sm:$0xf0] }
  0x39   :  { %1879 = vmatpush.bf16.msrb.mxu1 %v5675_v46  ;;  %1907 = vmatpush.bf16.msrb.mxu3 %v5295_v51  ;;  %v5443_v46 = vor.u32 %v7265_v40, %v5440_v41  ;;  %v5008_v51 = vld [vmem:[%s11520_s1 + $0x1b8] sm:$0xf0]  ;;  %v7349_v54 = vld [vmem:[%s11520_s1 + $0x78c] sm:$0xf]  ;;  %v5395_v59 = vor.u32 %v7253_v52, %v5392_v53 }
  0x3a   :  { %1893 = vmatpush.bf16.msrb.mxu2 %v4911_v47  ;;  %v5774_v47 = vld [vmem:[%s11520_s1 + $0x788] sm:$0xf]  ;;  %v5779_v63 = vor.u32 %v7349_v54, %v5776_v55  ;;  %v4960_v0 = vld [vmem:[%s11520_s1 + $0x158] sm:$0xf0]  ;;  %v7241_v1 = vld [vmem:[%s11520_s1 + $0x42c] sm:$0xf] }
  0x3b   :  { %v5775_v56 = vor.u32 %v7355_v48, %v5774_v47  ;;  %v7337_v3 = vld [vmem:[%s11520_s1 + $0x72c] sm:$0xf]  ;;  %v5728_v4 = vld [vmem:[%s11520_s1 + $0x758] sm:$0xf0] }
  0x3c   :  { %1866 = vmatpush.bf16.msrb.mxu0 %v5243_v58  ;;  %v5011_v58 = vor.u32 %v7157_v49, %v5008_v51  ;;  %v7133_v11 = vld [vmem:[%s11520_s1 + $0xcc] sm:$0xf]  ;;  %v5731_v12 = vor.u32 %v7337_v3, %v5728_v4  ;;  %v4912_v13 = vld [vmem:[%s11520_s1 + $0xf8] sm:$0xf0] }
  0x3d   :  { %1880 = vmatpush.bf16.msrb.mxu1 %v5627_v61  ;;  %1908 = vmatpush.bf16.msrb.mxu3 %v5247_v2  ;;  %v7343_v61 = vld [vmem:[%s11520_s1 + $0x754] sm:$0xf0]  ;;  %v5344_v2 = vld [vmem:[%s11520_s1 + $0x458] sm:$0xf0]  ;;  %v7325_v16 = vld [vmem:[%s11520_s1 + $0x6cc] sm:$0xf] }
  0x3e   :  { %1894 = vmatpush.bf16.msrb.mxu2 %v4863_v62  ;;  %v7145_v62 = vld [vmem:[%s11520_s1 + $0x12c] sm:$0xf]  ;;  %v5727_v6 = vor.u32 %v7343_v61, %v5726_v60  ;;  %v5347_v8 = vor.u32 %v7241_v1, %v5344_v2  ;;  %v5680_v17 = vld [vmem:[%s11520_s1 + $0x6f8] sm:$0xf0] }
  0x3f   :  { %v4963_v7 = vor.u32 %v7145_v62, %v4960_v0  ;;  %v7121_v24 = vld [vmem:[%s11520_s1 + $0x6c] sm:$0xf]  ;;  %v5683_v25 = vor.u32 %v7325_v16, %v5680_v17  ;;  %v5248_v28 = vld [vmem:[%s11520_s1 + $0x398] sm:$0xf0] }
  0x40   :  { %1867 = vmatpush.bf16.msrb.mxu0 %v5195_v10  ;;  %v7331_v10 = vld [vmem:[%s11520_s1 + $0x6f4] sm:$0xf0]  ;;  %v7217_v27 = vld [vmem:[%s11520_s1 + $0x36c] sm:$0xf]  ;;  %v5632_v30 = vld [vmem:[%s11520_s1 + $0x698] sm:$0xf0] }
  0x41   :  { %1881 = vmatpush.bf16.msrb.mxu1 %v5579_v14  ;;  %1909 = vmatpush.bf16.msrb.mxu3 %v5199_v18  ;;  %v7229_v14 = vld [vmem:[%s11520_s1 + $0x3cc] sm:$0xf]  ;;  %v5679_v18 = vor.u32 %v7331_v10, %v5678_v9 }
  0x42   :  { %1895 = vmatpush.bf16.msrb.mxu2 %v4815_v15  ;;  %v5296_v15 = vld [vmem:[%s11520_s1 + $0x3f8] sm:$0xf0]  ;;  %v7313_v29 = vld [vmem:[%s11520_s1 + $0x66c] sm:$0xf] }
  0x43   :  { %1868 = vmatmul.bf16.vlgmr.msrb.gmra.mxu0 %v8025_v5 }
  0x44   :  { %1916 = vmatpush.bf16.msra.mxu0 %v5919_v19  ;;  %1882 = vmatmul.bf16.vlgmr.msrb.gmra.mxu1 %v8059_v20  ;;  %v4915_v19 = vor.u32 %v7133_v11, %v4912_v13 }
  0x45   :  { %1930 = vmatpush.bf16.msra.mxu1 %v5155_v21  ;;  %1958 = vmatpush.bf16.msra.mxu3 %v5923_v26  ;;  %v5299_v21 = vor.u32 %v7229_v14, %v5296_v15  ;;  %v4864_v26 = vld [vmem:[%s11520_s1 + $0x98] sm:$0xf0] }
  0x46   :  { %1944 = vmatpush.bf16.msra.mxu2 %v5539_v22  ;;  %1910 = vmatmul.bf16.vlgmr.msrb.gmra.mxu3 %v8025_v5  ;;  %v5630_v22 = vld [vmem:[%s11520_s1 + $0x668] sm:$0xf] }
  0x47   :  { %1896 = vmatmul.bf16.vlgmr.msrb.gmra.mxu2 %v7998_v57 }
  0x48   :  { %1917 = vmatpush.bf16.msra.mxu0 %v5871_v32 }
  0x49   :  { %1931 = vmatpush.bf16.msra.mxu1 %v5107_v33  ;;  %1959 = vmatpush.bf16.msra.mxu3 %v5875_v38 }
  0x4a   :  { %1945 = vmatpush.bf16.msra.mxu2 %v5491_v34 }
  0x4c   :  { %1918 = vmatpush.bf16.msra.mxu0 %v5823_v44 }
  0x4d   :  { %1932 = vmatpush.bf16.msra.mxu1 %v5059_v45  ;;  %1960 = vmatpush.bf16.msra.mxu3 %v5827_v50 }
  0x4e   :  { %1946 = vmatpush.bf16.msra.mxu2 %v5443_v46 }
  0x50   :  { %1919 = vmatpush.bf16.msra.mxu0 %v5775_v56 }
  0x51   :  { %1933 = vmatpush.bf16.msra.mxu1 %v5011_v58  ;;  %1961 = vmatpush.bf16.msra.mxu3 %v5779_v63 }
  0x52   :  { %1947 = vmatpush.bf16.msra.mxu2 %v5395_v59 }
  0x54   :  { %1920 = vmatpush.bf16.msra.mxu0 %v5727_v6 }
  0x55   :  { %1934 = vmatpush.bf16.msra.mxu1 %v4963_v7  ;;  %1962 = vmatpush.bf16.msra.mxu3 %v5731_v12 }
  0x56   :  { %1948 = vmatpush.bf16.msra.mxu2 %v5347_v8 }
  0x57   :  { %10 = vsyncpa [#allocation3], 0  ;;  %v5631_v31 = vor.u32 %v7319_v23, %v5630_v22  ;;  %v5582_v32 = vld [vmem:[%s11520_s1 + $0x608] sm:$0xf]  ;;  %v7307_v33 = vld [vmem:[%s11520_s1 + $0x634] sm:$0xf0]  ;;  %v4867_v34 = vor.u32 %v7121_v24, %v4864_v26  ;;  %v5251_v35 = vor.u32 %v7217_v27, %v5248_v28  ;;  %v5635_v39 = vor.u32 %v7313_v29, %v5632_v30 }
  0x58   :  { %1921 = vmatpush.bf16.msra.mxu0 %v5679_v18  ;;  %v7109_v36 = vld [vmem:[%s11520_s1 + $0xc] sm:$0xf]  ;;  %v4816_v37 = vld [vmem:[%s11520_s1 + $0x38] sm:$0xf0]  ;;  %v5158_v43 = vld [vmem:[%s11520_s1 + $0x2b0] sm:$0xf]  ;;  %v5583_v46 = vor.u32 %v7307_v33, %v5582_v32 }
  0x59   :  { %1935 = vmatpush.bf16.msra.mxu1 %v4915_v19  ;;  %v7205_v38 = vld [vmem:[%s11520_s1 + $0x30c] sm:$0xf]  ;;  %1963 = vmatpush.bf16.msra.mxu3 %v5683_v25  ;;  %v5200_v40 = vld [vmem:[%s11520_s1 + $0x338] sm:$0xf0]  ;;  %v7200_v44 = vld [vmem:[%s11520_s1 + $0x2dc] sm:$0xf0]  ;;  %v4819_v50 = vor.u32 %v7109_v36, %v4816_v37 }
  0x5a   :  { %1949 = vmatpush.bf16.msra.mxu2 %v5299_v21  ;;  %v7301_v41 = vld [vmem:[%s11520_s1 + $0x60c] sm:$0xf]  ;;  %v5584_v42 = vld [vmem:[%s11520_s1 + $0x638] sm:$0xf0]  ;;  %v5542_v45 = vld [vmem:[%s11520_s1 + $0x5b0] sm:$0xf]  ;;  %v5203_v51 = vor.u32 %v7205_v38, %v5200_v40  ;;  %v5159_v55 = vor.u32 %v7200_v44, %v5158_v43 }
  0x5b   :  { %v7296_v47 = vld [vmem:[%s11520_s1 + $0x5dc] sm:$0xf0]  ;;  %v5926_v48 = vld [vmem:[%s11520_s1 + $0x8b0] sm:$0xf]  ;;  %v7194_v52 = vld [vmem:[%s11520_s1 + $0x2b4] sm:$0xf]  ;;  %v5587_v54 = vor.u32 %v7301_v41, %v5584_v42 }
  0x5c   :  { %1922 = vmatpush.bf16.msra.mxu0 %v5631_v31  ;;  %v7392_v49 = vld [vmem:[%s11520_s1 + $0x8dc] sm:$0xf0]  ;;  %v5160_v53 = vld [vmem:[%s11520_s1 + $0x2e0] sm:$0xf0]  ;;  %v5543_v56 = vor.u32 %v7296_v47, %v5542_v45  ;;  %v5110_v59 = vld [vmem:[%s11520_s1 + $0x250] sm:$0xf] }
  0x5d   :  { %1936 = vmatpush.bf16.msra.mxu1 %v4867_v34  ;;  %1964 = vmatpush.bf16.msra.mxu3 %v5635_v39  ;;  %v5927_v58 = vor.u32 %v7392_v49, %v5926_v48  ;;  %v7188_v60 = vld [vmem:[%s11520_s1 + $0x27c] sm:$0xf0]  ;;  %v5494_v61 = vld [vmem:[%s11520_s1 + $0x550] sm:$0xf]  ;;  %v5163_v62 = vor.u32 %v7194_v52, %v5160_v53  ;;  %v7182_v2 = vld [vmem:[%s11520_s1 + $0x254] sm:$0xf] }
  0x5e   :  { %1950 = vmatpush.bf16.msra.mxu2 %v5251_v35  ;;  %v7284_v63 = vld [vmem:[%s11520_s1 + $0x57c] sm:$0xf0]  ;;  %v5878_v0 = vld [vmem:[%s11520_s1 + $0x850] sm:$0xf]  ;;  %v5112_v3 = vld [vmem:[%s11520_s1 + $0x280] sm:$0xf0]  ;;  %v5111_v4 = vor.u32 %v7188_v60, %v5110_v59 }
  0x5f   :  { %v7380_v1 = vld [vmem:[%s11520_s1 + $0x87c] sm:$0xf0]  ;;  %v5495_v6 = vor.u32 %v7284_v63, %v5494_v61  ;;  %v5062_v8 = vld [vmem:[%s11520_s1 + $0x1f0] sm:$0xf]  ;;  %v5115_v11 = vor.u32 %v7182_v2, %v5112_v3  ;;  %v7170_v15 = vld [vmem:[%s11520_s1 + $0x1f4] sm:$0xf] }
  0x60   :  { %1923 = vmatpush.bf16.msra.mxu0 %v5583_v46  ;;  %v5879_v7 = vor.u32 %v7380_v1, %v5878_v0  ;;  %v7176_v9 = vld [vmem:[%s11520_s1 + $0x21c] sm:$0xf0]  ;;  %v5446_v10 = vld [vmem:[%s11520_s1 + $0x4f0] sm:$0xf]  ;;  %v5064_v16 = vld [vmem:[%s11520_s1 + $0x220] sm:$0xf0] }
  0x61   :  { %1937 = vmatpush.bf16.msra.mxu1 %v4819_v50  ;;  %1965 = vmatpush.bf16.msra.mxu3 %v5587_v54  ;;  %v7272_v12 = vld [vmem:[%s11520_s1 + $0x51c] sm:$0xf0]  ;;  %v5830_v13 = vld [vmem:[%s11520_s1 + $0x7f0] sm:$0xf]  ;;  %v5063_v17 = vor.u32 %v7176_v9, %v5062_v8  ;;  %v5067_v24 = vor.u32 %v7170_v15, %v5064_v16  ;;  %v7158_v28 = vld [vmem:[%s11520_s1 + $0x194] sm:$0xf] }
  0x62   :  { %1951 = vmatpush.bf16.msra.mxu2 %v5203_v51  ;;  %v7368_v14 = vld [vmem:[%s11520_s1 + $0x81c] sm:$0xf0]  ;;  %v5447_v18 = vor.u32 %v7272_v12, %v5446_v10  ;;  %v5014_v21 = vld [vmem:[%s11520_s1 + $0x190] sm:$0xf]  ;;  %v5016_v29 = vld [vmem:[%s11520_s1 + $0x1c0] sm:$0xf0] }
  0x63   :  { %1924 = vmatmul.bf16.vlgmr.msra.gmra.mxu0 %v8059_v20  ;;  %v5831_v19 = vor.u32 %v7368_v14, %v5830_v13  ;;  %v7164_v22 = vld [vmem:[%s11520_s1 + $0x1bc] sm:$0xf0]  ;;  %v5398_v23 = vld [vmem:[%s11520_s1 + $0x490] sm:$0xf]  ;;  %v5019_v36 = vor.u32 %v7158_v28, %v5016_v29  ;;  %v7146_v40 = vld [vmem:[%s11520_s1 + $0x134] sm:$0xf] }
  0x64   :  { %1972 = vmatpush.bf16.msrb.mxu0 %v5159_v55  ;;  %1966 = vmatmul.bf16.vlgmr.msra.gmra.mxu3 %v8059_v20  ;;  %v7260_v25 = vld [vmem:[%s11520_s1 + $0x4bc] sm:$0xf0]  ;;  %v5782_v26 = vld [vmem:[%s11520_s1 + $0x790] sm:$0xf]  ;;  %v5015_v30 = vor.u32 %v7164_v22, %v5014_v21  ;;  %v4968_v41 = vld [vmem:[%s11520_s1 + $0x160] sm:$0xf0] }
  0x65   :  { %1986 = vmatpush.bf16.msrb.mxu1 %v5543_v56  ;;  %2014 = vmatpush.bf16.msrb.mxu3 %v5163_v62  ;;  %v7356_v27 = vld [vmem:[%s11520_s1 + $0x7bc] sm:$0xf0]  ;;  %v5399_v31 = vor.u32 %v7260_v25, %v5398_v23  ;;  %v4966_v33 = vld [vmem:[%s11520_s1 + $0x130] sm:$0xf]  ;;  %v4971_v48 = vor.u32 %v7146_v40, %v4968_v41  ;;  %v7134_v52 = vld [vmem:[%s11520_s1 + $0xd4] sm:$0xf] }
  0x66   :  { %2000 = vmatpush.bf16.msrb.mxu2 %v5927_v58  ;;  %1938 = vmatmul.bf16.vlgmr.msra.gmra.mxu1 %v7998_v57  ;;  %v5783_v32 = vor.u32 %v7356_v27, %v5782_v26  ;;  %v7152_v34 = vld [vmem:[%s11520_s1 + $0x15c] sm:$0xf0]  ;;  %v5350_v35 = vld [vmem:[%s11520_s1 + $0x430] sm:$0xf]  ;;  %v4920_v53 = vld [vmem:[%s11520_s1 + $0x100] sm:$0xf0] }
  0x67   :  { %1952 = vmatmul.bf16.vlgmr.msra.gmra.mxu2 %v8025_v5  ;;  %v7248_v37 = vld [vmem:[%s11520_s1 + $0x45c] sm:$0xf0]  ;;  %v5734_v38 = vld [vmem:[%s11520_s1 + $0x730] sm:$0xf]  ;;  %v4967_v42 = vor.u32 %v7152_v34, %v4966_v33  ;;  %v4923_v61 = vor.u32 %v7134_v52, %v4920_v53  ;;  %v7122_v1 = vld [vmem:[%s11520_s1 + $0x74] sm:$0xf] }
  0x68   :  { %1973 = vmatpush.bf16.msrb.mxu0 %v5111_v4  ;;  %v7344_v39 = vld [vmem:[%s11520_s1 + $0x75c] sm:$0xf0]  ;;  %v5351_v43 = vor.u32 %v7248_v37, %v5350_v35  ;;  %v4918_v45 = vld [vmem:[%s11520_s1 + $0xd0] sm:$0xf]  ;;  %v4872_v2 = vld [vmem:[%s11520_s1 + $0xa0] sm:$0xf0] }
  0x69   :  { %1987 = vmatpush.bf16.msrb.mxu1 %v5495_v6  ;;  %2015 = vmatpush.bf16.msrb.mxu3 %v5115_v11  ;;  %v5735_v44 = vor.u32 %v7344_v39, %v5734_v38  ;;  %v7140_v46 = vld [vmem:[%s11520_s1 + $0xfc] sm:$0xf0]  ;;  %v5302_v47 = vld [vmem:[%s11520_s1 + $0x3d0] sm:$0xf]  ;;  %v4875_v12 = vor.u32 %v7122_v1, %v4872_v2  ;;  %v7110_v14 = vld [vmem:[%s11520_s1 + $0x14] sm:$0xf] }
  0x6a   :  { %2001 = vmatpush.bf16.msrb.mxu2 %v5879_v7  ;;  %v7236_v49 = vld [vmem:[%s11520_s1 + $0x3fc] sm:$0xf0]  ;;  %v5686_v50 = vld [vmem:[%s11520_s1 + $0x6d0] sm:$0xf]  ;;  %v4919_v54 = vor.u32 %v7140_v46, %v4918_v45  ;;  %v4824_v15 = vld [vmem:[%s11520_s1 + $0x40] sm:$0xf0] }
  0x6b   :  { %v7332_v51 = vld [vmem:[%s11520_s1 + $0x6fc] sm:$0xf0]  ;;  %v5303_v55 = vor.u32 %v7236_v49, %v5302_v47  ;;  %v4870_v58 = vld [vmem:[%s11520_s1 + $0x70] sm:$0xf]  ;;  %v7290_v16 = vld [vmem:[%s11520_s1 + $0x5b4] sm:$0xf]  ;;  %v4827_v28 = vor.u32 %v7110_v14, %v4824_v15 }
  0x6c   :  { %1974 = vmatpush.bf16.msrb.mxu0 %v5063_v17  ;;  %v5687_v56 = vor.u32 %v7332_v51, %v5686_v50  ;;  %v7128_v59 = vld [vmem:[%s11520_s1 + $0x9c] sm:$0xf0]  ;;  %v5254_v60 = vld [vmem:[%s11520_s1 + $0x370] sm:$0xf]  ;;  %v5544_v17 = vld [vmem:[%s11520_s1 + $0x5e0] sm:$0xf0] }
  0x6d   :  { %1988 = vmatpush.bf16.msrb.mxu1 %v5447_v18  ;;  %2016 = vmatpush.bf16.msrb.mxu3 %v5067_v24  ;;  %v7224_v62 = vld [vmem:[%s11520_s1 + $0x39c] sm:$0xf0]  ;;  %v5638_v63 = vld [vmem:[%s11520_s1 + $0x670] sm:$0xf]  ;;  %v4871_v3 = vor.u32 %v7128_v59, %v4870_v58  ;;  %v7386_v18 = vld [vmem:[%s11520_s1 + $0x8b4] sm:$0xf]  ;;  %v5547_v29 = vor.u32 %v7290_v16, %v5544_v17 }
  0x6e   :  { %2002 = vmatpush.bf16.msrb.mxu2 %v5831_v19  ;;  %v7320_v0 = vld [vmem:[%s11520_s1 + $0x69c] sm:$0xf0]  ;;  %v4822_v4 = vld [vmem:[%s11520_s1 + $0x10] sm:$0xf]  ;;  %v5255_v7 = vor.u32 %v7224_v62, %v5254_v60  ;;  %v5928_v21 = vld [vmem:[%s11520_s1 + $0x8e0] sm:$0xf0] }
  0x6f   :  { %v7116_v6 = vld [vmem:[%s11520_s1 + $0x3c] sm:$0xf0]  ;;  %v5639_v8 = vor.u32 %v7320_v0, %v5638_v63  ;;  %v5206_v9 = vld [vmem:[%s11520_s1 + $0x310] sm:$0xf]  ;;  %v5166_v22 = vld [vmem:[%s11520_s1 + $0x2b8] sm:$0xf] }
  0x70   :  { %1975 = vmatpush.bf16.msrb.mxu0 %v5015_v30  ;;  %v7212_v10 = vld [vmem:[%s11520_s1 + $0x33c] sm:$0xf0]  ;;  %v5590_v11 = vld [vmem:[%s11520_s1 + $0x610] sm:$0xf]  ;;  %v4823_v19 = vor.u32 %v7116_v6, %v4822_v4  ;;  %v7201_v23 = vld [vmem:[%s11520_s1 + $0x2e4] sm:$0xf0]  ;;  %v5931_v30 = vor.u32 %v7386_v18, %v5928_v21 }
  0x71   :  { %1989 = vmatpush.bf16.msrb.mxu1 %v5399_v31  ;;  %2017 = vmatpush.bf16.msrb.mxu3 %v5019_v36  ;;  %v7308_v13 = vld [vmem:[%s11520_s1 + $0x63c] sm:$0xf0]  ;;  %v5207_v24 = vor.u32 %v7212_v10, %v5206_v9  ;;  %v5550_v26 = vld [vmem:[%s11520_s1 + $0x5b8] sm:$0xf]  ;;  %v7297_v27 = vld [vmem:[%s11520_s1 + $0x5e4] sm:$0xf0]  ;;  %v5167_v31 = vor.u32 %v7201_v23, %v5166_v22 }
  0x72   :  { %2003 = vmatpush.bf16.msrb.mxu2 %v5783_v32  ;;  %v5591_v25 = vor.u32 %v7308_v13, %v5590_v11  ;;  %v7278_v32 = vld [vmem:[%s11520_s1 + $0x554] sm:$0xf]  ;;  %v5496_v33 = vld [vmem:[%s11520_s1 + $0x580] sm:$0xf0]  ;;  %v5551_v35 = vor.u32 %v7297_v27, %v5550_v26  ;;  %v5118_v37 = vld [vmem:[%s11520_s1 + $0x258] sm:$0xf] }
  0x73   :  { %v7374_v34 = vld [vmem:[%s11520_s1 + $0x854] sm:$0xf]  ;;  %v5880_v36 = vld [vmem:[%s11520_s1 + $0x880] sm:$0xf0]  ;;  %v7189_v38 = vld [vmem:[%s11520_s1 + $0x284] sm:$0xf0]  ;;  %v5499_v41 = vor.u32 %v7278_v32, %v5496_v33 }
  0x74   :  { %1976 = vmatpush.bf16.msrb.mxu0 %v4967_v42  ;;  %v5502_v39 = vld [vmem:[%s11520_s1 + $0x558] sm:$0xf]  ;;  %v7285_v40 = vld [vmem:[%s11520_s1 + $0x584] sm:$0xf0]  ;;  %v5883_v42 = vor.u32 %v7374_v34, %v5880_v36  ;;  %v5448_v45 = vld [vmem:[%s11520_s1 + $0x520] sm:$0xf0] }
  0x75   :  { %1990 = vmatpush.bf16.msrb.mxu1 %v5351_v43  ;;  %2018 = vmatpush.bf16.msrb.mxu3 %v4971_v48  ;;  %v5119_v43 = vor.u32 %v7189_v38, %v5118_v37  ;;  %v7362_v46 = vld [vmem:[%s11520_s1 + $0x7f4] sm:$0xf]  ;;  %v5503_v47 = vor.u32 %v7285_v40, %v5502_v39  ;;  %v5832_v48 = vld [vmem:[%s11520_s1 + $0x820] sm:$0xf0]  ;;  %v5070_v49 = vld [vmem:[%s11520_s1 + $0x1f8] sm:$0xf] }
  0x76   :  { %2004 = vmatpush.bf16.msrb.mxu2 %v5735_v44  ;;  %v7266_v44 = vld [vmem:[%s11520_s1 + $0x4f4] sm:$0xf]  ;;  %v7177_v50 = vld [vmem:[%s11520_s1 + $0x224] sm:$0xf0]  ;;  %v5454_v51 = vld [vmem:[%s11520_s1 + $0x4f8] sm:$0xf] }
  0x77   :  { %v7273_v52 = vld [vmem:[%s11520_s1 + $0x524] sm:$0xf0]  ;;  %v5451_v53 = vor.u32 %v7266_v44, %v5448_v45  ;;  %v5400_v58 = vld [vmem:[%s11520_s1 + $0x4c0] sm:$0xf0]  ;;  %v7350_v59 = vld [vmem:[%s11520_s1 + $0x794] sm:$0xf] }
  0x78   :  { %1977 = vmatpush.bf16.msrb.mxu0 %v4919_v54  ;;  %v5835_v54 = vor.u32 %v7362_v46, %v5832_v48  ;;  %v5455_v60 = vor.u32 %v7273_v52, %v5454_v51  ;;  %v5022_v62 = vld [vmem:[%s11520_s1 + $0x198] sm:$0xf]  ;;  %v7165_v63 = vld [vmem:[%s11520_s1 + $0x1c4] sm:$0xf0]  ;;  %v7242_v6 = vld [vmem:[%s11520_s1 + $0x434] sm:$0xf] }
  0x79   :  { %1991 = vmatpush.bf16.msrb.mxu1 %v5303_v55  ;;  %2019 = vmatpush.bf16.msrb.mxu3 %v4923_v61  ;;  %v5071_v55 = vor.u32 %v7177_v50, %v5070_v49  ;;  %v5784_v61 = vld [vmem:[%s11520_s1 + $0x7c0] sm:$0xf0]  ;;  %v5406_v0 = vld [vmem:[%s11520_s1 + $0x498] sm:$0xf]  ;;  %v7261_v1 = vld [vmem:[%s11520_s1 + $0x4c4] sm:$0xf0]  ;;  %v5023_v4 = vor.u32 %v7165_v63, %v5022_v62 }
  0x7a   :  { %2005 = vmatpush.bf16.msrb.mxu2 %v5687_v56  ;;  %v7254_v56 = vld [vmem:[%s11520_s1 + $0x494] sm:$0xf]  ;;  %v5407_v9 = vor.u32 %v7261_v1, %v5406_v0  ;;  %v5736_v10 = vld [vmem:[%s11520_s1 + $0x760] sm:$0xf0]  ;;  %v4974_v11 = vld [vmem:[%s11520_s1 + $0x138] sm:$0xf] }
  0x7b   :  { %v5403_v2 = vor.u32 %v7254_v56, %v5400_v58  ;;  %v5358_v13 = vld [vmem:[%s11520_s1 + $0x438] sm:$0xf]  ;;  %v7249_v14 = vld [vmem:[%s11520_s1 + $0x464] sm:$0xf0]  ;;  %v7230_v18 = vld [vmem:[%s11520_s1 + $0x3d4] sm:$0xf] }
  0x7c   :  { %1978 = vmatpush.bf16.msrb.mxu0 %v4871_v3  ;;  %v5787_v3 = vor.u32 %v7350_v59, %v5784_v61  ;;  %v7326_v21 = vld [vmem:[%s11520_s1 + $0x6d4] sm:$0xf]  ;;  %v5359_v22 = vor.u32 %v7249_v14, %v5358_v13  ;;  %v5688_v23 = vld [vmem:[%s11520_s1 + $0x700] sm:$0xf0]  ;;  %v5310_v26 = vld [vmem:[%s11520_s1 + $0x3d8] sm:$0xf] }
  0x7d   :  { %1992 = vmatpush.bf16.msrb.mxu1 %v5255_v7  ;;  %2020 = vmatpush.bf16.msrb.mxu3 %v4875_v12  ;;  %v5352_v7 = vld [vmem:[%s11520_s1 + $0x460] sm:$0xf0]  ;;  %v7153_v12 = vld [vmem:[%s11520_s1 + $0x164] sm:$0xf0]  ;;  %v7314_v33 = vld [vmem:[%s11520_s1 + $0x674] sm:$0xf] }
  0x7e   :  { %2006 = vmatpush.bf16.msrb.mxu2 %v5639_v8  ;;  %v7338_v8 = vld [vmem:[%s11520_s1 + $0x734] sm:$0xf]  ;;  %v5355_v15 = vor.u32 %v7242_v6, %v5352_v7  ;;  %v4975_v17 = vor.u32 %v7153_v12, %v4974_v11  ;;  %v7237_v27 = vld [vmem:[%s11520_s1 + $0x404] sm:$0xf0]  ;;  %v5256_v32 = vld [vmem:[%s11520_s1 + $0x3a0] sm:$0xf0] }
  0x7f   :  { %v5739_v16 = vor.u32 %v7338_v8, %v5736_v10  ;;  %v5311_v34 = vor.u32 %v7237_v27, %v5310_v26  ;;  %v4878_v36 = vld [vmem:[%s11520_s1 + $0x78] sm:$0xf]  ;;  %v7129_v37 = vld [vmem:[%s11520_s1 + $0xa4] sm:$0xf0]  ;;  %v7302_v45 = vld [vmem:[%s11520_s1 + $0x614] sm:$0xf] }
  0x80   :  { %1979 = vmatpush.bf16.msrb.mxu0 %v4823_v19  ;;  %v5304_v19 = vld [vmem:[%s11520_s1 + $0x400] sm:$0xf0]  ;;  %v5262_v38 = vld [vmem:[%s11520_s1 + $0x378] sm:$0xf]  ;;  %v7225_v39 = vld [vmem:[%s11520_s1 + $0x3a4] sm:$0xf0]  ;;  %v4879_v44 = vor.u32 %v7129_v37, %v4878_v36 }
  0x81   :  { %1993 = vmatpush.bf16.msrb.mxu1 %v5207_v24  ;;  %2021 = vmatpush.bf16.msrb.mxu3 %v4827_v28  ;;  %v4926_v24 = vld [vmem:[%s11520_s1 + $0xd8] sm:$0xf]  ;;  %v5307_v28 = vor.u32 %v7230_v18, %v5304_v19  ;;  %v5592_v46 = vld [vmem:[%s11520_s1 + $0x640] sm:$0xf0]  ;;  %v5263_v48 = vor.u32 %v7225_v39, %v5262_v38  ;;  %v7117_v49 = vld [vmem:[%s11520_s1 + $0x44] sm:$0xf0] }
  0x82   :  { %2007 = vmatpush.bf16.msrb.mxu2 %v5591_v25  ;;  %v7141_v25 = vld [vmem:[%s11520_s1 + $0x104] sm:$0xf0]  ;;  %v5214_v50 = vld [vmem:[%s11520_s1 + $0x318] sm:$0xf]  ;;  %v5168_v56 = vld [vmem:[%s11520_s1 + $0x2e8] sm:$0xf0] }
  0x83   :  { %1980 = vmatmul.bf16.vlgmr.msrb.gmra.mxu0 %v7998_v57  ;;  %v7213_v51 = vld [vmem:[%s11520_s1 + $0x344] sm:$0xf0]  ;;  %v5934_v52 = vld [vmem:[%s11520_s1 + $0x8b8] sm:$0xf]  ;;  %v7291_v58 = vld [vmem:[%s11520_s1 + $0x5bc] sm:$0xf] }
  0x84   :  { %2028 = vmatpush.bf16.msra.mxu0 %v5547_v29  ;;  %1994 = vmatmul.bf16.vlgmr.msrb.gmra.mxu1 %v8025_v5  ;;  %v5691_v29 = vor.u32 %v7326_v21, %v5688_v23  ;;  %v5552_v59 = vld [vmem:[%s11520_s1 + $0x5e8] sm:$0xf0]  ;;  %v7387_v62 = vld [vmem:[%s11520_s1 + $0x8bc] sm:$0xf]  ;;  %v5215_v0 = vor.u32 %v7213_v51, %v5214_v50  ;;  %v7381_v6 = vld [vmem:[%s11520_s1 + $0x884] sm:$0xf0] }
  0x85   :  { %2042 = vmatpush.bf16.msra.mxu1 %v5931_v30  ;;  %2070 = vmatpush.bf16.msra.mxu3 %v5551_v35  ;;  %v4927_v30 = vor.u32 %v7141_v25, %v4926_v24  ;;  %v5640_v35 = vld [vmem:[%s11520_s1 + $0x6a0] sm:$0xf0]  ;;  %v5936_v63 = vld [vmem:[%s11520_s1 + $0x8e8] sm:$0xf0]  ;;  %v7183_v7 = vld [vmem:[%s11520_s1 + $0x25c] sm:$0xf] }
  0x86   :  { %2056 = vmatpush.bf16.msra.mxu2 %v5167_v31  ;;  %2022 = vmatmul.bf16.vlgmr.msrb.gmra.mxu3 %v7998_v57  ;;  %v7218_v31 = vld [vmem:[%s11520_s1 + $0x374] sm:$0xf]  ;;  %v5939_v8 = vor.u32 %v7387_v62, %v5936_v63  ;;  %v7279_v10 = vld [vmem:[%s11520_s1 + $0x55c] sm:$0xf]  ;;  %v5504_v11 = vld [vmem:[%s11520_s1 + $0x588] sm:$0xf0] }
  0x87   :  { %2008 = vmatmul.bf16.vlgmr.msrb.gmra.mxu2 %v8059_v20  ;;  %v5259_v40 = vor.u32 %v7218_v31, %v5256_v32  ;;  %v7375_v12 = vld [vmem:[%s11520_s1 + $0x85c] sm:$0xf]  ;;  %v5888_v13 = vld [vmem:[%s11520_s1 + $0x888] sm:$0xf0]  ;;  %v7369_v18 = vld [vmem:[%s11520_s1 + $0x824] sm:$0xf0] }
  0x88   :  { %2029 = vmatpush.bf16.msra.mxu0 %v5499_v41  ;;  %v7206_v41 = vld [vmem:[%s11520_s1 + $0x314] sm:$0xf]  ;;  %v7171_v19 = vld [vmem:[%s11520_s1 + $0x1fc] sm:$0xf]  ;;  %v5891_v21 = vor.u32 %v7375_v12, %v5888_v13  ;;  %v5456_v24 = vld [vmem:[%s11520_s1 + $0x528] sm:$0xf0] }
  0x89   :  { %2043 = vmatpush.bf16.msra.mxu1 %v5883_v42  ;;  %2071 = vmatpush.bf16.msra.mxu3 %v5503_v47  ;;  %v5208_v42 = vld [vmem:[%s11520_s1 + $0x340] sm:$0xf0]  ;;  %v4830_v47 = vld [vmem:[%s11520_s1 + $0x18] sm:$0xf]  ;;  %v7267_v23 = vld [vmem:[%s11520_s1 + $0x4fc] sm:$0xf] }
  0x8a   :  { %2057 = vmatpush.bf16.msra.mxu2 %v5119_v43  ;;  %v5643_v43 = vor.u32 %v7314_v33, %v5640_v35  ;;  %v4831_v61 = vor.u32 %v7117_v49, %v4830_v47  ;;  %v7363_v25 = vld [vmem:[%s11520_s1 + $0x7fc] sm:$0xf]  ;;  %v5840_v26 = vld [vmem:[%s11520_s1 + $0x828] sm:$0xf0]  ;;  %v7357_v31 = vld [vmem:[%s11520_s1 + $0x7c4] sm:$0xf0] }
  0x8b   :  { %v7159_v32 = vld [vmem:[%s11520_s1 + $0x19c] sm:$0xf]  ;;  %v5843_v33 = vor.u32 %v7363_v25, %v5840_v26  ;;  %v5408_v36 = vld [vmem:[%s11520_s1 + $0x4c8] sm:$0xf0]  ;;  %v5174_v26 = vld [vmem:[%s11520_s1 + $0x2c0] sm:$0xf] }
  0x8c   :  { %2030 = vmatpush.bf16.msra.mxu0 %v5451_v53  ;;  %v7393_v53 = vld [vmem:[%s11520_s1 + $0x8e4] sm:$0xf0]  ;;  %v7255_v35 = vld [vmem:[%s11520_s1 + $0x49c] sm:$0xf]  ;;  %v5792_v38 = vld [vmem:[%s11520_s1 + $0x7c8] sm:$0xf0] }
  0x8d   :  { %2044 = vmatpush.bf16.msra.mxu1 %v5835_v54  ;;  %2072 = vmatpush.bf16.msra.mxu3 %v5455_v60  ;;  %v7195_v54 = vld [vmem:[%s11520_s1 + $0x2bc] sm:$0xf]  ;;  %v5595_v60 = vor.u32 %v7302_v45, %v5592_v46  ;;  %v5935_v1 = vor.u32 %v7393_v53, %v5934_v52  ;;  %v4976_v46 = vld [vmem:[%s11520_s1 + $0x168] sm:$0xf0]  ;;  %s4792_s15 = sshll.u32 %s11524_s5, 4  ;;  %s7714_s16 = smov 384   ;;  %s4793_s15 = int_to_ptr.hbm [resolvable:$true] %s4792_s15 }
  0x8e   :  { %2058 = vmatpush.bf16.msra.mxu2 %v5071_v55  ;;  %v5211_v55 = vor.u32 %v7206_v41, %v5208_v42  ;;  %v7351_v37 = vld [vmem:[%s11520_s1 + $0x79c] sm:$0xf]  ;;  %v5411_v41 = vor.u32 %v7255_v35, %v5408_v36  ;;  %v5742_v42 = vld [vmem:[%s11520_s1 + $0x738] sm:$0xf]  ;;  %v5744_v50 = vld [vmem:[%s11520_s1 + $0x768] sm:$0xf0] }
  0x8f   :  { %v5795_v45 = vor.u32 %v7351_v37, %v5792_v38  ;;  %v7243_v47 = vld [vmem:[%s11520_s1 + $0x43c] sm:$0xf]  ;;  %v5696_v63 = vld [vmem:[%s11520_s1 + $0x708] sm:$0xf0]  ;;  %v7196_v35 = vld [vmem:[%s11520_s1 + $0x2c4] sm:$0xf] }
  0x90   :  { %2031 = vmatpush.bf16.msra.mxu0 %v5403_v2  ;;  %v5171_v2 = vor.u32 %v7195_v54, %v5168_v56  ;;  %v7339_v49 = vld [vmem:[%s11520_s1 + $0x73c] sm:$0xf]  ;;  %v5694_v54 = vld [vmem:[%s11520_s1 + $0x6d8] sm:$0xf]  ;;  %v5648_v12 = vld [vmem:[%s11520_s1 + $0x6a8] sm:$0xf0] }
  0x91   :  { %2045 = vmatpush.bf16.msra.mxu1 %v5787_v3  ;;  %2073 = vmatpush.bf16.msra.mxu3 %v5407_v9  ;;  %v5555_v3 = vor.u32 %v7291_v58, %v5552_v59  ;;  %v5120_v9 = vld [vmem:[%s11520_s1 + $0x288] sm:$0xf0]  ;;  %v7135_v56 = vld [vmem:[%s11520_s1 + $0xdc] sm:$0xf]  ;;  %v5747_v58 = vor.u32 %v7339_v49, %v5744_v50  ;;  %v5176_v36 = vld [vmem:[%s11520_s1 + $0x2f0] sm:$0xf0] }
  0x92   :  { %2059 = vmatpush.bf16.msra.mxu2 %v5023_v4  ;;  %v5886_v4 = vld [vmem:[%s11520_s1 + $0x858] sm:$0xf]  ;;  %v4928_v59 = vld [vmem:[%s11520_s1 + $0x108] sm:$0xf0]  ;;  %v7327_v62 = vld [vmem:[%s11520_s1 + $0x6dc] sm:$0xf] }
  0x93   :  { %v5887_v14 = vor.u32 %v7381_v6, %v5886_v4  ;;  %v7321_v4 = vld [vmem:[%s11520_s1 + $0x6a4] sm:$0xf0]  ;;  %v7123_v6 = vld [vmem:[%s11520_s1 + $0x7c] sm:$0xf]  ;;  %v5600_v25 = vld [vmem:[%s11520_s1 + $0x648] sm:$0xf0] }
  0x94   :  { %2032 = vmatpush.bf16.msra.mxu0 %v5355_v15  ;;  %v5123_v15 = vor.u32 %v7183_v7, %v5120_v9  ;;  %v5699_v7 = vor.u32 %v7327_v62, %v5696_v63  ;;  %v7219_v9 = vld [vmem:[%s11520_s1 + $0x37c] sm:$0xf]  ;;  %v5128_v49 = vld [vmem:[%s11520_s1 + $0x290] sm:$0xf0]  ;;  %s7715_s17 = smov 24  }
  0x95   :  { %2046 = vmatpush.bf16.msra.mxu1 %v5739_v16  ;;  %2074 = vmatpush.bf16.msra.mxu3 %v5359_v22  ;;  %v5507_v16 = vor.u32 %v7279_v10, %v5504_v11  ;;  %v5072_v22 = vld [vmem:[%s11520_s1 + $0x228] sm:$0xf0]  ;;  %v7315_v11 = vld [vmem:[%s11520_s1 + $0x67c] sm:$0xf]  ;;  %v5080_v62 = vld [vmem:[%s11520_s1 + $0x230] sm:$0xf0] }
  0x96   :  { %2060 = vmatpush.bf16.msra.mxu2 %v4975_v17  ;;  %v5838_v17 = vld [vmem:[%s11520_s1 + $0x7f8] sm:$0xf]  ;;  %v5264_v10 = vld [vmem:[%s11520_s1 + $0x3a8] sm:$0xf0] }
  0x97   :  { %v5839_v27 = vor.u32 %v7369_v18, %v5838_v17  ;;  %v5267_v17 = vor.u32 %v7219_v9, %v5264_v10  ;;  %v7111_v18 = vld [vmem:[%s11520_s1 + $0x1c] sm:$0xf]  ;;  %v7358_v9 = vld [vmem:[%s11520_s1 + $0x7cc] sm:$0xf0]  ;;  %v7160_v10 = vld [vmem:[%s11520_s1 + $0x1a4] sm:$0xf] }
  0x98   :  { %2033 = vmatpush.bf16.msra.mxu0 %v5307_v28  ;;  %v5075_v28 = vor.u32 %v7171_v19, %v5072_v22  ;;  %v4832_v19 = vld [vmem:[%s11520_s1 + $0x48] sm:$0xf0]  ;;  %v5651_v22 = vor.u32 %v7315_v11, %v5648_v12  ;;  %v5032_v11 = vld [vmem:[%s11520_s1 + $0x1d0] sm:$0xf0] }
  0x99   :  { %2047 = vmatpush.bf16.msra.mxu1 %v5691_v29  ;;  %2075 = vmatpush.bf16.msra.mxu3 %v5311_v34  ;;  %v5459_v29 = vor.u32 %v7267_v23, %v5456_v24  ;;  %v5024_v34 = vld [vmem:[%s11520_s1 + $0x1c8] sm:$0xf0]  ;;  %v7303_v24 = vld [vmem:[%s11520_s1 + $0x61c] sm:$0xf] }
  0x9a   :  { %2061 = vmatpush.bf16.msra.mxu2 %v4927_v30  ;;  %v5790_v30 = vld [vmem:[%s11520_s1 + $0x798] sm:$0xf]  ;;  %v5216_v23 = vld [vmem:[%s11520_s1 + $0x348] sm:$0xf0]  ;;  %v5603_v37 = vor.u32 %v7303_v24, %v5600_v25  ;;  %v4984_v24 = vld [vmem:[%s11520_s1 + $0x170] sm:$0xf0] }
  0x9b   :  { %v5791_v39 = vor.u32 %v7357_v31, %v5790_v30  ;;  %v7298_v30 = vld [vmem:[%s11520_s1 + $0x5ec] sm:$0xf0]  ;;  %v5942_v31 = vld [vmem:[%s11520_s1 + $0x8c0] sm:$0xf] }
  0x9c   :  { %2034 = vmatpush.bf16.msra.mxu0 %v5259_v40  ;;  %v5027_v40 = vor.u32 %v7159_v32, %v5024_v34  ;;  %v7394_v32 = vld [vmem:[%s11520_s1 + $0x8ec] sm:$0xf0] }
  0x9d   :  { %2048 = vmatpush.bf16.msra.mxu1 %v5643_v43  ;;  %2076 = vmatpush.bf16.msra.mxu3 %v5263_v48  ;;  %v7345_v43 = vld [vmem:[%s11520_s1 + $0x764] sm:$0xf0]  ;;  %v5360_v48 = vld [vmem:[%s11520_s1 + $0x468] sm:$0xf0] }
  0x9e   :  { %2062 = vmatpush.bf16.msra.mxu2 %v4879_v44  ;;  %v7147_v44 = vld [vmem:[%s11520_s1 + $0x13c] sm:$0xf]  ;;  %v5743_v51 = vor.u32 %v7345_v43, %v5742_v42  ;;  %v5363_v53 = vor.u32 %v7243_v47, %v5360_v48  ;;  %v7190_v42 = vld [vmem:[%s11520_s1 + $0x28c] sm:$0xf0]  ;;  %v5510_v43 = vld [vmem:[%s11520_s1 + $0x560] sm:$0xf] }
  0x9f   :  { %v4979_v52 = vor.u32 %v7147_v44, %v4976_v46  ;;  %v5179_v44 = vor.u32 %v7196_v35, %v5176_v36  ;;  %v5894_v46 = vld [vmem:[%s11520_s1 + $0x860] sm:$0xf]  ;;  %v7382_v47 = vld [vmem:[%s11520_s1 + $0x88c] sm:$0xf0]  ;;  %v7184_v48 = vld [vmem:[%s11520_s1 + $0x264] sm:$0xf] }
  0xa0   :  { %2035 = vmatpush.bf16.msra.mxu0 %v5211_v55  ;;  %v7333_v55 = vld [vmem:[%s11520_s1 + $0x704] sm:$0xf0]  ;;  %v7136_v35 = vld [vmem:[%s11520_s1 + $0xe4] sm:$0xf]  ;;  %v4936_v36 = vld [vmem:[%s11520_s1 + $0x110] sm:$0xf0] }
  0xa1   :  { %2049 = vmatpush.bf16.msra.mxu1 %v5595_v60  ;;  %2077 = vmatpush.bf16.msra.mxu3 %v5215_v0  ;;  %v7231_v60 = vld [vmem:[%s11520_s1 + $0x3dc] sm:$0xf]  ;;  %v5695_v0 = vor.u32 %v7333_v55, %v5694_v54  ;;  %v7178_v54 = vld [vmem:[%s11520_s1 + $0x22c] sm:$0xf0]  ;;  %v5462_v55 = vld [vmem:[%s11520_s1 + $0x500] sm:$0xf] }
  0xa2   :  { %2063 = vmatpush.bf16.msra.mxu2 %v4831_v61  ;;  %v5312_v61 = vld [vmem:[%s11520_s1 + $0x408] sm:$0xf0] }
  0xa3   :  { %2036 = vmatmul.bf16.vlgmr.msra.gmra.mxu0 %v8025_v5 }
  0xa4   :  { %2084 = vmatpush.bf16.msrb.mxu0 %v5935_v1  ;;  %2050 = vmatmul.bf16.vlgmr.msra.gmra.mxu1 %v8059_v20  ;;  %v4931_v1 = vor.u32 %v7135_v56, %v4928_v59  ;;  %v5131_v56 = vor.u32 %v7184_v48, %v5128_v49  ;;  %v5846_v59 = vld [vmem:[%s11520_s1 + $0x800] sm:$0xf]  ;;  %v4888_v48 = vld [vmem:[%s11520_s1 + $0xb0] sm:$0xf0] }
  0xa5   :  { %2098 = vmatpush.bf16.msrb.mxu1 %v5171_v2  ;;  %2126 = vmatpush.bf16.msrb.mxu3 %v5939_v8  ;;  %v5315_v2 = vor.u32 %v7231_v60, %v5312_v61  ;;  %v4880_v8 = vld [vmem:[%s11520_s1 + $0xa8] sm:$0xf0]  ;;  %v7370_v60 = vld [vmem:[%s11520_s1 + $0x82c] sm:$0xf0]  ;;  %v7172_v61 = vld [vmem:[%s11520_s1 + $0x204] sm:$0xf] }
  0xa6   :  { %2112 = vmatpush.bf16.msrb.mxu2 %v5555_v3  ;;  %2078 = vmatmul.bf16.vlgmr.msra.gmra.mxu3 %v8025_v5  ;;  %v5646_v3 = vld [vmem:[%s11520_s1 + $0x678] sm:$0xf] }
  0xa7   :  { %2064 = vmatmul.bf16.vlgmr.msra.gmra.mxu2 %v7998_v57  ;;  %v5647_v13 = vor.u32 %v7321_v4, %v5646_v3  ;;  %v7166_v3 = vld [vmem:[%s11520_s1 + $0x1cc] sm:$0xf0]  ;;  %v5414_v4 = vld [vmem:[%s11520_s1 + $0x4a0] sm:$0xf] }
  0xa8   :  { %2085 = vmatpush.bf16.msrb.mxu0 %v5887_v14  ;;  %v5598_v14 = vld [vmem:[%s11520_s1 + $0x618] sm:$0xf] }
  0xa9   :  { %2099 = vmatpush.bf16.msrb.mxu1 %v5123_v15  ;;  %2127 = vmatpush.bf16.msrb.mxu3 %v5891_v21  ;;  %v7309_v15 = vld [vmem:[%s11520_s1 + $0x644] sm:$0xf0]  ;;  %v7207_v21 = vld [vmem:[%s11520_s1 + $0x31c] sm:$0xf] }
  0xaa   :  { %2113 = vmatpush.bf16.msrb.mxu2 %v5507_v16  ;;  %v4883_v16 = vor.u32 %v7123_v6, %v4880_v8  ;;  %v5219_v34 = vor.u32 %v7207_v21, %v5216_v23  ;;  %v5083_v6 = vor.u32 %v7172_v61, %v5080_v62  ;;  %v5798_v8 = vld [vmem:[%s11520_s1 + $0x7a0] sm:$0xf]  ;;  %v7148_v23 = vld [vmem:[%s11520_s1 + $0x144] sm:$0xf]  ;;  %v4840_v61 = vld [vmem:[%s11520_s1 + $0x50] sm:$0xf0] }
  0xab   :  { %v5750_v21 = vld [vmem:[%s11520_s1 + $0x740] sm:$0xf]  ;;  %v7292_v62 = vld [vmem:[%s11520_s1 + $0x5c4] sm:$0xf] }
  0xac   :  { %2086 = vmatpush.bf16.msrb.mxu0 %v5839_v27  ;;  %v7202_v27 = vld [vmem:[%s11520_s1 + $0x2ec] sm:$0xf0] }
  0xad   :  { %2100 = vmatpush.bf16.msrb.mxu1 %v5075_v28  ;;  %2128 = vmatpush.bf16.msrb.mxu3 %v5843_v33  ;;  %v5558_v28 = vld [vmem:[%s11520_s1 + $0x5c0] sm:$0xf]  ;;  %v4835_v33 = vor.u32 %v7111_v18, %v4832_v19  ;;  %v5175_v38 = vor.u32 %v7202_v27, %v5174_v26  ;;  %v5035_v18 = vor.u32 %v7160_v10, %v5032_v11  ;;  %v7250_v19 = vld [vmem:[%s11520_s1 + $0x46c] sm:$0xf0] }
  0xae   :  { %2114 = vmatpush.bf16.msrb.mxu2 %v5459_v29  ;;  %v5599_v29 = vor.u32 %v7309_v15, %v5598_v14  ;;  %v5799_v14 = vor.u32 %v7358_v9, %v5798_v8  ;;  %v4982_v15 = vld [vmem:[%s11520_s1 + $0x140] sm:$0xf]  ;;  %v5566_v8 = vld [vmem:[%s11520_s1 + $0x5c8] sm:$0xf]  ;;  %v7299_v9 = vld [vmem:[%s11520_s1 + $0x5f4] sm:$0xf0] }
  0xb0   :  { %2087 = vmatpush.bf16.msrb.mxu0 %v5791_v39  ;;  %v5559_v39 = vor.u32 %v7298_v30, %v5558_v28  ;;  %v4934_v28 = vld [vmem:[%s11520_s1 + $0xe0] sm:$0xf] }
  0xb1   :  { %2101 = vmatpush.bf16.msrb.mxu1 %v5027_v40  ;;  %2129 = vmatpush.bf16.msrb.mxu3 %v5795_v45  ;;  %v5943_v40 = vor.u32 %v7394_v32, %v5942_v31  ;;  %v7286_v45 = vld [vmem:[%s11520_s1 + $0x58c] sm:$0xf0]  ;;  %v5318_v30 = vld [vmem:[%s11520_s1 + $0x3e0] sm:$0xf]  ;;  %v4987_v31 = vor.u32 %v7148_v23, %v4984_v24  ;;  %v7287_v23 = vld [vmem:[%s11520_s1 + $0x594] sm:$0xf0] }
  0xb2   :  { %2115 = vmatpush.bf16.msrb.mxu2 %v5411_v41  ;;  %v5126_v41 = vld [vmem:[%s11520_s1 + $0x260] sm:$0xf]  ;;  %v7238_v32 = vld [vmem:[%s11520_s1 + $0x40c] sm:$0xf0] }
  0xb3   :  { %v5127_v50 = vor.u32 %v7190_v42, %v5126_v41  ;;  %v7130_v41 = vld [vmem:[%s11520_s1 + $0xac] sm:$0xf0]  ;;  %v5270_v42 = vld [vmem:[%s11520_s1 + $0x380] sm:$0xf] }
  0xb4   :  { %2088 = vmatpush.bf16.msrb.mxu0 %v5743_v51  ;;  %v5511_v51 = vor.u32 %v7286_v45, %v5510_v43  ;;  %v4939_v43 = vor.u32 %v7136_v35, %v4936_v36  ;;  %v5654_v45 = vld [vmem:[%s11520_s1 + $0x680] sm:$0xf]  ;;  %v7275_v35 = vld [vmem:[%s11520_s1 + $0x534] sm:$0xf0] }
  0xb5   :  { %2102 = vmatpush.bf16.msrb.mxu1 %v4979_v52  ;;  %2130 = vmatpush.bf16.msrb.mxu3 %v5747_v58  ;;  %v5895_v52 = vor.u32 %v7382_v47, %v5894_v46  ;;  %v7274_v58 = vld [vmem:[%s11520_s1 + $0x52c] sm:$0xf0]  ;;  %v7124_v47 = vld [vmem:[%s11520_s1 + $0x84] sm:$0xf] }
  0xb6   :  { %2116 = vmatpush.bf16.msrb.mxu2 %v5363_v53  ;;  %v5078_v53 = vld [vmem:[%s11520_s1 + $0x200] sm:$0xf]  ;;  %v7322_v46 = vld [vmem:[%s11520_s1 + $0x6ac] sm:$0xf0] }
  0xb7   :  { %v5079_v63 = vor.u32 %v7178_v54, %v5078_v53  ;;  %v5655_v53 = vor.u32 %v7322_v46, %v5654_v45  ;;  %v5222_v54 = vld [vmem:[%s11520_s1 + $0x320] sm:$0xf]  ;;  %v5800_v45 = vld [vmem:[%s11520_s1 + $0x7d0] sm:$0xf0]  ;;  %v5038_v46 = vld [vmem:[%s11520_s1 + $0x1a8] sm:$0xf] }
  0xb8   :  { %2089 = vmatpush.bf16.msrb.mxu0 %v5695_v0  ;;  %v5463_v0 = vor.u32 %v7274_v58, %v5462_v55  ;;  %v7214_v55 = vld [vmem:[%s11520_s1 + $0x34c] sm:$0xf0]  ;;  %v4891_v58 = vor.u32 %v7124_v47, %v4888_v48  ;;  %v7167_v47 = vld [vmem:[%s11520_s1 + $0x1d4] sm:$0xf0]  ;;  %v5422_v48 = vld [vmem:[%s11520_s1 + $0x4a8] sm:$0xf] }
  0xb9   :  { %2103 = vmatpush.bf16.msrb.mxu1 %v4931_v1  ;;  %2131 = vmatpush.bf16.msrb.mxu3 %v5699_v7  ;;  %v5847_v1 = vor.u32 %v7370_v60, %v5846_v59  ;;  %v7262_v7 = vld [vmem:[%s11520_s1 + $0x4cc] sm:$0xf0]  ;;  %v7112_v60 = vld [vmem:[%s11520_s1 + $0x24] sm:$0xf] }
  0xba   :  { %2117 = vmatpush.bf16.msrb.mxu2 %v5315_v2  ;;  %v5030_v2 = vld [vmem:[%s11520_s1 + $0x1a0] sm:$0xf]  ;;  %v7310_v59 = vld [vmem:[%s11520_s1 + $0x64c] sm:$0xf0]  ;;  %v4843_v10 = vor.u32 %v7112_v60, %v4840_v61  ;;  %v7155_v60 = vld [vmem:[%s11520_s1 + $0x174] sm:$0xf0] }
  0xbb   :  { %v5031_v12 = vor.u32 %v7166_v3, %v5030_v2  ;;  %v5944_v2 = vld [vmem:[%s11520_s1 + $0x8f0] sm:$0xf0]  ;;  %v5182_v3 = vld [vmem:[%s11520_s1 + $0x2c8] sm:$0xf] }
  0xbc   :  { %2090 = vmatpush.bf16.msrb.mxu0 %v5647_v13  ;;  %v5415_v13 = vor.u32 %v7262_v7, %v5414_v4  ;;  %v7203_v4 = vld [vmem:[%s11520_s1 + $0x2f4] sm:$0xf0]  ;;  %v5374_v61 = vld [vmem:[%s11520_s1 + $0x448] sm:$0xf] }
  0xbd   :  { %2104 = vmatpush.bf16.msrb.mxu1 %v4883_v16  ;;  %2132 = vmatpush.bf16.msrb.mxu3 %v5651_v22  ;;  %v7154_v16 = vld [vmem:[%s11520_s1 + $0x16c] sm:$0xf0] }
  0xbe   :  { %2118 = vmatpush.bf16.msrb.mxu2 %v5267_v17  ;;  %v5366_v17 = vld [vmem:[%s11520_s1 + $0x440] sm:$0xf]  ;;  %v7346_v22 = vld [vmem:[%s11520_s1 + $0x76c] sm:$0xf0]  ;;  %v4983_v25 = vor.u32 %v7154_v16, %v4982_v15  ;;  %v5512_v15 = vld [vmem:[%s11520_s1 + $0x590] sm:$0xf0] }
  0xbf   :  { %v5367_v26 = vor.u32 %v7250_v19, %v5366_v17  ;;  %v5751_v27 = vor.u32 %v7346_v22, %v5750_v21  ;;  %v7376_v16 = vld [vmem:[%s11520_s1 + $0x864] sm:$0xf]  ;;  %v5567_v17 = vor.u32 %v7299_v9, %v5566_v8  ;;  %v5134_v19 = vld [vmem:[%s11520_s1 + $0x268] sm:$0xf]  ;;  %v7191_v21 = vld [vmem:[%s11520_s1 + $0x294] sm:$0xf0] }
  0xc0   :  { %2091 = vmatpush.bf16.msrb.mxu0 %v5599_v29  ;;  %v7142_v29 = vld [vmem:[%s11520_s1 + $0x10c] sm:$0xf0]  ;;  %v5518_v22 = vld [vmem:[%s11520_s1 + $0x568] sm:$0xf]  ;;  %v5704_v9 = vld [vmem:[%s11520_s1 + $0x710] sm:$0xf0] }
  0xc1   :  { %2105 = vmatpush.bf16.msrb.mxu1 %v4835_v33  ;;  %2133 = vmatpush.bf16.msrb.mxu3 %v5603_v37  ;;  %v5702_v33 = vld [vmem:[%s11520_s1 + $0x6e0] sm:$0xf]  ;;  %v4935_v37 = vor.u32 %v7142_v29, %v4934_v28  ;;  %v5464_v28 = vld [vmem:[%s11520_s1 + $0x530] sm:$0xf0]  ;;  %v7364_v29 = vld [vmem:[%s11520_s1 + $0x804] sm:$0xf] }
  0xc2   :  { %2119 = vmatpush.bf16.msrb.mxu2 %v5219_v34  ;;  %v7334_v34 = vld [vmem:[%s11520_s1 + $0x70c] sm:$0xf0] }
  0xc3   :  { %2092 = vmatmul.bf16.vlgmr.msrb.gmra.mxu0 %v8059_v20 }
  0xc4   :  { %2140 = vmatpush.bf16.msra.mxu0 %v5175_v38  ;;  %2134 = vmatmul.bf16.vlgmr.msrb.gmra.mxu3 %v8059_v20  ;;  %v5319_v38 = vor.u32 %v7238_v32, %v5318_v30  ;;  %v5519_v30 = vor.u32 %v7287_v23, %v5518_v22  ;;  %v5086_v32 = vld [vmem:[%s11520_s1 + $0x208] sm:$0xf]  ;;  %v7316_v22 = vld [vmem:[%s11520_s1 + $0x684] sm:$0xf] }
  0xc5   :  { %2154 = vmatpush.bf16.msra.mxu1 %v5559_v39  ;;  %2182 = vmatpush.bf16.msra.mxu3 %v5179_v44  ;;  %v5703_v39 = vor.u32 %v7334_v34, %v5702_v33  ;;  %v7226_v44 = vld [vmem:[%s11520_s1 + $0x3ac] sm:$0xf0]  ;;  %v7179_v33 = vld [vmem:[%s11520_s1 + $0x234] sm:$0xf0]  ;;  %v5470_v34 = vld [vmem:[%s11520_s1 + $0x508] sm:$0xf] }
  0xc6   :  { %2168 = vmatpush.bf16.msra.mxu2 %v5943_v40  ;;  %2106 = vmatmul.bf16.vlgmr.msrb.gmra.mxu1 %v7998_v57  ;;  %v4886_v40 = vld [vmem:[%s11520_s1 + $0x80] sm:$0xf] }
  0xc7   :  { %2120 = vmatmul.bf16.vlgmr.msrb.gmra.mxu2 %v8025_v5  ;;  %v4887_v49 = vor.u32 %v7130_v41, %v4886_v40  ;;  %v5087_v40 = vor.u32 %v7179_v33, %v5086_v32  ;;  %v7256_v41 = vld [vmem:[%s11520_s1 + $0x4a4] sm:$0xf] }
  0xc8   :  { %2141 = vmatpush.bf16.msra.mxu0 %v5127_v50  ;;  %v4838_v50 = vld [vmem:[%s11520_s1 + $0x20] sm:$0xf] }
  0xc9   :  { %2155 = vmatpush.bf16.msra.mxu1 %v5511_v51  ;;  %2183 = vmatpush.bf16.msra.mxu3 %v5131_v56  ;;  %v7118_v51 = vld [vmem:[%s11520_s1 + $0x4c] sm:$0xf0]  ;;  %v5606_v56 = vld [vmem:[%s11520_s1 + $0x620] sm:$0xf] }
  0xca   :  { %2169 = vmatpush.bf16.msra.mxu2 %v5895_v52  ;;  %v5271_v52 = vor.u32 %v7226_v44, %v5270_v42  ;;  %v5607_v7 = vor.u32 %v7310_v59, %v5606_v56  ;;  %v5416_v42 = vld [vmem:[%s11520_s1 + $0x4d0] sm:$0xf0]  ;;  %v5471_v44 = vor.u32 %v7275_v35, %v5470_v34  ;;  %v4990_v59 = vld [vmem:[%s11520_s1 + $0x148] sm:$0xf]  ;;  %v7304_v34 = vld [vmem:[%s11520_s1 + $0x624] sm:$0xf] }
  0xcb   :  { %v5608_v35 = vld [vmem:[%s11520_s1 + $0x650] sm:$0xf0] }
  0xcc   :  { %2142 = vmatpush.bf16.msra.mxu0 %v5079_v63  ;;  %v5560_v63 = vld [vmem:[%s11520_s1 + $0x5f0] sm:$0xf0] }
  0xcd   :  { %2156 = vmatpush.bf16.msra.mxu1 %v5463_v0  ;;  %2184 = vmatpush.bf16.msra.mxu3 %v5083_v6  ;;  %v7388_v0 = vld [vmem:[%s11520_s1 + $0x8c4] sm:$0xf]  ;;  %v5223_v6 = vor.u32 %v7214_v55, %v5222_v54  ;;  %v5563_v11 = vor.u32 %v7292_v62, %v5560_v63  ;;  %v5368_v54 = vld [vmem:[%s11520_s1 + $0x470] sm:$0xf0]  ;;  %v7251_v62 = vld [vmem:[%s11520_s1 + $0x474] sm:$0xf0]  ;;  %v9266_v63 = vpop.f32.mrf.mxu2 }
  0xce   :  { %2170 = vmatpush.bf16.msra.mxu2 %v5847_v1  ;;  %v4839_v1 = vor.u32 %v7118_v51, %v4838_v50  ;;  %v5419_v50 = vor.u32 %v7256_v41, %v5416_v42  ;;  %v7340_v55 = vld [vmem:[%s11520_s1 + $0x744] sm:$0xf]  ;;  %v5375_v8 = vor.u32 %v7251_v62, %v5374_v61  ;;  %v7119_v42 = vld [vmem:[%s11520_s1 + $0x54] sm:$0xf0] }
  0xd0   :  { %2143 = vmatpush.bf16.msra.mxu0 %v5031_v12  ;;  %v5947_v12 = vor.u32 %v7388_v0, %v5944_v2  ;;  %v9268_v0 = vpop.f32.mrf.mxu3 }
  0xd1   :  { %2157 = vmatpush.bf16.msra.mxu1 %v5415_v13  ;;  %2185 = vmatpush.bf16.msra.mxu3 %v5035_v18  ;;  %v5183_v13 = vor.u32 %v7203_v4, %v5182_v3  ;;  %v5896_v18 = vld [vmem:[%s11520_s1 + $0x890] sm:$0xf0]  ;;  %v4991_v3 = vor.u32 %v7155_v60, %v4990_v59  ;;  %v7232_v4 = vld [vmem:[%s11520_s1 + $0x3e4] sm:$0xf] }
  0xd2   :  { %2171 = vmatpush.bf16.msra.mxu2 %v5799_v14  ;;  %v7280_v14 = vld [vmem:[%s11520_s1 + $0x564] sm:$0xf] }
  0xd3   :  { %v5515_v24 = vor.u32 %v7280_v14, %v5512_v15  ;;  %v5326_v14 = vld [vmem:[%s11520_s1 + $0x3e8] sm:$0xf]  ;;  %v7239_v15 = vld [vmem:[%s11520_s1 + $0x414] sm:$0xf0] }
  0xd4   :  { %2144 = vmatpush.bf16.msra.mxu0 %v4983_v25  ;;  %v5899_v25 = vor.u32 %v7376_v16, %v5896_v18  ;;  %v5327_v23 = vor.u32 %v7239_v15, %v5326_v14 }
  0xd5   :  { %2158 = vmatpush.bf16.msra.mxu1 %v5367_v26  ;;  %2186 = vmatpush.bf16.msra.mxu3 %v4987_v31  ;;  %v5135_v26 = vor.u32 %v7191_v21, %v5134_v19  ;;  %v5848_v31 = vld [vmem:[%s11520_s1 + $0x830] sm:$0xf0]  ;;  %v7220_v19 = vld [vmem:[%s11520_s1 + $0x384] sm:$0xf] }
  0xd6   :  { %2172 = vmatpush.bf16.msra.mxu2 %v5751_v27  ;;  %v7268_v27 = vld [vmem:[%s11520_s1 + $0x504] sm:$0xf]  ;;  %v5272_v21 = vld [vmem:[%s11520_s1 + $0x3b0] sm:$0xf0] }
  0xd7   :  { %v5467_v36 = vor.u32 %v7268_v27, %v5464_v28  ;;  %v5278_v27 = vld [vmem:[%s11520_s1 + $0x388] sm:$0xf]  ;;  %v7227_v28 = vld [vmem:[%s11520_s1 + $0x3b4] sm:$0xf0] }
  0xd8   :  { %2145 = vmatpush.bf16.msra.mxu0 %v4935_v37  ;;  %v9214_v37 = vpop.f32.mrf.mxu0  ;;  %v5279_v41 = vor.u32 %v7227_v28, %v5278_v27  ;;  %v5856_v27 = vld [vmem:[%s11520_s1 + $0x838] sm:$0xf0] }
  0xd9   :  { %2159 = vmatpush.bf16.msra.mxu1 %v5319_v38  ;;  %2187 = vmatpush.bf16.msra.mxu3 %v4939_v43  ;;  %v9216_v38 = vpop.f32.mrf.mxu1  ;;  %v7352_v43 = vld [vmem:[%s11520_s1 + $0x7a4] sm:$0xf] }
  0xda   :  { %2173 = vmatpush.bf16.msra.mxu2 %v5703_v39  ;;  %v5851_v39 = vor.u32 %v7364_v29, %v5848_v31  ;;  %v5803_v51 = vor.u32 %v7352_v43, %v5800_v45  ;;  %v5275_v29 = vor.u32 %v7220_v19, %v5272_v21  ;;  %v5224_v31 = vld [vmem:[%s11520_s1 + $0x350] sm:$0xf0]  ;;  %v5230_v43 = vld [vmem:[%s11520_s1 + $0x328] sm:$0xf]  ;;  %v7371_v19 = vld [vmem:[%s11520_s1 + $0x834] sm:$0xf0] }
  0xdb   :  { %v5950_v45 = vld [vmem:[%s11520_s1 + $0x8c8] sm:$0xf]  ;;  %v7173_v21 = vld [vmem:[%s11520_s1 + $0x20c] sm:$0xf] }
  0xdc   :  { %2146 = vmatpush.bf16.msra.mxu0 %v4887_v49  ;;  %v7263_v49 = vld [vmem:[%s11520_s1 + $0x4d4] sm:$0xf0] }
  0xdd   :  { %2160 = vmatpush.bf16.msra.mxu1 %v5271_v52  ;;  %2188 = vmatpush.bf16.msra.mxu3 %v4891_v58  ;;  %v5039_v52 = vor.u32 %v7167_v47, %v5038_v46  ;;  %v5423_v56 = vor.u32 %v7263_v49, %v5422_v48  ;;  %v5752_v58 = vld [vmem:[%s11520_s1 + $0x770] sm:$0xf0]  ;;  %v7395_v46 = vld [vmem:[%s11520_s1 + $0x8f4] sm:$0xf0]  ;;  %v7197_v47 = vld [vmem:[%s11520_s1 + $0x2cc] sm:$0xf] }
  0xde   :  { %2174 = vmatpush.bf16.msra.mxu2 %v5655_v53  ;;  %v7244_v53 = vld [vmem:[%s11520_s1 + $0x444] sm:$0xf]  ;;  %v5755_v2 = vor.u32 %v7340_v55, %v5752_v58  ;;  %v5184_v49 = vld [vmem:[%s11520_s1 + $0x2f8] sm:$0xf0]  ;;  %v5951_v60 = vor.u32 %v7395_v46, %v5950_v45 }
  0xdf   :  { %v5952_v58 = vld [vmem:[%s11520_s1 + $0x8f8] sm:$0xf0]  ;;  %v5187_v61 = vor.u32 %v7197_v47, %v5184_v49  ;;  %v5758_v49 = vld [vmem:[%s11520_s1 + $0x748] sm:$0xf] }
  0xe0   :  { %2147 = vmatpush.bf16.msra.mxu0 %v4839_v1  ;;  %v5371_v1 = vor.u32 %v7244_v53, %v5368_v54  ;;  %v5611_v54 = vor.u32 %v7304_v34, %v5608_v35  ;;  %v7359_v34 = vld [vmem:[%s11520_s1 + $0x7d4] sm:$0xf0]  ;;  %v7161_v35 = vld [vmem:[%s11520_s1 + $0x1ac] sm:$0xf]  ;;  %v5808_v45 = vld [vmem:[%s11520_s1 + $0x7d8] sm:$0xf0] }
  0xe1   :  { %2161 = vmatpush.bf16.msra.mxu1 %v5223_v6  ;;  %2189 = vmatpush.bf16.msra.mxu3 %v4843_v10  ;;  %v5320_v6 = vld [vmem:[%s11520_s1 + $0x410] sm:$0xf0]  ;;  %v4942_v10 = vld [vmem:[%s11520_s1 + $0xe8] sm:$0xf] }
  0xe2   :  { %2175 = vmatpush.bf16.msra.mxu2 %v5607_v7  ;;  %v7328_v7 = vld [vmem:[%s11520_s1 + $0x6e4] sm:$0xf]  ;;  %v5323_v16 = vor.u32 %v7232_v4, %v5320_v6  ;;  %v5136_v6 = vld [vmem:[%s11520_s1 + $0x298] sm:$0xf0] }
  0xe3   :  { %2148 = vmatmul.bf16.vlgmr.msra.gmra.mxu0 %v7998_v57 }
  0xe4   :  { %2196 = vmatpush.bf16.msrb.mxu0 %v5563_v11  ;;  %2162 = vmatmul.bf16.vlgmr.msra.gmra.mxu1 %v8025_v5  ;;  %v7143_v11 = vld [vmem:[%s11520_s1 + $0x114] sm:$0xf0] }
  0xe5   :  { %2210 = vmatpush.bf16.msrb.mxu1 %v5947_v12  ;;  %2238 = vmatpush.bf16.msrb.mxu3 %v5567_v17  ;;  %v9288_v12 = vpop.f32.mrf.mxu0  ;;  %v5707_v17 = vor.u32 %v7328_v7, %v5704_v9  ;;  %v4943_v18 = vor.u32 %v7143_v11, %v4942_v10  ;;  %v7281_v7 = vld [vmem:[%s11520_s1 + $0x56c] sm:$0xf]  ;;  %v5904_v10 = vld [vmem:[%s11520_s1 + $0x898] sm:$0xf0] }
  0xe6   :  { %2224 = vmatpush.bf16.msrb.mxu2 %v5183_v13  ;;  %2190 = vmatmul.bf16.vlgmr.msra.gmra.mxu3 %v7998_v57  ;;  %v9290_v13 = vpop.f32.mrf.mxu1  ;;  %v7377_v9 = vld [vmem:[%s11520_s1 + $0x86c] sm:$0xf] }
  0xe7   :  { %2176 = vmatmul.bf16.vlgmr.msra.gmra.mxu2 %v8059_v20 }
  0xe8   :  { %2197 = vmatpush.bf16.msrb.mxu0 %v5515_v24  ;;  %v5656_v24 = vld [vmem:[%s11520_s1 + $0x6b0] sm:$0xf0] }
  0xe9   :  { %2211 = vmatpush.bf16.msrb.mxu1 %v5899_v25  ;;  %2239 = vmatpush.bf16.msrb.mxu3 %v5519_v30  ;;  %v4894_v25 = vld [vmem:[%s11520_s1 + $0x88] sm:$0xf]  ;;  %v7208_v30 = vld [vmem:[%s11520_s1 + $0x324] sm:$0xf]  ;;  %v5659_v32 = vor.u32 %v7316_v22, %v5656_v24  ;;  %v5907_v22 = vor.u32 %v7377_v9, %v5904_v10  ;;  %v7269_v24 = vld [vmem:[%s11520_s1 + $0x50c] sm:$0xf] }
  0xea   :  { %2225 = vmatpush.bf16.msrb.mxu2 %v5135_v26  ;;  %v7131_v26 = vld [vmem:[%s11520_s1 + $0xb4] sm:$0xf0]  ;;  %v5227_v48 = vor.u32 %v7208_v30, %v5224_v31  ;;  %v7137_v9 = vld [vmem:[%s11520_s1 + $0xec] sm:$0xf] }
  0xeb   :  { %v4895_v33 = vor.u32 %v7131_v26, %v4894_v25  ;;  %v5472_v25 = vld [vmem:[%s11520_s1 + $0x538] sm:$0xf0]  ;;  %v7365_v26 = vld [vmem:[%s11520_s1 + $0x80c] sm:$0xf] }
  0xec   :  { %2198 = vmatpush.bf16.msrb.mxu0 %v5467_v36  ;;  %v4846_v36 = vld [vmem:[%s11520_s1 + $0x28] sm:$0xf] }
  0xed   :  { %2212 = vmatpush.bf16.msrb.mxu1 %v5851_v39  ;;  %2240 = vmatpush.bf16.msrb.mxu3 %v5471_v44  ;;  %v9337_v39 = vpop.f32.mrf.mxu2  ;;  %v7215_v44 = vld [vmem:[%s11520_s1 + $0x354] sm:$0xf0]  ;;  %v4847_v55 = vor.u32 %v7119_v42, %v4846_v36  ;;  %v5859_v36 = vor.u32 %v7365_v26, %v5856_v27  ;;  %v7257_v42 = vld [vmem:[%s11520_s1 + $0x4ac] sm:$0xf] }
  0xee   :  { %2226 = vmatpush.bf16.msrb.mxu2 %v5087_v40  ;;  %v9339_v40 = vpop.f32.mrf.mxu3  ;;  %v9370_v53 = vpop.f32.mrf.mxu1  ;;  %v5231_v59 = vor.u32 %v7215_v44, %v5230_v43  ;;  %v5424_v43 = vld [vmem:[%s11520_s1 + $0x4d8] sm:$0xf0]  ;;  %v7353_v44 = vld [vmem:[%s11520_s1 + $0x7ac] sm:$0xf] }
  0xef   :  { %v7125_v26 = vld [vmem:[%s11520_s1 + $0x8c] sm:$0xf] }
  0xf0   :  { %2199 = vmatpush.bf16.msrb.mxu0 %v5419_v50  ;;  %v7293_v50 = vld [vmem:[%s11520_s1 + $0x5cc] sm:$0xf] }
  0xf1   :  { %2213 = vmatpush.bf16.msrb.mxu1 %v5803_v51  ;;  %2241 = vmatpush.bf16.msrb.mxu3 %v5423_v56  ;;  %v5568_v51 = vld [vmem:[%s11520_s1 + $0x5f8] sm:$0xf0]  ;;  %v7389_v56 = vld [vmem:[%s11520_s1 + $0x8cc] sm:$0xf] }
  0xf2   :  { %2227 = vmatpush.bf16.msrb.mxu2 %v5039_v52  ;;  %v9368_v52 = vpop.f32.mrf.mxu0  ;;  %v5571_v62 = vor.u32 %v7293_v50, %v5568_v51  ;;  %v5955_v4 = vor.u32 %v7389_v56, %v5952_v58  ;;  %v7347_v50 = vld [vmem:[%s11520_s1 + $0x774] sm:$0xf0]  ;;  %v7149_v51 = vld [vmem:[%s11520_s1 + $0x14c] sm:$0xf]  ;;  %v5811_v56 = vor.u32 %v7353_v44, %v5808_v45  ;;  %v4992_v58 = vld [vmem:[%s11520_s1 + $0x178] sm:$0xf0] }
  0xf4   :  { %2200 = vmatpush.bf16.msrb.mxu0 %v5371_v1  ;;  %v5902_v1 = vld [vmem:[%s11520_s1 + $0x868] sm:$0xf] }
  0xf5   :  { %2214 = vmatpush.bf16.msrb.mxu1 %v5755_v2  ;;  %2242 = vmatpush.bf16.msrb.mxu3 %v5375_v8  ;;  %v7383_v2 = vld [vmem:[%s11520_s1 + $0x894] sm:$0xf0]  ;;  %v5520_v8 = vld [vmem:[%s11520_s1 + $0x598] sm:$0xf0]  ;;  %v9402_v11 = vpop.f32.mrf.mxu2 }
  0xf6   :  { %2228 = vmatpush.bf16.msrb.mxu2 %v4991_v3  ;;  %v7185_v3 = vld [vmem:[%s11520_s1 + $0x26c] sm:$0xf]  ;;  %v9404_v14 = vpop.f32.mrf.mxu3  ;;  %v5903_v15 = vor.u32 %v7383_v2, %v5902_v1  ;;  %v9436_v30 = vpop.f32.mrf.mxu1  ;;  %v5759_v1 = vor.u32 %v7347_v50, %v5758_v49  ;;  %v5232_v50 = vld [vmem:[%s11520_s1 + $0x358] sm:$0xf0] }
  0xf8   :  { %2201 = vmatpush.bf16.msrb.mxu0 %v5323_v16  ;;  %v5139_v16 = vor.u32 %v7185_v3, %v5136_v6 }
  0xf9   :  { %2215 = vmatpush.bf16.msrb.mxu1 %v5707_v17  ;;  %2243 = vmatpush.bf16.msrb.mxu3 %v5327_v23  ;;  %v5523_v17 = vor.u32 %v7281_v7, %v5520_v8  ;;  %v5088_v23 = vld [vmem:[%s11520_s1 + $0x238] sm:$0xf0]  ;;  %v5710_v7 = vld [vmem:[%s11520_s1 + $0x6e8] sm:$0xf]  ;;  %v7335_v8 = vld [vmem:[%s11520_s1 + $0x714] sm:$0xf0] }
  0xfa   :  { %2229 = vmatpush.bf16.msrb.mxu2 %v4943_v18  ;;  %v5854_v18 = vld [vmem:[%s11520_s1 + $0x808] sm:$0xf]  ;;  %v5091_v31 = vor.u32 %v7173_v21, %v5088_v23  ;;  %v5711_v21 = vor.u32 %v7335_v8, %v5710_v7  ;;  %v7466_v7 = vld [vmem:[%s11522_s3 + $0x230] sm:$0xf0] }
  0xfb   :  { %v5855_v28 = vor.u32 %v7371_v19, %v5854_v18  ;;  %v7329_v18 = vld [vmem:[%s11520_s1 + $0x6ec] sm:$0xf]  ;;  %v5712_v19 = vld [vmem:[%s11520_s1 + $0x718] sm:$0xf0] }
  0xfc   :  { %2202 = vmatpush.bf16.msrb.mxu0 %v5275_v29  ;;  %v9434_v29 = vpop.f32.mrf.mxu0 }
  0xfd   :  { %2216 = vmatpush.bf16.msrb.mxu1 %v5659_v32  ;;  %2244 = vmatpush.bf16.msrb.mxu3 %v5279_v41  ;;  %v5475_v32 = vor.u32 %v7269_v24, %v5472_v25  ;;  %v5040_v41 = vld [vmem:[%s11520_s1 + $0x1d8] sm:$0xf0]  ;;  %v5662_v24 = vld [vmem:[%s11520_s1 + $0x688] sm:$0xf]  ;;  %v7323_v25 = vld [vmem:[%s11520_s1 + $0x6b4] sm:$0xf0] }
  0xfe   :  { %2230 = vmatpush.bf16.msrb.mxu2 %v4895_v33  ;;  %v5806_v33 = vld [vmem:[%s11520_s1 + $0x7a8] sm:$0xf]  ;;  %v5043_v47 = vor.u32 %v7161_v35, %v5040_v41  ;;  %v9492_v3 = vpop.f32.mrf.mxu1  ;;  %v7317_v35 = vld [vmem:[%s11520_s1 + $0x68c] sm:$0xf]  ;;  %v5663_v41 = vor.u32 %v7323_v25, %v5662_v24 }
  0xff   :  { %v5807_v46 = vor.u32 %v7359_v34, %v5806_v33  ;;  %v7221_v33 = vld [vmem:[%s11520_s1 + $0x38c] sm:$0xf]  ;;  %v5280_v34 = vld [vmem:[%s11520_s1 + $0x3b8] sm:$0xf0] }
 0x100   :  { %2203 = vmatpush.bf16.msrb.mxu0 %v5227_v48  ;;  %v5427_v48 = vor.u32 %v7257_v42, %v5424_v43  ;;  %v5614_v42 = vld [vmem:[%s11520_s1 + $0x628] sm:$0xf]  ;;  %v7311_v43 = vld [vmem:[%s11520_s1 + $0x654] sm:$0xf0]  ;;  %v5283_v45 = vor.u32 %v7221_v33, %v5280_v34  ;;  %v7463_v33 = vld [vmem:[%s11522_s3 + $0x218] sm:$0xf0] }
 0x101   :  { %2217 = vmatpush.bf16.msrb.mxu1 %v5611_v54  ;;  %2245 = vmatpush.bf16.msrb.mxu3 %v5231_v59  ;;  %v9471_v54 = vpop.f32.mrf.mxu2  ;;  %v7245_v59 = vld [vmem:[%s11520_s1 + $0x44c] sm:$0xf]  ;;  %v6318_v34 = vld [vmem:[%s11522_s3 + $0x2d0] sm:$0xf] }
 0x102   :  { %2231 = vmatpush.bf16.msrb.mxu2 %v4847_v55  ;;  %v9473_v55 = vpop.f32.mrf.mxu3 }
 0x103   :  { %2204 = vmatmul.bf16.vlgmr.msrb.gmra.mxu0 %v8025_v5 }
 0x104   :  { %2252 = vmatpush.bf16.msra.mxu0 %v5951_v60  ;;  %2218 = vmatmul.bf16.vlgmr.msrb.gmra.mxu1 %v8059_v20  ;;  %v5376_v60 = vld [vmem:[%s11520_s1 + $0x478] sm:$0xf0]  ;;  %v9490_v2 = vpop.f32.mrf.mxu0 }
 0x105   :  { %2266 = vmatpush.bf16.msra.mxu1 %v5187_v61  ;;  %2294 = vmatpush.bf16.msra.mxu3 %v5955_v4  ;;  %v7341_v61 = vld [vmem:[%s11520_s1 + $0x74c] sm:$0xf]  ;;  %v4995_v4 = vor.u32 %v7149_v51, %v4992_v58  ;;  %v5379_v6 = vor.u32 %v7245_v59, %v5376_v60  ;;  %v6042_v60 = vld [vmem:[%s11522_s3 + $0xa8] sm:$0xf] }
 0x106   :  { %2280 = vmatpush.bf16.msra.mxu2 %v5571_v62  ;;  %2246 = vmatmul.bf16.vlgmr.msrb.gmra.mxu3 %v8025_v5  ;;  %v5760_v62 = vld [vmem:[%s11520_s1 + $0x778] sm:$0xf0]  ;;  %v7305_v51 = vld [vmem:[%s11520_s1 + $0x62c] sm:$0xf]  ;;  %v9572_v59 = vpop.f32.mrf.mxu1 }
 0x107   :  { %2232 = vmatmul.bf16.vlgmr.msrb.gmra.mxu2 %v7998_v57  ;;  %v5763_v10 = vor.u32 %v7341_v61, %v5760_v62  ;;  %v7418_v61 = vld [vmem:[%s11522_s3 + $0xb0] sm:$0xf0]  ;;  %v6138_v62 = vld [vmem:[%s11522_s3 + $0x168] sm:$0xf] }
 0x108   :  { %2253 = vmatpush.bf16.msra.mxu0 %v5903_v15  ;;  %v4944_v15 = vld [vmem:[%s11520_s1 + $0x118] sm:$0xf0] }
 0x109   :  { %2267 = vmatpush.bf16.msra.mxu1 %v5139_v16  ;;  %2295 = vmatpush.bf16.msra.mxu3 %v5907_v22  ;;  %v7233_v16 = vld [vmem:[%s11520_s1 + $0x3ec] sm:$0xf]  ;;  %v4947_v22 = vor.u32 %v7137_v9, %v4944_v15  ;;  %v9527_v27 = vpop.f32.mrf.mxu2  ;;  %v7490_v15 = vld [vmem:[%s11522_s3 + $0x2f0] sm:$0xf0] }
 0x10a   :  { %2281 = vmatpush.bf16.msra.mxu2 %v5523_v17  ;;  %v5328_v17 = vld [vmem:[%s11520_s1 + $0x418] sm:$0xf0] }
 0x10b   :  { %v5331_v23 = vor.u32 %v7233_v16, %v5328_v17  ;;  %v6043_v17 = vor.u32 %v7418_v61, %v6042_v60 }
 0x10c   :  { %2254 = vmatpush.bf16.msra.mxu0 %v5855_v28  ;;  %v9529_v28 = vpop.f32.mrf.mxu3  ;;  %v9570_v58 = vpop.f32.mrf.mxu0 }
 0x10d   :  { %2268 = vmatpush.bf16.msra.mxu1 %v5091_v31  ;;  %2296 = vmatpush.bf16.msra.mxu3 %v5859_v36  ;;  %v5715_v31 = vor.u32 %v7329_v18, %v5712_v19  ;;  %v5664_v36 = vld [vmem:[%s11520_s1 + $0x6b8] sm:$0xf0] }
 0x10e   :  { %2282 = vmatpush.bf16.msra.mxu2 %v5475_v32  ;;  %v4896_v32 = vld [vmem:[%s11520_s1 + $0xb8] sm:$0xf0]  ;;  %v5667_v49 = vor.u32 %v7317_v35, %v5664_v36  ;;  %v9629_v36 = vld [vmem:[%s11521_s2] sm:$0xff] }
 0x10f   :  { %v4899_v44 = vor.u32 %v7125_v26, %v4896_v32  ;;  %v6222_v32 = vld [vmem:[%s11522_s3 + $0x210] sm:$0xf]  ;;  %v7487_v35 = vld [vmem:[%s11522_s3 + $0x2d8] sm:$0xf0]  ;;  %v340_v60 = vperm.slane %v9629_v36, 0  ;;  %v341_v61 = vperm.slane %v9629_v36, 1 }
 0x110   :  { %2255 = vmatpush.bf16.msra.mxu0 %v5807_v46  ;;  %v7113_v46 = vld [vmem:[%s11520_s1 + $0x2c] sm:$0xf] }
 0x111   :  { %2269 = vmatpush.bf16.msra.mxu1 %v5043_v47  ;;  %2297 = vmatpush.bf16.msra.mxu3 %v5811_v56  ;;  %v4848_v47 = vld [vmem:[%s11520_s1 + $0x58] sm:$0xf0]  ;;  %v9607_v24 = vpop.f32.mrf.mxu2 }
 0x112   :  { %2283 = vmatpush.bf16.msra.mxu2 %v5427_v48  ;;  %v7209_v48 = vld [vmem:[%s11520_s1 + $0x32c] sm:$0xf]  ;;  %v5616_v56 = vld [vmem:[%s11520_s1 + $0x658] sm:$0xf0]  ;;  %v4851_v8 = vor.u32 %v7113_v46, %v4848_v47  ;;  %v6018_v46 = vld [vmem:[%s11522_s3 + $0x78] sm:$0xf] }
 0x113   :  { %v5235_v9 = vor.u32 %v7209_v48, %v5232_v50  ;;  %v5619_v16 = vor.u32 %v7305_v51, %v5616_v56  ;;  %v7412_v47 = vld [vmem:[%s11522_s3 + $0x80] sm:$0xf0]  ;;  %v6114_v48 = vld [vmem:[%s11522_s3 + $0x138] sm:$0xf] }
 0x114   :  { %2256 = vmatpush.bf16.msra.mxu0 %v5759_v1  ;;  %v5615_v1 = vor.u32 %v7311_v43, %v5614_v42  ;;  %v9609_v25 = vpop.f32.mrf.mxu3  ;;  %v9631_v42 = vpop.f32.mrf.mxu0  ;;  %v7436_v50 = vld [vmem:[%s11522_s3 + $0x140] sm:$0xf0]  ;;  %v6210_v51 = vld [vmem:[%s11522_s3 + $0x1f8] sm:$0xf] }
 0x115   :  { %2270 = vmatpush.bf16.msra.mxu1 %v4995_v4  ;;  %2298 = vmatpush.bf16.msra.mxu3 %v5763_v10  ;;  %v7442_v4 = vld [vmem:[%s11522_s3 + $0x170] sm:$0xf0]  ;;  %v6330_v10 = vld [vmem:[%s11522_s3 + $0x2e8] sm:$0xf]  ;;  %v9633_v43 = vpop.f32.mrf.mxu1  ;;  %v7460_v56 = vld [vmem:[%s11522_s3 + $0x200] sm:$0xf0] }
 0x116   :  { %2284 = vmatpush.bf16.msra.mxu2 %v5379_v6  ;;  %v6234_v6 = vld [vmem:[%s11522_s3 + $0x228] sm:$0xf]  ;;  %v6139_v18 = vor.u32 %v7442_v4, %v6138_v62  ;;  %v6331_v26 = vor.u32 %v7490_v15, %v6330_v10  ;;  %v6306_v62 = vld [vmem:[%s11522_s3 + $0x2b8] sm:$0xf]  ;;  %v6019_v4 = vor.u32 %v7412_v47, %v6018_v46  ;;  %v7433_v15 = vld [vmem:[%s11522_s3 + $0x128] sm:$0xf0] }
 0x117   :  { %v6235_v19 = vor.u32 %v7466_v7, %v6234_v6  ;;  %v6115_v6 = vor.u32 %v7436_v50, %v6114_v48  ;;  %v6211_v7 = vor.u32 %v7460_v56, %v6210_v51  ;;  %v6282_v50 = vld [vmem:[%s11522_s3 + $0x288] sm:$0xf]  ;;  %v7478_v51 = vld [vmem:[%s11522_s3 + $0x290] sm:$0xf0] }
 0x118   :  { %2257 = vmatpush.bf16.msra.mxu0 %v5711_v21  ;;  %v6030_v21 = vld [vmem:[%s11522_s3 + $0x90] sm:$0xf] }
 0x119   :  { %2271 = vmatpush.bf16.msra.mxu1 %v4947_v22  ;;  %2299 = vmatpush.bf16.msra.mxu3 %v5715_v31  ;;  %v7415_v22 = vld [vmem:[%s11522_s3 + $0x98] sm:$0xf0] }
 0x11a   :  { %2285 = vmatpush.bf16.msra.mxu2 %v5331_v23  ;;  %v6126_v23 = vld [vmem:[%s11522_s3 + $0x150] sm:$0xf]  ;;  %v7439_v31 = vld [vmem:[%s11522_s3 + $0x158] sm:$0xf0] }
 0x11c   :  { %2258 = vmatpush.bf16.msra.mxu0 %v5663_v41  ;;  %v6031_v41 = vor.u32 %v7415_v22, %v6030_v21  ;;  %v9676_v10 = vpop.f32.mrf.mxu3  ;;  %v1856_v21 = vadd.f32 %v9268_v0, %v341_v61  ;;  %v6294_v22 = vld [vmem:[%s11522_s3 + $0x2a0] sm:$0xf]  ;;  %v9719_v48 = vpop.f32.mrf.mxu0 }
 0x11d   :  { %2272 = vmatpush.bf16.msra.mxu1 %v4899_v44  ;;  %2300 = vmatpush.bf16.msra.mxu3 %v5667_v49  ;;  %v6127_v44 = vor.u32 %v7439_v31, %v6126_v23  ;;  %v6319_v49 = vor.u32 %v7487_v35, %v6318_v34  ;;  %v7481_v23 = vld [vmem:[%s11522_s3 + $0x2a8] sm:$0xf0]  ;;  %v342_v31 = vperm.slane %v9629_v36, 2  ;;  %v7406_v34 = vld [vmem:[%s11522_s3 + $0x50] sm:$0xf0] }
 0x11e   :  { %2286 = vmatpush.bf16.msra.mxu2 %v5283_v45  ;;  %v6223_v45 = vor.u32 %v7463_v33, %v6222_v32  ;;  %v343_v32 = vperm.slane %v9629_v36, 3  ;;  %v5994_v33 = vld [vmem:[%s11522_s3 + $0x48] sm:$0xf]  ;;  %v6295_v35 = vor.u32 %v7481_v23, %v6294_v22  ;;  %v1870_v56 = vadd.f32 %v9368_v52, %v1856_v21  ;;  %v7403_v52 = vld [vmem:[%s11522_s3 + $0x38] sm:$0xf0] }
 0x120   :  { %2259 = vmatpush.bf16.msra.mxu0 %v5615_v1  ;;  %v7484_v1 = vld [vmem:[%s11522_s3 + $0x2c0] sm:$0xf0] }
 0x121   :  { %2273 = vmatpush.bf16.msra.mxu1 %v4851_v8  ;;  %2301 = vmatpush.bf16.msra.mxu3 %v5619_v16  ;;  %v6102_v8 = vld [vmem:[%s11522_s3 + $0x120] sm:$0xf] }
 0x122   :  { %2287 = vmatpush.bf16.msra.mxu2 %v5235_v9  ;;  %v6307_v9 = vor.u32 %v7484_v1, %v6306_v62  ;;  %v6198_v16 = vld [vmem:[%s11522_s3 + $0x1e0] sm:$0xf] }
 0x123   :  { %2260 = vmatmul.bf16.vlgmr.msra.gmra.mxu0 %v8059_v20 }
 0x124   :  { %4270 = vmatpush.bf16.msrb.mxu0 %v6043_v17  ;;  %2274 = vmatmul.bf16.vlgmr.msra.gmra.mxu1 %v7998_v57  ;;  %v6006_v57 = vld [vmem:[%s11522_s3 + $0x60] sm:$0xf]  ;;  %v7457_v17 = vld [vmem:[%s11522_s3 + $0x1e8] sm:$0xf0] }
 0x125   :  { %4284 = vmatpush.bf16.msrb.mxu1 %v6139_v18  ;;  %4312 = vmatpush.bf16.msrb.mxu3 %v6331_v26  ;;  %v1814_v18 = vadd.f32 %v9214_v37, %v340_v60  ;;  %v1858_v26 = vadd.f32 %v9339_v40, %v341_v61  ;;  %v6199_v0 = vor.u32 %v7457_v17, %v6198_v16  ;;  %v6090_v40 = vld [vmem:[%s11522_s3 + $0x108] sm:$0xf] }
 0x126   :  { %4298 = vmatpush.bf16.msrb.mxu2 %v6235_v19  ;;  %2302 = vmatmul.bf16.vlgmr.msra.gmra.mxu3 %v8059_v20  ;;  %v9674_v20 = vpop.f32.mrf.mxu2  ;;  %v1816_v19 = vadd.f32 %v9288_v12, %v340_v60  ;;  %v6103_v12 = vor.u32 %v7433_v15, %v6102_v8  ;;  %v1900_v61 = vadd.f32 %v9471_v54, %v342_v31 }
 0x127   :  { %2288 = vmatmul.bf16.vlgmr.msra.gmra.mxu2 %v8025_v5  ;;  %v7409_v5 = vld [vmem:[%s11522_s3 + $0x68] sm:$0xf0]  ;;  %v1828_v46 = vadd.f32 %v9216_v38, %v1814_v18  ;;  %v1872_v60 = vadd.f32 %v9434_v29, %v1858_v26  ;;  %v1898_v38 = vadd.f32 %v9402_v11, %v342_v31  ;;  %v6078_v11 = vld [vmem:[%s11522_s3 + $0xf0] sm:$0xf]  ;;  %v1940_v29 = vadd.f32 %v9492_v3, %v343_v32  ;;  %v7424_v31 = vld [vmem:[%s11522_s3 + $0xe0] sm:$0xf0] }
 0x128   :  { %4271 = vmatpush.bf16.msrb.mxu0 %v6031_v41  ;;  %v6007_v37 = vor.u32 %v7409_v5, %v6006_v57  ;;  %v7430_v41 = vld [vmem:[%s11522_s3 + $0x110] sm:$0xf0]  ;;  %v1830_v47 = vadd.f32 %v9290_v13, %v1816_v19  ;;  %v5995_v13 = vor.u32 %v7406_v34, %v5994_v33  ;;  %v1942_v54 = vadd.f32 %v9572_v59, %v343_v32  ;;  %v6174_v57 = vld [vmem:[%s11522_s3 + $0x1b0] sm:$0xf]  ;;  %v7451_v5 = vld [vmem:[%s11522_s3 + $0x1b8] sm:$0xf0] }
 0x129   :  { %4285 = vmatpush.bf16.msrb.mxu1 %v6127_v44  ;;  %4313 = vmatpush.bf16.msrb.mxu3 %v6319_v49  ;;  %v6186_v44 = vld [vmem:[%s11522_s3 + $0x1c8] sm:$0xf]  ;;  %v9721_v49 = vpop.f32.mrf.mxu1  ;;  %v6091_v62 = vor.u32 %v7430_v41, %v6090_v40  ;;  %v9754_v8 = vadd.f32 %v9266_v63, %v1828_v46  ;;  %v6270_v59 = vld [vmem:[%s11522_s3 + $0x270] sm:$0xf]  ;;  %v9766_v15 = vadd.f32 %v9370_v53, %v1870_v56  ;;  %v5970_v53 = vld [vmem:[%s11522_s3 + $0x18] sm:$0xf]  ;;  %v9815_v46 = vpop.f32.mrf.mxu0 }
 0x12a   :  { %4299 = vmatpush.bf16.msrb.mxu2 %v6223_v45  ;;  %v7454_v45 = vld [vmem:[%s11522_s3 + $0x1d0] sm:$0xf0]  ;;  %v9757_v3 = vadd.f32 %v9337_v39, %v1830_v47  ;;  %v9769_v16 = vadd.f32 %v9436_v30, %v1872_v60  ;;  %v1912_v63 = vadd.f32 %v9404_v14, %v1898_v38  ;;  %v9774_v39 = vpop.f32.mrf.mxu3  ;;  %v1914_v19 = vadd.f32 %v9473_v55, %v1900_v61  ;;  %v7400_v14 = vld [vmem:[%s11522_s3 + $0x20] sm:$0xf0]  ;;  %v6066_v30 = vld [vmem:[%s11522_s3 + $0xd8] sm:$0xf] }
 0x12b   :  { %v6187_v1 = vor.u32 %v7454_v45, %v6186_v44  ;;  %v6175_v22 = vor.u32 %v7451_v5, %v6174_v57  ;;  %v1954_v23 = vadd.f32 %v9527_v27, %v1940_v29  ;;  %v1956_v55 = vadd.f32 %v9607_v24, %v1942_v54  ;;  %v6162_v32 = vld [vmem:[%s11522_s3 + $0x198] sm:$0xf]  ;;  %v5958_v41 = vld [vmem:[%s11522_s3] sm:$0xf]  ;;  %v7397_v44 = vld [vmem:[%s11522_s3 + $0x8] sm:$0xf0] }
 0x12c   :  { %4272 = vmatpush.bf16.msrb.mxu0 %v6019_v4  ;;  %v5982_v4 = vld [vmem:[%s11522_s3 + $0x30] sm:$0xf]  ;;  %v2320_v27 = vmax.f32 %v9757_v3, 0.0  ;;  %v6258_v24 = vld [vmem:[%s11522_s3 + $0x258] sm:$0xf]  ;;  %v2309_v33 = vmax.f32 %v9766_v15, 0.0  ;;  %v1926_v40 = vadd.f32 %v9490_v2, %v1912_v63  ;;  %v1928_v45 = vadd.f32 %v9570_v58, %v1914_v19 }
 0x12d   :  { %4286 = vmatpush.bf16.msrb.mxu1 %v6115_v6  ;;  %4314 = vmatpush.bf16.msrb.mxu3 %v6307_v9  ;;  %v6283_v6 = vor.u32 %v7478_v51, %v6282_v50  ;;  %v7475_v9 = vld [vmem:[%s11522_s3 + $0x278] sm:$0xf0]  ;;  %v5983_v18 = vor.u32 %v7403_v52, %v5982_v4  ;;  %v2321_v34 = vmax.f32 %v9769_v16, 0.0  ;;  %v6067_v50 = vor.u32 %v7424_v31, %v6066_v30  ;;  %v6054_v51 = vld [vmem:[%s11522_s3 + $0xc0] sm:$0xf] }
 0x12e   :  { %4300 = vmatpush.bf16.msrb.mxu2 %v6211_v7  ;;  %v7427_v7 = vld [vmem:[%s11522_s3 + $0xf8] sm:$0xf0]  ;;  %v9772_v17 = vpop.f32.mrf.mxu2  ;;  %v6271_v26 = vor.u32 %v7475_v9, %v6270_v59  ;;  %v7421_v56 = vld [vmem:[%s11522_s3 + $0xc8] sm:$0xf0]  ;;  %v6150_v58 = vld [vmem:[%s11522_s3 + $0x180] sm:$0xf]  ;;  %v1968_v60 = vadd.f32 %v9529_v28, %v1954_v23  ;;  %v1970_v38 = vadd.f32 %v9609_v25, %v1956_v55  ;;  %v5959_v52 = vor.u32 %v7397_v44, %v5958_v41 }
 0x12f   :  { %v6079_v21 = vor.u32 %v7427_v7, %v6078_v11  ;;  %v7445_v61 = vld [vmem:[%s11522_s3 + $0x188] sm:$0xf0]  ;;  %v6426_v28 = vld [vmem:[%s11522_s3 + $0x3a8] sm:$0xf]  ;;  %v7514_v25 = vld [vmem:[%s11522_s3 + $0x3b0] sm:$0xf0]  ;;  %v9887_v31 = vpack.c.bf16 %v2321_v34, %v2309_v33 }
 0x130   :  { %4273 = vmatpush.bf16.msrb.mxu0 %v6007_v37  ;;  %v7448_v37 = vld [vmem:[%s11522_s3 + $0x1a0] sm:$0xf0]  ;;  %v6522_v4 = vld [vmem:[%s11522_s3 + $0x468] sm:$0xf]  ;;  %v7538_v11 = vld [vmem:[%s11522_s3 + $0x470] sm:$0xf0]  ;;  %v6151_v3 = vor.u32 %v7445_v61, %v6150_v58  ;;  %v6427_v16 = vor.u32 %v7514_v25, %v6426_v28 }
 0x131   :  { %4287 = vmatpush.bf16.msrb.mxu1 %v6103_v12  ;;  %4315 = vmatpush.bf16.msrb.mxu3 %v6295_v35  ;;  %v2308_v12 = vmax.f32 %v9754_v8, 0.0  ;;  %v5971_v35 = vor.u32 %v7400_v14, %v5970_v53  ;;  %v9817_v47 = vpop.f32.mrf.mxu1  ;;  %v6163_v2 = vor.u32 %v7448_v37, %v6162_v32  ;;  %v6618_v29 = vld [vmem:[%s11522_s3 + $0x528] sm:$0xf]  ;;  %v7562_v54 = vld [vmem:[%s11522_s3 + $0x530] sm:$0xf0]  ;;  %v2310_v57 = vmax.f32 %v1926_v40, 0.0 }
 0x132   :  { %4301 = vmatpush.bf16.msrb.mxu2 %v6199_v0  ;;  %v7472_v0 = vld [vmem:[%s11522_s3 + $0x260] sm:$0xf0]  ;;  %v9859_v7 = vpop.f32.mrf.mxu3  ;;  %v2322_v5 = vmax.f32 %v1928_v45, 0.0  ;;  %v6055_v8 = vor.u32 %v7421_v56, %v6054_v51  ;;  %v2311_v59 = vmax.f32 %v1968_v60, 0.0  ;;  %v2323_v9 = vmax.f32 %v1970_v38, 0.0 }
 0x133   :  { %v6714_v63 = vld [vmem:[%s11522_s3 + $0x5e8] sm:$0xf]  ;;  %v6523_v19 = vor.u32 %v7538_v11, %v6522_v4  ;;  %v7511_v53 = vld [vmem:[%s11522_s3 + $0x398] sm:$0xf0]  ;;  %v6510_v14 = vld [vmem:[%s11522_s3 + $0x450] sm:$0xf] }
 0x134   :  { %4274 = vmatpush.bf16.msrb.mxu0 %v5995_v13  ;;  %v6259_v13 = vor.u32 %v7472_v0, %v6258_v24  ;;  %v7535_v30 = vld [vmem:[%s11522_s3 + $0x458] sm:$0xf0]  ;;  %v6606_v23 = vld [vmem:[%s11522_s3 + $0x510] sm:$0xf]  ;;  %v9889_v32 = vpack.c.bf16 %v2322_v5, %v2310_v57  ;;  %v6402_v41 = vld [vmem:[%s11522_s3 + $0x378] sm:$0xf] }
 0x135   :  { %4288 = vmatpush.bf16.msrb.mxu1 %v6091_v62  ;;  %4316 = vmatpush.bf16.msrb.mxu3 %v6283_v6  ;;  %v6246_v62 = vld [vmem:[%s11522_s3 + $0x240] sm:$0xf]  ;;  %v7559_v55 = vld [vmem:[%s11522_s3 + $0x518] sm:$0xf0]  ;;  %v6702_v0 = vld [vmem:[%s11522_s3 + $0x5d0] sm:$0xf]  ;;  %v6511_v34 = vor.u32 %v7535_v30, %v6510_v14 }
 0x136   :  { %4302 = vmatpush.bf16.msrb.mxu2 %v6187_v1  ;;  %v7469_v1 = vld [vmem:[%s11522_s3 + $0x248] sm:$0xf0]  ;;  %v9857_v6 = vpop.f32.mrf.mxu2  ;;  %v7583_v40 = vld [vmem:[%s11522_s3 + $0x5d8] sm:$0xf0]  ;;  %v7508_v44 = vld [vmem:[%s11522_s3 + $0x380] sm:$0xf0] }
 0x137   :  { %v6247_v15 = vor.u32 %v7469_v1, %v6246_v62  ;;  %v6498_v45 = vld [vmem:[%s11522_s3 + $0x438] sm:$0xf]  ;;  %v7556_v51 = vld [vmem:[%s11522_s3 + $0x500] sm:$0xf0]  ;;  %v344_v56 = vperm.slane %v9629_v36, 4  ;;  %v6703_v58 = vor.u32 %v7583_v40, %v6702_v0  ;;  %v6403_v60 = vor.u32 %v7508_v44, %v6402_v41 }
 0x138   :  { %4275 = vmatpush.bf16.msrb.mxu0 %v5983_v18  ;;  %v7586_v18 = vld [vmem:[%s11522_s3 + $0x5f0] sm:$0xf0]  ;;  %v6690_v61 = vld [vmem:[%s11522_s3 + $0x5b8] sm:$0xf]  ;;  %v7580_v62 = vld [vmem:[%s11522_s3 + $0x5c0] sm:$0xf0] }
 0x139   :  { %4289 = vmatpush.bf16.msrb.mxu1 %v6079_v21  ;;  %4317 = vmatpush.bf16.msrb.mxu3 %v6271_v26  ;;  %v6619_v21 = vor.u32 %v7562_v54, %v6618_v29  ;;  %v9885_v26 = vpack.c.bf16 %v2320_v27, %v2308_v12  ;;  %v6715_v37 = vor.u32 %v7586_v18, %v6714_v63  ;;  %v9899_v27 = vpop.f32.mrf.mxu0  ;;  %v9901_v33 = vpop.f32.mrf.mxu1  ;;  %v6390_v25 = vld [vmem:[%s11522_s3 + $0x360] sm:$0xf]  ;;  %v7505_v4 = vld [vmem:[%s11522_s3 + $0x368] sm:$0xf0]  ;;  %v6570_v14 = vld [vmem:[%s11522_s3 + $0x4c8] sm:$0xf] }
 0x13a   :  { %4303 = vmatpush.bf16.msrb.mxu2 %v6175_v22  ;;  %v6414_v22 = vld [vmem:[%s11522_s3 + $0x390] sm:$0xf]  ;;  %v9897_v12 = vpack.c.bf16 %v2323_v9, %v2311_v59  ;;  %v7529_v11 = vld [vmem:[%s11522_s3 + $0x428] sm:$0xf0]  ;;  %v6582_v29 = vld [vmem:[%s11522_s3 + $0x4e0] sm:$0xf]  ;;  %v1982_v57 = vadd.f32 %v9631_v42, %v344_v56  ;;  %v1984_v5 = vadd.f32 %v9719_v48, %v344_v56  ;;  %v6691_v59 = vor.u32 %v7580_v62, %v6690_v61 }
 0x13b   :  { %v6415_v24 = vor.u32 %v7511_v53, %v6414_v22  ;;  %v7553_v54 = vld [vmem:[%s11522_s3 + $0x4e8] sm:$0xf0]  ;;  %v6391_v9 = vor.u32 %v7505_v4, %v6390_v25  ;;  %v6474_v22 = vld [vmem:[%s11522_s3 + $0x408] sm:$0xf]  ;;  %v7526_v53 = vld [vmem:[%s11522_s3 + $0x410] sm:$0xf0] }
 0x13c   :  { %4276 = vmatpush.bf16.msrb.mxu0 %v5971_v35  ;;  %v6607_v35 = vor.u32 %v7559_v55, %v6606_v23  ;;  %v6583_v63 = vor.u32 %v7553_v54, %v6582_v29  ;;  %v7550_v30 = vld [vmem:[%s11522_s3 + $0x4d0] sm:$0xf0]  ;;  %v1996_v23 = vadd.f32 %v9633_v43, %v1982_v57  ;;  %v1998_v55 = vadd.f32 %v9721_v49, %v1984_v5  ;;  %v7499_v41 = vld [vmem:[%s11522_s3 + $0x338] sm:$0xf0]  ;;  %v6462_v44 = vld [vmem:[%s11522_s3 + $0x3f0] sm:$0xf] }
 0x13d   :  { %4290 = vmatpush.bf16.msrb.mxu1 %v6067_v50  ;;  %4318 = vmatpush.bf16.msrb.mxu3 %v6259_v13  ;;  %v7532_v50 = vld [vmem:[%s11522_s3 + $0x440] sm:$0xf0]  ;;  %v9926_v13 = vpop.f32.mrf.mxu3  ;;  %v6475_v49 = vor.u32 %v7526_v53, %v6474_v22  ;;  %v6558_v56 = vld [vmem:[%s11522_s3 + $0x4b0] sm:$0xf]  ;;  %v7571_v25 = vld [vmem:[%s11522_s3 + $0x578] sm:$0xf0] }
 0x13e   :  { %4304 = vmatpush.bf16.msrb.mxu2 %v6163_v2  ;;  %v6594_v2 = vld [vmem:[%s11522_s3 + $0x4f8] sm:$0xf]  ;;  %v2067_v38 = vpop.f32.mrf.mxu2  ;;  %v6499_v1 = vor.u32 %v7532_v50, %v6498_v45  ;;  %v7520_v57 = vld [vmem:[%s11522_s3 + $0x3e0] sm:$0xf0]  ;;  %v7493_v53 = vld [vmem:[%s11522_s3 + $0x308] sm:$0xf0] }
 0x13f   :  { %v6595_v28 = vor.u32 %v7556_v51, %v6594_v2  ;;  %v7523_v51 = vld [vmem:[%s11522_s3 + $0x3f8] sm:$0xf0]  ;;  %v6450_v29 = vld [vmem:[%s11522_s3 + $0x3d8] sm:$0xf] }
 0x140   :  { %4277 = vmatpush.bf16.msrb.mxu0 %v5959_v52  ;;  %v6486_v52 = vld [vmem:[%s11522_s3 + $0x420] sm:$0xf]  ;;  %v6546_v5 = vld [vmem:[%s11522_s3 + $0x498] sm:$0xf] }
 0x141   :  { %4291 = vmatpush.bf16.msrb.mxu1 %v6055_v8  ;;  %4319 = vmatpush.bf16.msrb.mxu3 %v6247_v15  ;;  %v345_v8 = vperm.slane %v9629_v36, 5  ;;  %v6678_v15 = vld [vmem:[%s11522_s3 + $0x5a0] sm:$0xf]  ;;  %v9962_v42 = vpop.f32.mrf.mxu0  ;;  %v6487_v48 = vor.u32 %v7529_v11, %v6486_v52  ;;  %v6354_v52 = vld [vmem:[%s11522_s3 + $0x318] sm:$0xf] }
 0x142   :  { %4305 = vmatpush.bf16.msrb.mxu2 %v6151_v3  ;;  %v346_v3 = vperm.slane %v9629_v36, 6  ;;  %v7496_v11 = vld [vmem:[%s11522_s3 + $0x320] sm:$0xf0] }
 0x143   :  { %4278 = vmatmul.bf16.vlgmr.msrb.gmra.mxu0 %v9885_v26  ;;  %v2107_v18 = vpop.f32.mrf.mxu1  ;;  %v2026_v43 = vadd.f32 %v9774_v39, %v345_v8 }
 0x144   :  { %4326 = vmatpush.bf16.msra.mxu0 %v6427_v16  ;;  %4292 = vmatmul.bf16.vlgmr.msrb.gmra.mxu1 %v9887_v31  ;;  %v7577_v16 = vld [vmem:[%s11522_s3 + $0x5a8] sm:$0xf0]  ;;  %v2066_v45 = vadd.f32 %v9857_v6, %v346_v3  ;;  %v2068_v50 = vadd.f32 %v2067_v38, %v346_v3  ;;  %v10017_v38 = vadd.f32 %v9772_v17, %v1998_v55 }
 0x145   :  { %4340 = vmatpush.bf16.msra.mxu1 %v6523_v19  ;;  %4306 = vmatmul.bf16.vlgmr.msrb.gmra.mxu2 %v9889_v32  ;;  %v6378_v19 = vld [vmem:[%s11522_s3 + $0x348] sm:$0xf]  ;;  %v6679_v0 = vor.u32 %v7577_v16, %v6678_v15 }
 0x146   :  { %4354 = vmatpush.bf16.msra.mxu2 %v6619_v21  ;;  %4320 = vmatmul.bf16.vlgmr.msrb.gmra.mxu3 %v9897_v12  ;;  %v7502_v21 = vld [vmem:[%s11522_s3 + $0x350] sm:$0xf0]  ;;  %v2080_v54 = vadd.f32 %v9859_v7, %v2066_v45  ;;  %v2324_v7 = vmax.f32 %v10017_v38, 0.0 }
 0x147   :  { %4368 = vmatpush.bf16.msra.mxu3 %v6715_v37  ;;  %v2024_v37 = vadd.f32 %v9676_v10, %v345_v8  ;;  %v6379_v40 = vor.u32 %v7502_v21, %v6378_v19  ;;  %v6571_v10 = vor.u32 %v7550_v30, %v6570_v14  ;;  %v2135_v2 = vpop.f32.mrf.mxu3  ;;  %v7544_v8 = vld [vmem:[%s11522_s3 + $0x4a0] sm:$0xf0]  ;;  %v6451_v21 = vor.u32 %v7520_v57, %v6450_v29  ;;  %v6438_v14 = vld [vmem:[%s11522_s3 + $0x3c0] sm:$0xf]  ;;  %v7517_v30 = vld [vmem:[%s11522_s3 + $0x3c8] sm:$0xf0] }
 0x148   :  { %4327 = vmatpush.bf16.msra.mxu0 %v6415_v24  ;;  %v347_v24 = vperm.slane %v9629_v36, 7  ;;  %v6366_v36 = vld [vmem:[%s11522_s3 + $0x330] sm:$0xf]  ;;  %v6547_v22 = vor.u32 %v7544_v8, %v6546_v5  ;;  %v7658_v45 = vld [vmem:[%s11522_s3 + $0x830] sm:$0xf0] }
 0x149   :  { %4341 = vmatpush.bf16.msra.mxu1 %v6511_v34  ;;  %v6666_v34 = vld [vmem:[%s11522_s3 + $0x588] sm:$0xf]  ;;  %v2038_v6 = vadd.f32 %v9815_v46, %v2024_v37  ;;  %v6463_v46 = vor.u32 %v7523_v51, %v6462_v44  ;;  %v6439_v51 = vor.u32 %v7517_v30, %v6438_v14  ;;  %v7086_v14 = vld [vmem:[%s11522_s3 + $0x8d0] sm:$0xf]  ;;  %v6870_v30 = vld [vmem:[%s11522_s3 + $0x720] sm:$0xf] }
 0x14a   :  { %4355 = vmatpush.bf16.msra.mxu2 %v6607_v35  ;;  %v7574_v35 = vld [vmem:[%s11522_s3 + $0x590] sm:$0xf0]  ;;  %v2121_v39 = vpop.f32.mrf.mxu2  ;;  %v2108_v61 = vadd.f32 %v2107_v18, %v347_v24  ;;  %v7568_v18 = vld [vmem:[%s11522_s3 + $0x560] sm:$0xf0]  ;;  %v7002_v44 = vld [vmem:[%s11522_s3 + $0x828] sm:$0xf] }
 0x14b   :  { %4369 = vmatpush.bf16.msra.mxu3 %v6703_v58  ;;  %v7547_v58 = vld [vmem:[%s11522_s3 + $0x4b8] sm:$0xf0]  ;;  %v6667_v62 = vor.u32 %v7574_v35, %v6666_v34  ;;  %v2109_v4 = vpop.f32.mrf.mxu1  ;;  %v6906_v35 = vld [vmem:[%s11522_s3 + $0x768] sm:$0xf] }
 0x14c   :  { %4328 = vmatpush.bf16.msra.mxu0 %v6403_v60  ;;  %v10013_v60 = vadd.f32 %v9674_v20, %v1996_v23  ;;  %v2040_v20 = vadd.f32 %v9899_v27, %v2026_v43  ;;  %v6559_v17 = vor.u32 %v7547_v58, %v6558_v56  ;;  %v2082_v27 = vadd.f32 %v9926_v13, %v2068_v50  ;;  %v2095_v13 = vpop.f32.mrf.mxu0  ;;  %v7634_v43 = vld [vmem:[%s11522_s3 + $0x770] sm:$0xf0] }
 0x14d   :  { %4342 = vmatpush.bf16.msra.mxu1 %v6499_v1  ;;  %v6367_v1 = vor.u32 %v7499_v41, %v6366_v36  ;;  %v2122_v15 = vadd.f32 %v2121_v39, %v2108_v61  ;;  %v2094_v23 = vadd.f32 %v9962_v42, %v2080_v54  ;;  %v7610_v42 = vld [vmem:[%s11522_s3 + $0x6b0] sm:$0xf0]  ;;  %v6907_v61 = vor.u32 %v7634_v43, %v6906_v35 }
 0x14e   :  { %4356 = vmatpush.bf16.msra.mxu2 %v6595_v28  ;;  %v6654_v28 = vld [vmem:[%s11522_s3 + $0x570] sm:$0xf]  ;;  %v2312_v3 = vmax.f32 %v10013_v60, 0.0  ;;  %v2054_v19 = vadd.f32 %v9901_v33, %v2040_v20  ;;  %v2096_v55 = vadd.f32 %v2095_v13, %v2082_v27  ;;  %v7631_v20 = vld [vmem:[%s11522_s3 + $0x758] sm:$0xf0] }
 0x14f   :  { %4370 = vmatpush.bf16.msra.mxu3 %v6691_v59  ;;  %v10048_v59 = vadd.f32 %v9817_v47, %v2038_v6  ;;  %v6655_v16 = vor.u32 %v7571_v25, %v6654_v28  ;;  %v6342_v47 = vld [vmem:[%s11522_s3 + $0x300] sm:$0xf]  ;;  %v2137_v37 = vpop.f32.mrf.mxu3  ;;  %v2314_v58 = vmax.f32 %v2094_v23, 0.0  ;;  %v7607_v28 = vld [vmem:[%s11522_s3 + $0x698] sm:$0xf0] }
 0x150   :  { %4329 = vmatpush.bf16.msra.mxu0 %v6391_v9  ;;  %v2110_v9 = vadd.f32 %v2109_v4, %v347_v24  ;;  %v6534_v24 = vld [vmem:[%s11522_s3 + $0x480] sm:$0xf]  ;;  %v6343_v41 = vor.u32 %v7493_v53, %v6342_v47  ;;  %v2325_v50 = vmax.f32 %v2054_v19, 0.0  ;;  %v2326_v6 = vmax.f32 %v2096_v55, 0.0  ;;  %v6894_v25 = vld [vmem:[%s11522_s3 + $0x750] sm:$0xf] }
 0x151   :  { %4343 = vmatpush.bf16.msra.mxu1 %v6487_v48  ;;  %v6355_v48 = vor.u32 %v7496_v11, %v6354_v52  ;;  %v6990_v52 = vld [vmem:[%s11522_s3 + $0x810] sm:$0xf]  ;;  %v7655_v11 = vld [vmem:[%s11522_s3 + $0x818] sm:$0xf0]  ;;  %v10122_v29 = vpack.c.bf16 %v2324_v7, %v2312_v3  ;;  %v6895_v8 = vor.u32 %v7631_v20, %v6894_v25  ;;  %v7604_v60 = vld [vmem:[%s11522_s3 + $0x680] sm:$0xf0] }
 0x152   :  { %4357 = vmatpush.bf16.msra.mxu2 %v6583_v63  ;;  %v6642_v63 = vld [vmem:[%s11522_s3 + $0x558] sm:$0xf]  ;;  %v2123_v33 = vpop.f32.mrf.mxu2  ;;  %v10126_v57 = vpack.c.bf16 %v2326_v6, %v2314_v58  ;;  %v7628_v7 = vld [vmem:[%s11522_s3 + $0x740] sm:$0xf0]  ;;  %v6991_v13 = vor.u32 %v7655_v11, %v6990_v52  ;;  %v10160_v47 = vld [vmem:[%s11521_s2 + $0x8] sm:$0xf] }
 0x153   :  { %4371 = vmatpush.bf16.msra.mxu3 %v6679_v0  ;;  %v7541_v0 = vld [vmem:[%s11522_s3 + $0x488] sm:$0xf0]  ;;  %v2124_v34 = vadd.f32 %v2123_v33, %v2110_v9  ;;  %v6643_v36 = vor.u32 %v7568_v18, %v6642_v63  ;;  %v6882_v3 = vld [vmem:[%s11522_s3 + $0x738] sm:$0xf]  ;;  %v7098_v9 = vld [vmem:[%s11522_s3 + $0x8e8] sm:$0xf] }
 0x154   :  { %4330 = vmatpush.bf16.msra.mxu0 %v6379_v40  ;;  %v6810_v40 = vld [vmem:[%s11522_s3 + $0x6a8] sm:$0xf]  ;;  %v6535_v56 = vor.u32 %v7541_v0, %v6534_v24  ;;  %v7652_v63 = vld [vmem:[%s11522_s3 + $0x800] sm:$0xf0]  ;;  %v7601_v53 = vld [vmem:[%s11522_s3 + $0x668] sm:$0xf0] }
 0x155   :  { %4344 = vmatpush.bf16.msra.mxu1 %v6475_v49  ;;  %v2313_v49 = vmax.f32 %v10048_v59, 0.0  ;;  %v2138_v39 = vadd.f32 %v2137_v37, %v2124_v34  ;;  %v6811_v38 = vor.u32 %v7610_v42, %v6810_v40  ;;  %v6786_v59 = vld [vmem:[%s11522_s3 + $0x678] sm:$0xf]  ;;  %v7625_v23 = vld [vmem:[%s11522_s3 + $0x728] sm:$0xf0]  ;;  %v348_v37 = vperm.slane %v10160_v47, 0 }
 0x156   :  { %4358 = vmatpush.bf16.msra.mxu2 %v6571_v10  ;;  %v2136_v10 = vadd.f32 %v2135_v2, %v2122_v15  ;;  %v6630_v2 = vld [vmem:[%s11522_s3 + $0x540] sm:$0xf]  ;;  %v7682_v15 = vld [vmem:[%s11522_s3 + $0x8f0] sm:$0xf0]  ;;  %v6787_v19 = vor.u32 %v7604_v60, %v6786_v59  ;;  %v7679_v33 = vld [vmem:[%s11522_s3 + $0x8d8] sm:$0xf0]  ;;  %v6871_v42 = vor.u32 %v7625_v23, %v6870_v30 }
 0x157   :  { %4372 = vmatpush.bf16.msra.mxu3 %v6667_v62  ;;  %v7565_v62 = vld [vmem:[%s11522_s3 + $0x548] sm:$0xf0]  ;;  %v2327_v4 = vmax.f32 %v2138_v39, 0.0  ;;  %v10124_v54 = vpack.c.bf16 %v2325_v50, %v2313_v49  ;;  %v7099_v18 = vor.u32 %v7682_v15, %v7098_v9  ;;  %v6966_v24 = vld [vmem:[%s11522_s3 + $0x7e0] sm:$0xf]  ;;  %v7087_v40 = vor.u32 %v7679_v33, %v7086_v14 }
 0x158   :  { %4331 = vmatpush.bf16.msra.mxu0 %v6367_v1  ;;  %v6798_v1 = vld [vmem:[%s11522_s3 + $0x690] sm:$0xf]  ;;  %v6631_v27 = vor.u32 %v7565_v62, %v6630_v2  ;;  %v7649_v0 = vld [vmem:[%s11522_s3 + $0x7e8] sm:$0xf0]  ;;  %v6762_v49 = vld [vmem:[%s11522_s3 + $0x648] sm:$0xf] }
 0x159   :  { %4345 = vmatpush.bf16.msra.mxu1 %v6463_v46  ;;  %v7003_v46 = vor.u32 %v7658_v45, %v7002_v44  ;;  %v6799_v5 = vor.u32 %v7607_v28, %v6798_v1  ;;  %v7622_v44 = vld [vmem:[%s11522_s3 + $0x710] sm:$0xf0]  ;;  %v6967_v45 = vor.u32 %v7649_v0, %v6966_v24  ;;  %v7676_v50 = vld [vmem:[%s11522_s3 + $0x8c0] sm:$0xf0]  ;;  %v7062_v62 = vld [vmem:[%s11522_s3 + $0x8a0] sm:$0xf] }
 0x15a   :  { %4359 = vmatpush.bf16.msra.mxu2 %v6559_v17  ;;  %v2315_v17 = vmax.f32 %v2136_v10, 0.0  ;;  %v7598_v10 = vld [vmem:[%s11522_s3 + $0x650] sm:$0xf0]  ;;  %v6846_v28 = vld [vmem:[%s11522_s3 + $0x6f0] sm:$0xf] }
 0x15b   :  { %4373 = vmatpush.bf16.msra.mxu3 %v6655_v16  ;;  %v6763_v58 = vor.u32 %v7598_v10, %v6762_v49  ;;  %v7619_v25 = vld [vmem:[%s11522_s3 + $0x6f8] sm:$0xf0]  ;;  %v6738_v60 = vld [vmem:[%s11522_s3 + $0x618] sm:$0xf]  ;;  %v7616_v9 = vld [vmem:[%s11522_s3 + $0x6e0] sm:$0xf0] }
 0x15c   :  { %4332 = vmatpush.bf16.msra.mxu0 %v6355_v48  ;;  %v10147_v16 = vpack.c.bf16 %v2327_v4, %v2315_v17  ;;  %v6978_v48 = vld [vmem:[%s11522_s3 + $0x7f8] sm:$0xf]  ;;  %v6942_v4 = vld [vmem:[%s11522_s3 + $0x7b0] sm:$0xf]  ;;  %v7643_v52 = vld [vmem:[%s11522_s3 + $0x7b8] sm:$0xf0] }
 0x15d   :  { %4346 = vmatpush.bf16.msra.mxu1 %v6451_v21  ;;  %v6883_v21 = vor.u32 %v7628_v7, %v6882_v3  ;;  %v6979_v55 = vor.u32 %v7652_v63, %v6978_v48  ;;  %v7592_v3 = vld [vmem:[%s11522_s3 + $0x620] sm:$0xf0]  ;;  %v6834_v7 = vld [vmem:[%s11522_s3 + $0x6d8] sm:$0xf]  ;;  %v6943_v15 = vor.u32 %v7643_v52, %v6942_v4  ;;  %v7050_v48 = vld [vmem:[%s11522_s3 + $0x888] sm:$0xf] }
 0x15e   :  { %4360 = vmatpush.bf16.msra.mxu2 %v6547_v22  ;;  %v6774_v22 = vld [vmem:[%s11522_s3 + $0x660] sm:$0xf]  ;;  %v7670_v63 = vld [vmem:[%s11522_s3 + $0x890] sm:$0xf0]  ;;  %v7589_v30 = vld [vmem:[%s11522_s3 + $0x608] sm:$0xf0]  ;;  %v6835_v33 = vor.u32 %v7616_v9, %v6834_v7 }
 0x15f   :  { %4374 = vmatpush.bf16.msra.mxu3 %v6643_v36  ;;  %v6775_v34 = vor.u32 %v7601_v53, %v6774_v22  ;;  %v7074_v36 = vld [vmem:[%s11522_s3 + $0x8b8] sm:$0xf]  ;;  %v7051_v22 = vor.u32 %v7670_v63, %v7050_v48  ;;  %v6726_v14 = vld [vmem:[%s11522_s3 + $0x600] sm:$0xf]  ;;  %v7417_v24 = vld [vmem:[%s11522_s3 + $0xac] sm:$0xf] }
 0x160   :  { %4333 = vmatpush.bf16.msra.mxu0 %v6343_v41  ;;  %v2149_v35 = vpop.f32.mrf.mxu0  ;;  %v6858_v41 = vld [vmem:[%s11522_s3 + $0x708] sm:$0xf]  ;;  %v7075_v2 = vor.u32 %v7676_v50, %v7074_v36  ;;  %v6822_v23 = vld [vmem:[%s11522_s3 + $0x6c0] sm:$0xf]  ;;  %v6044_v0 = vld [vmem:[%s11522_s3 + $0xb4] sm:$0xf0] }
 0x161   :  { %4347 = vmatpush.bf16.msra.mxu1 %v6439_v51  ;;  %v2163_v43 = vpop.f32.mrf.mxu1  ;;  %v2150_v39 = vadd.f32 %v2149_v35, %v348_v37  ;;  %v6954_v51 = vld [vmem:[%s11522_s3 + $0x7c8] sm:$0xf]  ;;  %v6859_v6 = vor.u32 %v7622_v44, %v6858_v41  ;;  %v7038_v35 = vld [vmem:[%s11522_s3 + $0x870] sm:$0xf]  ;;  %v6140_v36 = vld [vmem:[%s11522_s3 + $0x174] sm:$0xf0] }
 0x162   :  { %4361 = vmatpush.bf16.msra.mxu2 %v6535_v56  ;;  %v7646_v56 = vld [vmem:[%s11522_s3 + $0x7d0] sm:$0xf0]  ;;  %v6918_v41 = vld [vmem:[%s11522_s3 + $0x780] sm:$0xf]  ;;  %v7465_v50 = vld [vmem:[%s11522_s3 + $0x22c] sm:$0xf] }
 0x163   :  { %4334 = vmatmul.bf16.vlgmr.msra.gmra.mxu0 %v10122_v29  ;;  %4375 = vmatpush.bf16.msra.mxu3 %v6631_v27  ;;  %v6955_v20 = vor.u32 %v7646_v56, %v6954_v51  ;;  %v2164_v17 = vadd.f32 %v2163_v43, %v2150_v39  ;;  %v7667_v43 = vld [vmem:[%s11522_s3 + $0x878] sm:$0xf0]  ;;  %v6236_v39 = vld [vmem:[%s11522_s3 + $0x234] sm:$0xf0]  ;;  %v6727_v56 = vor.u32 %v7589_v30, %v6726_v14  ;;  %v7462_v52 = vld [vmem:[%s11522_s3 + $0x214] sm:$0xf] }
 0x164   :  { %4382 = vmatpush.bf16.msrb.mxu0 %v6811_v38  ;;  %4348 = vmatmul.bf16.vlgmr.msra.gmra.mxu1 %v10124_v54  ;;  %v6750_v38 = vld [vmem:[%s11522_s3 + $0x630] sm:$0xf]  ;;  %v7039_v44 = vor.u32 %v7667_v43, %v7038_v35  ;;  %v6239_v4 = vor.u32 %v7465_v50, %v6236_v39  ;;  %v6020_v7 = vld [vmem:[%s11522_s3 + $0x84] sm:$0xf0]  ;;  %v7489_v48 = vld [vmem:[%s11522_s3 + $0x2ec] sm:$0xf] }
 0x165   :  { %4396 = vmatpush.bf16.msrb.mxu1 %v6907_v61  ;;  %4362 = vmatmul.bf16.vlgmr.msra.gmra.mxu2 %v10126_v57  ;;  %v7595_v61 = vld [vmem:[%s11522_s3 + $0x638] sm:$0xf0]  ;;  %v6116_v9 = vld [vmem:[%s11522_s3 + $0x144] sm:$0xf0]  ;;  %v7456_v35 = vld [vmem:[%s11522_s3 + $0x1e4] sm:$0xf] }
 0x166   :  { %4410 = vmatpush.bf16.msrb.mxu2 %v7003_v46  ;;  %4376 = vmatmul.bf16.vlgmr.msra.gmra.mxu3 %v10147_v16  ;;  %v7673_v46 = vld [vmem:[%s11522_s3 + $0x8a8] sm:$0xf0]  ;;  %v6751_v27 = vor.u32 %v7595_v61, %v6750_v38  ;;  %v6047_v38 = vor.u32 %v7417_v24, %v6044_v0  ;;  %v6104_v24 = vld [vmem:[%s11522_s3 + $0x12c] sm:$0xf0]  ;;  %v6320_v0 = vld [vmem:[%s11522_s3 + $0x2dc] sm:$0xf0] }
 0x167   :  { %4424 = vmatpush.bf16.msrb.mxu3 %v7099_v18  ;;  %v7063_v11 = vor.u32 %v7673_v46, %v7062_v62  ;;  %v7414_v62 = vld [vmem:[%s11522_s3 + $0x94] sm:$0xf]  ;;  %v6200_v43 = vld [vmem:[%s11522_s3 + $0x1ec] sm:$0xf0]  ;;  %v6092_v39 = vld [vmem:[%s11522_s3 + $0x114] sm:$0xf0] }
 0x168   :  { %4383 = vmatpush.bf16.msrb.mxu0 %v6799_v5  ;;  %v6847_v5 = vor.u32 %v7619_v25, %v6846_v28  ;;  %v7438_v28 = vld [vmem:[%s11522_s3 + $0x154] sm:$0xf]  ;;  %v6128_v25 = vld [vmem:[%s11522_s3 + $0x15c] sm:$0xf0] }
 0x169   :  { %4397 = vmatpush.bf16.msrb.mxu1 %v6895_v8  ;;  %v2151_v8 = vpop.f32.mrf.mxu0  ;;  %v2165_v59 = vpop.f32.mrf.mxu1 }
 0x16a   :  { %4411 = vmatpush.bf16.msrb.mxu2 %v6991_v13  ;;  %v2177_v1 = vpop.f32.mrf.mxu2  ;;  %v2152_v13 = vadd.f32 %v2151_v8, %v348_v37  ;;  %v7613_v37 = vld [vmem:[%s11522_s3 + $0x6c8] sm:$0xf0] }
 0x16b   :  { %4425 = vmatpush.bf16.msrb.mxu3 %v7087_v40  ;;  %v2178_v18 = vadd.f32 %v2177_v1, %v2164_v17  ;;  %v6032_v1 = vld [vmem:[%s11522_s3 + $0x9c] sm:$0xf0] }
 0x16c   :  { %4384 = vmatpush.bf16.msrb.mxu0 %v6787_v19  ;;  %v6930_v19 = vld [vmem:[%s11522_s3 + $0x798] sm:$0xf]  ;;  %v2166_v53 = vadd.f32 %v2165_v59, %v2152_v13  ;;  %v6035_v8 = vor.u32 %v7414_v62, %v6032_v1  ;;  %v6131_v59 = vor.u32 %v7438_v28, %v6128_v25  ;;  %v7435_v13 = vld [vmem:[%s11522_s3 + $0x13c] sm:$0xf]  ;;  %v7402_v25 = vld [vmem:[%s11522_s3 + $0x34] sm:$0xf] }
 0x16d   :  { %4398 = vmatpush.bf16.msrb.mxu1 %v6883_v21  ;;  %v7640_v21 = vld [vmem:[%s11522_s3 + $0x7a0] sm:$0xf0]  ;;  %v2316_v49 = vmax.f32 %v2178_v18, 0.0  ;;  %v6332_v18 = vld [vmem:[%s11522_s3 + $0x2f4] sm:$0xf0]  ;;  %v6119_v30 = vor.u32 %v7435_v13, %v6116_v9 }
 0x16e   :  { %4412 = vmatpush.bf16.msrb.mxu2 %v6979_v55  ;;  %v6739_v55 = vor.u32 %v7592_v3, %v6738_v60  ;;  %v2191_v60 = vpop.f32.mrf.mxu3  ;;  %v7411_v3 = vld [vmem:[%s11522_s3 + $0x7c] sm:$0xf]  ;;  %v6188_v62 = vld [vmem:[%s11522_s3 + $0x1d4] sm:$0xf0] }
 0x16f   :  { %4426 = vmatpush.bf16.msrb.mxu3 %v7075_v2  ;;  %v6823_v2 = vor.u32 %v7613_v37, %v6822_v23  ;;  %v6023_v14 = vor.u32 %v7411_v3, %v6020_v7  ;;  %v7408_v23 = vld [vmem:[%s11522_s3 + $0x64] sm:$0xf]  ;;  %v6176_v3 = vld [vmem:[%s11522_s3 + $0x1bc] sm:$0xf0] }
 0x170   :  { %4385 = vmatpush.bf16.msrb.mxu0 %v6775_v34  ;;  %v7441_v34 = vld [vmem:[%s11522_s3 + $0x16c] sm:$0xf]  ;;  %v7432_v37 = vld [vmem:[%s11522_s3 + $0x124] sm:$0xf] }
 0x171   :  { %4399 = vmatpush.bf16.msrb.mxu1 %v6871_v42  ;;  %v6931_v42 = vor.u32 %v7640_v21, %v6930_v19  ;;  %v6143_v61 = vor.u32 %v7441_v34, %v6140_v36  ;;  %v349_v19 = vperm.slane %v10160_v47, 1  ;;  %v7459_v21 = vld [vmem:[%s11522_s3 + $0x1fc] sm:$0xf]  ;;  %v6107_v36 = vor.u32 %v7432_v37, %v6104_v24  ;;  %v5960_v37 = vld [vmem:[%s11522_s3 + $0xc] sm:$0xf0] }
 0x172   :  { %4413 = vmatpush.bf16.msrb.mxu2 %v6967_v45  ;;  %v2179_v40 = vpop.f32.mrf.mxu2  ;;  %v7637_v45 = vld [vmem:[%s11522_s3 + $0x788] sm:$0xf0]  ;;  %v7447_v24 = vld [vmem:[%s11522_s3 + $0x19c] sm:$0xf] }
 0x173   :  { %4427 = vmatpush.bf16.msrb.mxu3 %v7063_v11  ;;  %v2180_v10 = vadd.f32 %v2179_v40, %v2166_v53  ;;  %v6224_v11 = vld [vmem:[%s11522_s3 + $0x21c] sm:$0xf0]  ;;  %v6335_v53 = vor.u32 %v7489_v48, %v6332_v18  ;;  %v5972_v48 = vld [vmem:[%s11522_s3 + $0x24] sm:$0xf0] }
 0x174   :  { %4386 = vmatpush.bf16.msrb.mxu0 %v6763_v58  ;;  %v7026_v58 = vld [vmem:[%s11522_s3 + $0x858] sm:$0xf]  ;;  %v6227_v63 = vor.u32 %v7462_v52, %v6224_v11  ;;  %v7426_v52 = vld [vmem:[%s11522_s3 + $0xf4] sm:$0xf]  ;;  %v6080_v11 = vld [vmem:[%s11522_s3 + $0xfc] sm:$0xf0] }
 0x175   :  { %4400 = vmatpush.bf16.msrb.mxu1 %v6859_v6  ;;  %v2328_v51 = vmax.f32 %v2180_v10, 0.0  ;;  %v7664_v6 = vld [vmem:[%s11522_s3 + $0x860] sm:$0xf0]  ;;  %v6083_v9 = vor.u32 %v7426_v52, %v6080_v11 }
 0x176   :  { %4414 = vmatpush.bf16.msrb.mxu2 %v6955_v20  ;;  %v6919_v20 = vor.u32 %v7637_v45, %v6918_v41  ;;  %v7027_v46 = vor.u32 %v7664_v6, %v7026_v58  ;;  %v7405_v41 = vld [vmem:[%s11522_s3 + $0x4c] sm:$0xf]  ;;  %v6203_v58 = vor.u32 %v7456_v35, %v6200_v43  ;;  %v6056_v35 = vld [vmem:[%s11522_s3 + $0xcc] sm:$0xf0] }
 0x177   :  { %4428 = vmatpush.bf16.msrb.mxu3 %v7051_v22  ;;  %v10320_v17 = vpack.c.bf16 %v2328_v51, %v2316_v49  ;;  %v6212_v22 = vld [vmem:[%s11522_s3 + $0x204] sm:$0xf0]  ;;  %v7429_v45 = vld [vmem:[%s11522_s3 + $0x10c] sm:$0xf]  ;;  %v7483_v51 = vld [vmem:[%s11522_s3 + $0x2bc] sm:$0xf] }
 0x178   :  { %4387 = vmatpush.bf16.msrb.mxu0 %v6751_v27  ;;  %v7014_v27 = vld [vmem:[%s11522_s3 + $0x840] sm:$0xf]  ;;  %v6215_v40 = vor.u32 %v7459_v21, %v6212_v22  ;;  %v6095_v28 = vor.u32 %v7429_v45, %v6092_v39  ;;  %v6068_v21 = vld [vmem:[%s11522_s3 + $0xe4] sm:$0xf0]  ;;  %v7477_v22 = vld [vmem:[%s11522_s3 + $0x28c] sm:$0xf] }
 0x179   :  { %4401 = vmatpush.bf16.msrb.mxu1 %v6847_v5  ;;  %v7661_v5 = vld [vmem:[%s11522_s3 + $0x848] sm:$0xf0]  ;;  %v6524_v45 = vld [vmem:[%s11522_s3 + $0x474] sm:$0xf0] }
 0x17a   :  { %4415 = vmatpush.bf16.msrb.mxu2 %v6943_v15  ;;  %v7015_v15 = vor.u32 %v7661_v5, %v7014_v27  ;;  %v6296_v27 = vld [vmem:[%s11522_s3 + $0x2ac] sm:$0xf0]  ;;  %v7513_v43 = vld [vmem:[%s11522_s3 + $0x3ac] sm:$0xf] }
 0x17b   :  { %4429 = vmatpush.bf16.msrb.mxu3 %v7039_v44  ;;  %v5996_v44 = vld [vmem:[%s11522_s3 + $0x54] sm:$0xf0] }
 0x17c   :  { %4388 = vmatpush.bf16.msrb.mxu0 %v6739_v55  ;;  %v6008_v55 = vld [vmem:[%s11522_s3 + $0x6c] sm:$0xf0]  ;;  %v5999_v1 = vor.u32 %v7405_v41, %v5996_v44  ;;  %v6428_v41 = vld [vmem:[%s11522_s3 + $0x3b4] sm:$0xf0]  ;;  %v7537_v44 = vld [vmem:[%s11522_s3 + $0x46c] sm:$0xf] }
 0x17d   :  { %4402 = vmatpush.bf16.msrb.mxu1 %v6835_v33  ;;  %v7486_v33 = vld [vmem:[%s11522_s3 + $0x2d4] sm:$0xf]  ;;  %v6011_v10 = vor.u32 %v7408_v23, %v6008_v55 }
 0x17e   :  { %4416 = vmatpush.bf16.msrb.mxu2 %v6931_v42  ;;  %v6323_v34 = vor.u32 %v7486_v33, %v6320_v0  ;;  %v2192_v42 = vadd.f32 %v2191_v60, %v349_v19  ;;  %v7450_v60 = vld [vmem:[%s11522_s3 + $0x1b4] sm:$0xf]  ;;  %v7396_v33 = vld [vmem:[%s11522_s3 + $0x4] sm:$0xf]  ;;  %v6164_v0 = vld [vmem:[%s11522_s3 + $0x1a4] sm:$0xf0] }
 0x17f   :  { %4430 = vmatpush.bf16.msrb.mxu3 %v7027_v46  ;;  %v7480_v46 = vld [vmem:[%s11522_s3 + $0x2a4] sm:$0xf] }
 0x180   :  { %4389 = vmatpush.bf16.msrb.mxu0 %v6727_v56  ;;  %v2205_v49 = vpop.f32.mrf.mxu0  ;;  %v6308_v56 = vld [vmem:[%s11522_s3 + $0x2c4] sm:$0xf0] }
 0x181   :  { %4403 = vmatpush.bf16.msrb.mxu1 %v6823_v2  ;;  %v2219_v50 = vpop.f32.mrf.mxu1  ;;  %v2193_v2 = vpop.f32.mrf.mxu3  ;;  %v6311_v6 = vor.u32 %v7483_v51, %v6308_v56  ;;  %v7444_v56 = vld [vmem:[%s11522_s3 + $0x184] sm:$0xf] }
 0x182   :  { %4417 = vmatpush.bf16.msrb.mxu2 %v6919_v20  ;;  %v5984_v20 = vld [vmem:[%s11522_s3 + $0x3c] sm:$0xf0] }
 0x183   :  { %4390 = vmatmul.bf16.vlgmr.msrb.gmra.mxu0 %v10320_v17  ;;  %4431 = vmatpush.bf16.msrb.mxu3 %v7015_v15  ;;  %v5987_v13 = vor.u32 %v7402_v25, %v5984_v20  ;;  %v7399_v15 = vld [vmem:[%s11522_s3 + $0x1c] sm:$0xf]  ;;  %v6416_v25 = vld [vmem:[%s11522_s3 + $0x39c] sm:$0xf0]  ;;  %v7534_v20 = vld [vmem:[%s11522_s3 + $0x454] sm:$0xf] }
 0x184   :  { %4438 = vmatpush.bf16.msra.mxu0 %v6047_v38  ;;  %v2206_v38 = vadd.f32 %v2205_v49, %v2192_v42  ;;  %v7420_v42 = vld [vmem:[%s11522_s3 + $0xc4] sm:$0xf] }
 0x185   :  { %4452 = vmatpush.bf16.msra.mxu1 %v6143_v61  ;;  %v7453_v61 = vld [vmem:[%s11522_s3 + $0x1cc] sm:$0xf] }
 0x186   :  { %4466 = vmatpush.bf16.msra.mxu2 %v6239_v4  ;;  %v2194_v4 = vadd.f32 %v2193_v2, %v349_v19  ;;  %v6191_v5 = vor.u32 %v7453_v61, %v6188_v62  ;;  %v6152_v2 = vld [vmem:[%s11522_s3 + $0x18c] sm:$0xf0]  ;;  %v6260_v61 = vld [vmem:[%s11522_s3 + $0x264] sm:$0xf0]  ;;  %v6431_v62 = vor.u32 %v7513_v43, %v6428_v41  ;;  %v351_v41 = vperm.slane %v10160_v47, 3 }
 0x187   :  { %4480 = vmatpush.bf16.msra.mxu3 %v6335_v53  ;;  %v6284_v53 = vld [vmem:[%s11522_s3 + $0x294] sm:$0xf0] }
 0x188   :  { %4439 = vmatpush.bf16.msra.mxu0 %v6035_v8  ;;  %v6299_v8 = vor.u32 %v7480_v46, %v6296_v27  ;;  %v2207_v7 = vpop.f32.mrf.mxu0  ;;  %v6512_v46 = vld [vmem:[%s11522_s3 + $0x45c] sm:$0xf0] }
 0x189   :  { %4453 = vmatpush.bf16.msra.mxu1 %v6131_v59  ;;  %v2220_v59 = vadd.f32 %v2219_v50, %v2206_v38  ;;  %v2208_v18 = vadd.f32 %v2207_v7, %v2194_v4  ;;  %v2221_v19 = vpop.f32.mrf.mxu1  ;;  %v6167_v50 = vor.u32 %v7447_v24, %v6164_v0  ;;  %v7471_v38 = vld [vmem:[%s11522_s3 + $0x25c] sm:$0xf]  ;;  %v6155_v4 = vor.u32 %v7444_v56, %v6152_v2  ;;  %v2247_v27 = vpop.f32.mrf.mxu3  ;;  %v6404_v7 = vld [vmem:[%s11522_s3 + $0x384] sm:$0xf0]  ;;  %v6380_v24 = vld [vmem:[%s11522_s3 + $0x354] sm:$0xf0] }
 0x18a   :  { %4467 = vmatpush.bf16.msra.mxu2 %v6227_v63  ;;  %v7423_v63 = vld [vmem:[%s11522_s3 + $0xdc] sm:$0xf]  ;;  %v6263_v52 = vor.u32 %v7471_v38, %v6260_v61  ;;  %v2233_v11 = vpop.f32.mrf.mxu2  ;;  %v7525_v0 = vld [vmem:[%s11522_s3 + $0x40c] sm:$0xf] }
 0x18b   :  { %4481 = vmatpush.bf16.msra.mxu3 %v6323_v34  ;;  %v2317_v23 = vmax.f32 %v2220_v59, 0.0  ;;  %v2222_v55 = vadd.f32 %v2221_v19, %v2208_v18  ;;  %v6071_v34 = vor.u32 %v7423_v63, %v6068_v21  ;;  %v7504_v18 = vld [vmem:[%s11522_s3 + $0x364] sm:$0xf]  ;;  %v6392_v19 = vld [vmem:[%s11522_s3 + $0x36c] sm:$0xf0] }
 0x18c   :  { %4440 = vmatpush.bf16.msra.mxu0 %v6023_v14  ;;  %v6179_v14 = vor.u32 %v7450_v60, %v6176_v3  ;;  %v6515_v60 = vor.u32 %v7534_v20, %v6512_v46  ;;  %v7507_v3 = vld [vmem:[%s11522_s3 + $0x37c] sm:$0xf]  ;;  %v7528_v21 = vld [vmem:[%s11522_s3 + $0x424] sm:$0xf]  ;;  %v7561_v46 = vld [vmem:[%s11522_s3 + $0x52c] sm:$0xf] }
 0x18d   :  { %4454 = vmatpush.bf16.msra.mxu1 %v6119_v30  ;;  %v6287_v30 = vor.u32 %v7477_v22, %v6284_v53  ;;  %v2329_v49 = vmax.f32 %v2222_v55, 0.0  ;;  %v6488_v22 = vld [vmem:[%s11522_s3 + $0x42c] sm:$0xf0]  ;;  %v350_v53 = vperm.slane %v10160_v47, 2  ;;  %v7501_v55 = vld [vmem:[%s11522_s3 + $0x34c] sm:$0xf] }
 0x18e   :  { %4468 = vmatpush.bf16.msra.mxu2 %v6215_v40  ;;  %v5975_v40 = vor.u32 %v7399_v15, %v5972_v48  ;;  %v6407_v48 = vor.u32 %v7507_v3, %v6404_v7  ;;  %v6383_v43 = vor.u32 %v7501_v55, %v6380_v24  ;;  %v7495_v47 = vld [vmem:[%s11522_s3 + $0x31c] sm:$0xf]  ;;  %v7516_v7 = vld [vmem:[%s11522_s3 + $0x3c4] sm:$0xf] }
 0x18f   :  { %4482 = vmatpush.bf16.msra.mxu3 %v6311_v6  ;;  %v10486_v51 = vpack.c.bf16 %v2329_v49, %v2317_v23  ;;  %v6059_v6 = vor.u32 %v7420_v42, %v6056_v35  ;;  %v6491_v23 = vor.u32 %v7528_v21, %v6488_v22  ;;  %v7558_v22 = vld [vmem:[%s11522_s3 + $0x514] sm:$0xf] }
 0x190   :  { %4441 = vmatpush.bf16.msra.mxu0 %v6011_v10  ;;  %v7474_v10 = vld [vmem:[%s11522_s3 + $0x274] sm:$0xf] }
 0x191   :  { %4455 = vmatpush.bf16.msra.mxu1 %v6107_v36  ;;  %v6272_v36 = vld [vmem:[%s11522_s3 + $0x27c] sm:$0xf0] }
 0x192   :  { %4469 = vmatpush.bf16.msra.mxu2 %v6203_v58  ;;  %v6275_v39 = vor.u32 %v7474_v10, %v6272_v36  ;;  %v5963_v58 = vor.u32 %v7396_v33, %v5960_v37  ;;  %4404 = vmatmul.bf16.vlgmr.msrb.gmra.mxu1 %v10486_v51  ;;  %v2249_v33 = vpop.f32.mrf.mxu3  ;;  %v7498_v10 = vld [vmem:[%s11522_s3 + $0x334] sm:$0xf]  ;;  %v6368_v36 = vld [vmem:[%s11522_s3 + $0x33c] sm:$0xf0] }
 0x193   :  { %4483 = vmatpush.bf16.msra.mxu3 %v6299_v8  ;;  %v6248_v8 = vld [vmem:[%s11522_s3 + $0x24c] sm:$0xf0] }
 0x194   :  { %4442 = vmatpush.bf16.msra.mxu0 %v5999_v1  ;;  %v6527_v1 = vor.u32 %v7537_v44, %v6524_v45  ;;  %v7522_v44 = vld [vmem:[%s11522_s3 + $0x3f4] sm:$0xf]  ;;  %v6464_v45 = vld [vmem:[%s11522_s3 + $0x3fc] sm:$0xf0] }
 0x195   :  { %4456 = vmatpush.bf16.msra.mxu1 %v6095_v28  ;;  %v7510_v28 = vld [vmem:[%s11522_s3 + $0x394] sm:$0xf] }
 0x196   :  { %4470 = vmatpush.bf16.msra.mxu2 %v6191_v5  ;;  %v7468_v5 = vld [vmem:[%s11522_s3 + $0x244] sm:$0xf]  ;;  %v6419_v59 = vor.u32 %v7510_v28, %v6416_v25  ;;  %v7519_v28 = vld [vmem:[%s11522_s3 + $0x3dc] sm:$0xf]  ;;  %v6452_v25 = vld [vmem:[%s11522_s3 + $0x3e4] sm:$0xf0] }
 0x197   :  { %4484 = vmatpush.bf16.msra.mxu3 %v6287_v30  ;;  %v6251_v15 = vor.u32 %v7468_v5, %v6248_v8  ;;  %v6395_v30 = vor.u32 %v7504_v18, %v6392_v19  ;;  %v6455_v8 = vor.u32 %v7519_v28, %v6452_v25  ;;  %v7633_v18 = vld [vmem:[%s11522_s3 + $0x76c] sm:$0xf]  ;;  %v6908_v19 = vld [vmem:[%s11522_s3 + $0x774] sm:$0xf0]  ;;  %v6584_v28 = vld [vmem:[%s11522_s3 + $0x4ec] sm:$0xf0] }
 0x198   :  { %4443 = vmatpush.bf16.msra.mxu0 %v5987_v13  ;;  %v7531_v13 = vld [vmem:[%s11522_s3 + $0x43c] sm:$0xf]  ;;  %v6911_v24 = vor.u32 %v7633_v18, %v6908_v19  ;;  %v7582_v25 = vld [vmem:[%s11522_s3 + $0x5d4] sm:$0xf]  ;;  %v6764_v18 = vld [vmem:[%s11522_s3 + $0x654] sm:$0xf0] }
 0x199   :  { %4457 = vmatpush.bf16.msra.mxu1 %v6083_v9  ;;  %v6500_v9 = vld [vmem:[%s11522_s3 + $0x444] sm:$0xf0]  ;;  %v7621_v19 = vld [vmem:[%s11522_s3 + $0x70c] sm:$0xf] }
 0x19a   :  { %4471 = vmatpush.bf16.msra.mxu2 %v6179_v14  ;;  %v6503_v63 = vor.u32 %v7531_v13, %v6500_v9  ;;  %v2235_v14 = vpop.f32.mrf.mxu2  ;;  %v6440_v13 = vld [vmem:[%s11522_s3 + $0x3cc] sm:$0xf0]  ;;  %v7609_v9 = vld [vmem:[%s11522_s3 + $0x6ac] sm:$0xf] }
 0x19b   :  { %4485 = vmatpush.bf16.msra.mxu3 %v6275_v39  ;;  %v2236_v35 = vadd.f32 %v2235_v14, %v350_v53  ;;  %v6371_v39 = vor.u32 %v7498_v10, %v6368_v36  ;;  %v7555_v10 = vld [vmem:[%s11522_s3 + $0x4fc] sm:$0xf]  ;;  %v6596_v36 = vld [vmem:[%s11522_s3 + $0x504] sm:$0xf0] }
 0x19c   :  { %4444 = vmatpush.bf16.msra.mxu0 %v5975_v40  ;;  %v6476_v40 = vld [vmem:[%s11522_s3 + $0x414] sm:$0xf0] }
 0x19d   :  { %4458 = vmatpush.bf16.msra.mxu1 %v6071_v34  ;;  %v2234_v34 = vadd.f32 %v2233_v11, %v350_v53  ;;  %v6479_v49 = vor.u32 %v7525_v0, %v6476_v40  ;;  %v2250_v56 = vadd.f32 %v2249_v33, %v2236_v35  ;;  %v6608_v53 = vld [vmem:[%s11522_s3 + $0x51c] sm:$0xf0]  ;;  %v7606_v0 = vld [vmem:[%s11522_s3 + $0x694] sm:$0xf] }
 0x19e   :  { %4472 = vmatpush.bf16.msra.mxu2 %v6167_v50  ;;  %v7630_v35 = vld [vmem:[%s11522_s3 + $0x754] sm:$0xf] }
 0x19f   :  { %4486 = vmatpush.bf16.msra.mxu3 %v6263_v52  ;;  %v2248_v50 = vadd.f32 %v2247_v27, %v2234_v34  ;;  %v6611_v34 = vor.u32 %v7558_v22, %v6608_v53 }
 0x1a0   :  { %4445 = vmatpush.bf16.msra.mxu0 %v5963_v58  ;;  %v2261_v37 = vpop.f32.mrf.mxu0 }
 0x1a1   :  { %4459 = vmatpush.bf16.msra.mxu1 %v6059_v6  ;;  %v2275_v42 = vpop.f32.mrf.mxu1  ;;  %v2262_v2 = vadd.f32 %v2261_v37, %v2248_v50  ;;  %v6467_v6 = vor.u32 %v7522_v44, %v6464_v45  ;;  %v6716_v44 = vld [vmem:[%s11522_s3 + $0x5f4] sm:$0xf0] }
 0x1a2   :  { %4473 = vmatpush.bf16.msra.mxu2 %v6155_v4  ;;  %v2276_v38 = vadd.f32 %v2275_v42, %v351_v41  ;;  %v6620_v4 = vld [vmem:[%s11522_s3 + $0x534] sm:$0xf0]  ;;  %v6800_v42 = vld [vmem:[%s11522_s3 + $0x69c] sm:$0xf0] }
 0x1a3   :  { %4446 = vmatmul.bf16.vlgmr.msra.gmra.mxu0 %v9885_v26  ;;  %4487 = vmatpush.bf16.msra.mxu3 %v6251_v15  ;;  %v2318_v52 = vmax.f32 %v2262_v2, 0.0  ;;  %v7603_v2 = vld [vmem:[%s11522_s3 + $0x67c] sm:$0xf] }
 0x1a4   :  { %4494 = vmatpush.bf16.msrb.mxu0 %v6431_v62  ;;  %4460 = vmatmul.bf16.vlgmr.msra.gmra.mxu1 %v9887_v31 }
 0x1a5   :  { %4508 = vmatpush.bf16.msrb.mxu1 %v6527_v1  ;;  %v6356_v1 = vld [vmem:[%s11522_s3 + $0x324] sm:$0xf0] }
 0x1a6   :  { %v6359_v5 = vor.u32 %v7495_v47, %v6356_v1  ;;  %v7627_v47 = vld [vmem:[%s11522_s3 + $0x73c] sm:$0xf]  ;;  %v7552_v1 = vld [vmem:[%s11522_s3 + $0x4e4] sm:$0xf] }
 0x1a8   :  { %4495 = vmatpush.bf16.msrb.mxu0 %v6419_v59  ;;  %v2263_v62 = vpop.f32.mrf.mxu0  ;;  %v7492_v59 = vld [vmem:[%s11522_s3 + $0x304] sm:$0xf] }
 0x1a9   :  { %4509 = vmatpush.bf16.msrb.mxu1 %v6515_v60  ;;  %v2303_v61 = vpop.f32.mrf.mxu3  ;;  %v2264_v20 = vadd.f32 %v2263_v62, %v2250_v56  ;;  %v2277_v27 = vpop.f32.mrf.mxu1  ;;  %v6344_v60 = vld [vmem:[%s11522_s3 + $0x30c] sm:$0xf0] }
 0x1aa   :  { %v2289_v58 = vpop.f32.mrf.mxu2  ;;  %v2278_v21 = vadd.f32 %v2277_v27, %v351_v41  ;;  %v7585_v41 = vld [vmem:[%s11522_s3 + $0x5ec] sm:$0xf]  ;;  %v6776_v27 = vld [vmem:[%s11522_s3 + $0x66c] sm:$0xf0] }
 0x1ab   :  { %v2330_v11 = vmax.f32 %v2264_v20, 0.0  ;;  %v2290_v3 = vadd.f32 %v2289_v58, %v2276_v38  ;;  %v6599_v58 = vor.u32 %v7555_v10, %v6596_v36  ;;  %v6884_v38 = vld [vmem:[%s11522_s3 + $0x744] sm:$0xf0]  ;;  %v6719_v62 = vor.u32 %v7585_v41, %v6716_v44  ;;  %v6704_v20 = vld [vmem:[%s11522_s3 + $0x5dc] sm:$0xf0] }
 0x1ac   :  { %4496 = vmatpush.bf16.msrb.mxu0 %v6407_v48  ;;  %v6623_v48 = vor.u32 %v7561_v46, %v6620_v4  ;;  %v6887_v4 = vor.u32 %v7627_v47, %v6884_v38  ;;  %v7573_v10 = vld [vmem:[%s11522_s3 + $0x58c] sm:$0xf]  ;;  %v6668_v36 = vld [vmem:[%s11522_s3 + $0x594] sm:$0xf0]  ;;  %v6536_v47 = vld [vmem:[%s11522_s3 + $0x48c] sm:$0xf0] }
 0x1ad   :  { %4510 = vmatpush.bf16.msrb.mxu1 %v6503_v63  ;;  %v10604_v15 = vpack.c.bf16 %v2330_v11, %v2318_v52  ;;  %v6812_v63 = vld [vmem:[%s11522_s3 + $0x6b4] sm:$0xf0]  ;;  %v2304_v55 = vadd.f32 %v2303_v61, %v2290_v3  ;;  %v7600_v52 = vld [vmem:[%s11522_s3 + $0x664] sm:$0xf]  ;;  %v6587_v11 = vor.u32 %v7552_v1, %v6584_v28  ;;  %v7570_v38 = vld [vmem:[%s11522_s3 + $0x574] sm:$0xf] }
 0x1ae   :  { %v6815_v37 = vor.u32 %v7609_v9, %v6812_v63  ;;  %v6572_v3 = vld [vmem:[%s11522_s3 + $0x4d4] sm:$0xf0]  ;;  %v6779_v9 = vor.u32 %v7600_v52, %v6776_v27  ;;  %v7597_v63 = vld [vmem:[%s11522_s3 + $0x64c] sm:$0xf]  ;;  %v7612_v52 = vld [vmem:[%s11522_s3 + $0x6c4] sm:$0xf] }
 0x1af   :  { %4418 = vmatmul.bf16.vlgmr.msrb.gmra.mxu2 %v10604_v15  ;;  %v2319_v45 = vmax.f32 %v2304_v55, 0.0  ;;  %v6680_v55 = vld [vmem:[%s11522_s3 + $0x5ac] sm:$0xf0] }
 0x1b0   :  { %4497 = vmatpush.bf16.msrb.mxu0 %v6395_v30  ;;  %v6347_v30 = vor.u32 %v7492_v59, %v6344_v60  ;;  %4522 = vmatpush.bf16.msrb.mxu2 %v6623_v48  ;;  %v6707_v59 = vor.u32 %v7582_v25, %v6704_v20  ;;  %v7549_v60 = vld [vmem:[%s11522_s3 + $0x4cc] sm:$0xf]  ;;  %v7004_v20 = vld [vmem:[%s11522_s3 + $0x834] sm:$0xf0] }
 0x1b1   :  { %4511 = vmatpush.bf16.msrb.mxu1 %v6491_v23  ;;  %v6443_v23 = vor.u32 %v7516_v7, %v6440_v13  ;;  %v2305_v40 = vpop.f32.mrf.mxu3  ;;  %v7579_v7 = vld [vmem:[%s11522_s3 + $0x5bc] sm:$0xf]  ;;  %v6692_v13 = vld [vmem:[%s11522_s3 + $0x5c4] sm:$0xf0]  ;;  %v6575_v22 = vor.u32 %v7549_v60, %v6572_v3  ;;  %v7657_v25 = vld [vmem:[%s11522_s3 + $0x82c] sm:$0xf] }
 0x1b2   :  { %v2291_v14 = vpop.f32.mrf.mxu2  ;;  %v6695_v53 = vor.u32 %v7579_v7, %v6692_v13  ;;  %v7419_v60 = vld [vmem:[%s11522_s3 + $0xb8] sm:$0xf0]  ;;  %v7007_v3 = vor.u32 %v7657_v25, %v7004_v20  ;;  %v6644_v7 = vld [vmem:[%s11522_s3 + $0x564] sm:$0xf0]  ;;  %v6146_v13 = vld [vmem:[%s11522_s3 + $0x170] sm:$0xf] }
 0x1b3   :  { %v2292_v33 = vadd.f32 %v2291_v14, %v2278_v21  ;;  %v6860_v21 = vld [vmem:[%s11522_s3 + $0x714] sm:$0xf0]  ;;  %v7546_v14 = vld [vmem:[%s11522_s3 + $0x4b4] sm:$0xf]  ;;  %v6110_v25 = vld [vmem:[%s11522_s3 + $0x128] sm:$0xf] }
 0x1b4   :  { %4498 = vmatpush.bf16.msrb.mxu0 %v6383_v43  ;;  %v6896_v43 = vld [vmem:[%s11522_s3 + $0x75c] sm:$0xf0]  ;;  %4523 = vmatpush.bf16.msrb.mxu2 %v6611_v34  ;;  %v7434_v20 = vld [vmem:[%s11522_s3 + $0x130] sm:$0xf0] }
 0x1b5   :  { %4512 = vmatpush.bf16.msrb.mxu1 %v6479_v49  ;;  %v2306_v49 = vadd.f32 %v2305_v40, %v2292_v33  ;;  %v6899_v56 = vor.u32 %v7630_v35, %v6896_v43  ;;  %v6767_v33 = vor.u32 %v7597_v63, %v6764_v18  ;;  %v7618_v40 = vld [vmem:[%s11522_s3 + $0x6f4] sm:$0xf]  ;;  %v6848_v34 = vld [vmem:[%s11522_s3 + $0x6fc] sm:$0xf0]  ;;  %v7543_v43 = vld [vmem:[%s11522_s3 + $0x49c] sm:$0xf] }
 0x1b6   :  { %v6851_v44 = vor.u32 %v7618_v40, %v6848_v34  ;;  %v7654_v18 = vld [vmem:[%s11522_s3 + $0x814] sm:$0xf]  ;;  %v6980_v40 = vld [vmem:[%s11522_s3 + $0x804] sm:$0xf0]  ;;  %v7681_v34 = vld [vmem:[%s11522_s3 + $0x8ec] sm:$0xf] }
 0x1b7   :  { %v2331_v50 = vmax.f32 %v2306_v49, 0.0  ;;  %v6548_v49 = vld [vmem:[%s11522_s3 + $0x4a4] sm:$0xf0] }
 0x1b8   :  { %4499 = vmatpush.bf16.msrb.mxu0 %v6371_v39  ;;  %v6803_v39 = vor.u32 %v7606_v0, %v6800_v42  ;;  %4524 = vmatpush.bf16.msrb.mxu2 %v6599_v58  ;;  %v6752_v0 = vld [vmem:[%s11522_s3 + $0x63c] sm:$0xf0]  ;;  %v6671_v58 = vor.u32 %v7573_v10, %v6668_v36  ;;  %v7413_v36 = vld [vmem:[%s11522_s3 + $0x88] sm:$0xf0] }
 0x1b9   :  { %4513 = vmatpush.bf16.msrb.mxu1 %v6467_v6  ;;  %v6788_v6 = vld [vmem:[%s11522_s3 + $0x684] sm:$0xf0]  ;;  %v10658_v61 = vpack.c.bf16 %v2331_v50, %v2319_v45  ;;  %v7591_v45 = vld [vmem:[%s11522_s3 + $0x61c] sm:$0xf]  ;;  %v6026_v10 = vld [vmem:[%s11522_s3 + $0x80] sm:$0xf] }
 0x1ba   :  { %v6791_v46 = vor.u32 %v7603_v2, %v6788_v6  ;;  %v6740_v50 = vld [vmem:[%s11522_s3 + $0x624] sm:$0xf0]  ;;  %v6551_v2 = vor.u32 %v7543_v43, %v6548_v49  ;;  %v7540_v6 = vld [vmem:[%s11522_s3 + $0x484] sm:$0xf] }
 0x1bb   :  { %4432 = vmatmul.bf16.vlgmr.msrb.gmra.mxu3 %v10658_v61  ;;  %v6743_v1 = vor.u32 %v7591_v45, %v6740_v50  ;;  %v6539_v27 = vor.u32 %v7540_v6, %v6536_v47  ;;  %v6122_v45 = vld [vmem:[%s11522_s3 + $0x140] sm:$0xf]  ;;  %v7437_v50 = vld [vmem:[%s11522_s3 + $0x148] sm:$0xf0]  ;;  %v6027_v6 = vor.u32 %v7413_v36, %v6026_v10 }
 0x1bc   :  { %4500 = vmatpush.bf16.msrb.mxu0 %v6359_v5  ;;  %v7624_v5 = vld [vmem:[%s11522_s3 + $0x724] sm:$0xf]  ;;  %4536 = vmatpush.bf16.msrb.mxu3 %v6719_v62  ;;  %v6656_v62 = vld [vmem:[%s11522_s3 + $0x57c] sm:$0xf0]  ;;  %v6123_v47 = vor.u32 %v7437_v50, %v6122_v45  ;;  %v7425_v36 = vld [vmem:[%s11522_s3 + $0xe8] sm:$0xf0] }
 0x1bd   :  { %4514 = vmatpush.bf16.msrb.mxu1 %v6455_v8  ;;  %v6872_v8 = vld [vmem:[%s11522_s3 + $0x72c] sm:$0xf0]  ;;  %4525 = vmatpush.bf16.msrb.mxu2 %v6587_v11  ;;  %v6074_v10 = vld [vmem:[%s11522_s3 + $0xe0] sm:$0xf]  ;;  %v7666_v45 = vld [vmem:[%s11522_s3 + $0x874] sm:$0xf] }
 0x1be   :  { %v6875_v48 = vor.u32 %v7624_v5, %v6872_v8  ;;  %v6824_v11 = vld [vmem:[%s11522_s3 + $0x6cc] sm:$0xf0]  ;;  %v6659_v5 = vor.u32 %v7570_v38, %v6656_v62  ;;  %v7567_v8 = vld [vmem:[%s11522_s3 + $0x55c] sm:$0xf]  ;;  %v6014_v38 = vld [vmem:[%s11522_s3 + $0x68] sm:$0xf] }
 0x1bf   :  { %4474 = vmatmul.bf16.vlgmr.msra.gmra.mxu2 %v9889_v32  ;;  %v6827_v63 = vor.u32 %v7612_v52, %v6824_v11  ;;  %v7410_v62 = vld [vmem:[%s11522_s3 + $0x70] sm:$0xf0]  ;;  %v7675_v52 = vld [vmem:[%s11522_s3 + $0x8bc] sm:$0xf]  ;;  %v7076_v11 = vld [vmem:[%s11522_s3 + $0x8c4] sm:$0xf0] }
 0x1c0   :  { %4501 = vmatpush.bf16.msrb.mxu0 %v6347_v30  ;;  %4537 = vmatpush.bf16.msrb.mxu3 %v6707_v59  ;;  %v6560_v30 = vld [vmem:[%s11522_s3 + $0x4bc] sm:$0xf0]  ;;  %v6050_v59 = vld [vmem:[%s11522_s3 + $0xb0] sm:$0xf] }
 0x1c1   :  { %4515 = vmatpush.bf16.msrb.mxu1 %v6443_v23  ;;  %v7576_v23 = vld [vmem:[%s11522_s3 + $0x5a4] sm:$0xf]  ;;  %4526 = vmatpush.bf16.msrb.mxu2 %v6575_v22  ;;  %v6563_v42 = vor.u32 %v7546_v14, %v6560_v30  ;;  %v6632_v30 = vld [vmem:[%s11522_s3 + $0x54c] sm:$0xf0]  ;;  %v7040_v50 = vld [vmem:[%s11522_s3 + $0x87c] sm:$0xf0] }
 0x1c2   :  { %v6683_v35 = vor.u32 %v7576_v23, %v6680_v55  ;;  %v7564_v22 = vld [vmem:[%s11522_s3 + $0x544] sm:$0xf]  ;;  %v6038_v23 = vld [vmem:[%s11522_s3 + $0x98] sm:$0xf] }
 0x1c3   :  { %4502 = vmatmul.bf16.vlgmr.msrb.gmra.mxu0 %v10122_v29  ;;  %v7416_v55 = vld [vmem:[%s11522_s3 + $0xa0] sm:$0xf0]  ;;  %v6635_v43 = vor.u32 %v7564_v22, %v6632_v30  ;;  %v5990_v22 = vld [vmem:[%s11522_s3 + $0x38] sm:$0xf] }
 0x1c4   :  { %4550 = vmatpush.bf16.msra.mxu0 %v6815_v37  ;;  %4516 = vmatmul.bf16.vlgmr.msrb.gmra.mxu1 %v10124_v54  ;;  %v6863_v37 = vor.u32 %v7621_v19, %v6860_v21  ;;  %v6992_v19 = vld [vmem:[%s11522_s3 + $0x81c] sm:$0xf0]  ;;  %v6051_v21 = vor.u32 %v7419_v60, %v6050_v59  ;;  %v7407_v59 = vld [vmem:[%s11522_s3 + $0x58] sm:$0xf0] }
 0x1c5   :  { %4564 = vmatpush.bf16.msra.mxu1 %v6911_v24  ;;  %v7594_v24 = vld [vmem:[%s11522_s3 + $0x634] sm:$0xf]  ;;  %4538 = vmatpush.bf16.msrb.mxu3 %v6695_v53  ;;  %v6647_v53 = vor.u32 %v7567_v8, %v6644_v7  ;;  %v6002_v8 = vld [vmem:[%s11522_s3 + $0x50] sm:$0xf] }
 0x1c6   :  { %v6755_v41 = vor.u32 %v7594_v24, %v6752_v0  ;;  %4527 = vmatpush.bf16.msrb.mxu2 %v6563_v42  ;;  %v7440_v24 = vld [vmem:[%s11522_s3 + $0x160] sm:$0xf0]  ;;  %v7651_v0 = vld [vmem:[%s11522_s3 + $0x7fc] sm:$0xf]  ;;  %v7100_v42 = vld [vmem:[%s11522_s3 + $0x8f4] sm:$0xf0] }
 0x1c7   :  { %v6098_v7 = vld [vmem:[%s11522_s3 + $0x110] sm:$0xf] }
 0x1c8   :  { %4551 = vmatpush.bf16.msra.mxu0 %v6803_v39  ;;  %v7615_v39 = vld [vmem:[%s11522_s3 + $0x6dc] sm:$0xf] }
 0x1c9   :  { %4565 = vmatpush.bf16.msra.mxu1 %v6899_v56  ;;  %v6836_v56 = vld [vmem:[%s11522_s3 + $0x6e4] sm:$0xf0]  ;;  %4539 = vmatpush.bf16.msrb.mxu3 %v6683_v35  ;;  %v6039_v35 = vor.u32 %v7416_v55, %v6038_v23  ;;  %v6086_v23 = vld [vmem:[%s11522_s3 + $0xf8] sm:$0xf]  ;;  %v7428_v55 = vld [vmem:[%s11522_s3 + $0x100] sm:$0xf0] }
 0x1ca   :  { %v6839_v28 = vor.u32 %v7615_v39, %v6836_v56  ;;  %4528 = vmatpush.bf16.msrb.mxu2 %v6551_v2  ;;  %v7648_v39 = vld [vmem:[%s11522_s3 + $0x7e4] sm:$0xf]  ;;  %v6968_v56 = vld [vmem:[%s11522_s3 + $0x7ec] sm:$0xf0]  ;;  %v7678_v2 = vld [vmem:[%s11522_s3 + $0x8d4] sm:$0xf] }
 0x1cb   :  { %4488 = vmatmul.bf16.vlgmr.msra.gmra.mxu3 %v9897_v12 }
 0x1cc   :  { %4552 = vmatpush.bf16.msra.mxu0 %v6791_v46  ;;  %v7588_v46 = vld [vmem:[%s11522_s3 + $0x604] sm:$0xf] }
 0x1cd   :  { %4566 = vmatpush.bf16.msra.mxu1 %v6887_v4  ;;  %v6728_v4 = vld [vmem:[%s11522_s3 + $0x60c] sm:$0xf0]  ;;  %4540 = vmatpush.bf16.msrb.mxu3 %v6671_v58  ;;  %v7088_v58 = vld [vmem:[%s11522_s3 + $0x8dc] sm:$0xf0] }
 0x1ce   :  { %4529 = vmatpush.bf16.msrb.mxu2 %v6539_v27  ;;  %v6015_v27 = vor.u32 %v7410_v62, %v6014_v38  ;;  %v6062_v38 = vld [vmem:[%s11522_s3 + $0xc8] sm:$0xf] }
 0x1d0   :  { %4553 = vmatpush.bf16.msra.mxu0 %v6779_v9  ;;  %v7443_v9 = vld [vmem:[%s11522_s3 + $0x178] sm:$0xf0] }
 0x1d1   :  { %4567 = vmatpush.bf16.msra.mxu1 %v6875_v48  ;;  %v6731_v48 = vor.u32 %v7588_v46, %v6728_v4  ;;  %4541 = vmatpush.bf16.msrb.mxu3 %v6659_v5  ;;  %v6147_v14 = vor.u32 %v7443_v9, %v6146_v13  ;;  %v7645_v46 = vld [vmem:[%s11522_s3 + $0x7cc] sm:$0xf]  ;;  %v6956_v4 = vld [vmem:[%s11522_s3 + $0x7d4] sm:$0xf0]  ;;  %v6111_v5 = vor.u32 %v7434_v20, %v6110_v25  ;;  %v7431_v13 = vld [vmem:[%s11522_s3 + $0x118] sm:$0xf0] }
 0x1d2   :  { %4578 = vmatpush.bf16.msra.mxu2 %v7007_v3  ;;  %v6959_v60 = vor.u32 %v7645_v46, %v6956_v4  ;;  %v7079_v3 = vor.u32 %v7675_v52, %v7076_v11  ;;  %v7642_v9 = vld [vmem:[%s11522_s3 + $0x7b4] sm:$0xf]  ;;  %v7663_v25 = vld [vmem:[%s11522_s3 + $0x85c] sm:$0xf]  ;;  %v7028_v20 = vld [vmem:[%s11522_s3 + $0x864] sm:$0xf0] }
 0x1d3   :  { %4530 = vmatmul.bf16.vlgmr.msrb.gmra.mxu2 %v10126_v57  ;;  %v6434_v4 = vld [vmem:[%s11522_s3 + $0x3b0] sm:$0xf]  ;;  %v7515_v52 = vld [vmem:[%s11522_s3 + $0x3b8] sm:$0xf0] }
 0x1d4   :  { %4554 = vmatpush.bf16.msra.mxu0 %v6767_v33  ;;  %v6995_v33 = vor.u32 %v7654_v18, %v6992_v19  ;;  %v7064_v18 = vld [vmem:[%s11522_s3 + $0x8ac] sm:$0xf0]  ;;  %v6003_v19 = vor.u32 %v7407_v59, %v6002_v8  ;;  %v6230_v8 = vld [vmem:[%s11522_s3 + $0x218] sm:$0xf]  ;;  %v7464_v59 = vld [vmem:[%s11522_s3 + $0x220] sm:$0xf0] }
 0x1d5   :  { %4568 = vmatpush.bf16.msra.mxu1 %v6863_v37  ;;  %v6134_v37 = vld [vmem:[%s11522_s3 + $0x158] sm:$0xf]  ;;  %4542 = vmatpush.bf16.msrb.mxu3 %v6647_v53  ;;  %v7404_v53 = vld [vmem:[%s11522_s3 + $0x40] sm:$0xf0]  ;;  %v6530_v11 = vld [vmem:[%s11522_s3 + $0x470] sm:$0xf] }
 0x1d6   :  { %v6135_v49 = vor.u32 %v7440_v24, %v6134_v37  ;;  %4579 = vmatpush.bf16.msra.mxu2 %v6995_v33  ;;  %v7639_v33 = vld [vmem:[%s11522_s3 + $0x79c] sm:$0xf]  ;;  %v6932_v37 = vld [vmem:[%s11522_s3 + $0x7a4] sm:$0xf0]  ;;  %v7669_v24 = vld [vmem:[%s11522_s3 + $0x88c] sm:$0xf] }
 0x1d8   :  { %4555 = vmatpush.bf16.msra.mxu0 %v6755_v41  ;;  %v6983_v41 = vor.u32 %v7651_v0, %v6980_v40  ;;  %v7052_v0 = vld [vmem:[%s11522_s3 + $0x894] sm:$0xf0]  ;;  %v5991_v40 = vor.u32 %v7404_v53, %v5990_v22  ;;  %v7536_v22 = vld [vmem:[%s11522_s3 + $0x460] sm:$0xf0]  ;;  %v6218_v53 = vld [vmem:[%s11522_s3 + $0x200] sm:$0xf] }
 0x1d9   :  { %4569 = vmatpush.bf16.msra.mxu1 %v6851_v44  ;;  %v7103_v44 = vor.u32 %v7681_v34, %v7100_v42  ;;  %4543 = vmatpush.bf16.msrb.mxu3 %v6635_v43  ;;  %v6087_v34 = vor.u32 %v7428_v55, %v6086_v23  ;;  %v5978_v42 = vld [vmem:[%s11522_s3 + $0x20] sm:$0xf]  ;;  %v6935_v43 = vor.u32 %v7639_v33, %v6932_v37  ;;  %v7491_v23 = vld [vmem:[%s11522_s3 + $0x2f8] sm:$0xf0] }
 0x1da   :  { %4580 = vmatpush.bf16.msra.mxu2 %v6983_v41  ;;  %v7636_v41 = vld [vmem:[%s11522_s3 + $0x784] sm:$0xf] }
 0x1dc   :  { %4556 = vmatpush.bf16.msra.mxu0 %v6743_v1  ;;  %v6971_v1 = vor.u32 %v7648_v39, %v6968_v56  ;;  %4544 = vmatmul.bf16.vlgmr.msrb.gmra.mxu3 %v10147_v16  ;;  %v6242_v56 = vld [vmem:[%s11522_s3 + $0x230] sm:$0xf] }
 0x1dd   :  { %4570 = vmatpush.bf16.msra.mxu1 %v6839_v28  ;;  %4592 = vmatpush.bf16.msra.mxu3 %v7103_v44  ;;  %v7091_v28 = vor.u32 %v7678_v2, %v7088_v58  ;;  %v6920_v44 = vld [vmem:[%s11522_s3 + $0x78c] sm:$0xf0]  ;;  %v7467_v2 = vld [vmem:[%s11522_s3 + $0x238] sm:$0xf0]  ;;  %v6075_v58 = vor.u32 %v7425_v36, %v6074_v10  ;;  %v6326_v10 = vld [vmem:[%s11522_s3 + $0x2d8] sm:$0xf] }
 0x1de   :  { %4581 = vmatpush.bf16.msra.mxu2 %v6971_v1  ;;  %v6923_v62 = vor.u32 %v7636_v41, %v6920_v44  ;;  %v7043_v1 = vor.u32 %v7666_v45, %v7040_v50  ;;  %v6243_v46 = vor.u32 %v7467_v2, %v6242_v56  ;;  %v6398_v44 = vld [vmem:[%s11522_s3 + $0x368] sm:$0xf]  ;;  %v7506_v45 = vld [vmem:[%s11522_s3 + $0x370] sm:$0xf0]  ;;  %v6194_v2 = vld [vmem:[%s11522_s3 + $0x1d0] sm:$0xf] }
 0x1df   :  { %v6494_v50 = vld [vmem:[%s11522_s3 + $0x428] sm:$0xf]  ;;  %v7530_v56 = vld [vmem:[%s11522_s3 + $0x430] sm:$0xf0] }
 0x1e0   :  { %4557 = vmatpush.bf16.msra.mxu0 %v6731_v48  ;;  %v6944_v48 = vld [vmem:[%s11522_s3 + $0x7bc] sm:$0xf0] }
 0x1e1   :  { %4571 = vmatpush.bf16.msra.mxu1 %v6827_v63  ;;  %4593 = vmatpush.bf16.msra.mxu3 %v7091_v28  ;;  %v7672_v63 = vld [vmem:[%s11522_s3 + $0x8a4] sm:$0xf]  ;;  %v7422_v28 = vld [vmem:[%s11522_s3 + $0xd0] sm:$0xf0] }
 0x1e2   :  { %4582 = vmatpush.bf16.msra.mxu2 %v6959_v60  ;;  %v7067_v30 = vor.u32 %v7672_v63, %v7064_v18  ;;  %v6063_v60 = vor.u32 %v7422_v28, %v6062_v38  ;;  %v6231_v63 = vor.u32 %v7464_v59, %v6230_v8  ;;  %v6422_v18 = vld [vmem:[%s11522_s3 + $0x398] sm:$0xf]  ;;  %v6399_v38 = vor.u32 %v7506_v45, %v6398_v44  ;;  %v6386_v28 = vld [vmem:[%s11522_s3 + $0x350] sm:$0xf] }
 0x1e3   :  { %4558 = vmatmul.bf16.vlgmr.msra.gmra.mxu0 %v10320_v17 }
 0x1e4   :  { %4606 = vmatpush.bf16.msrb.mxu0 %v6051_v21  ;;  %4572 = vmatmul.bf16.vlgmr.msra.gmra.mxu1 %v10486_v51  ;;  %v6099_v21 = vor.u32 %v7431_v13, %v6098_v7  ;;  %v6435_v7 = vor.u32 %v7515_v52, %v6434_v4  ;;  %v7660_v13 = vld [vmem:[%s11522_s3 + $0x844] sm:$0xf]  ;;  %v7527_v4 = vld [vmem:[%s11522_s3 + $0x418] sm:$0xf0]  ;;  %v6182_v52 = vld [vmem:[%s11522_s3 + $0x1b8] sm:$0xf] }
 0x1e5   :  { %4620 = vmatpush.bf16.msrb.mxu1 %v6147_v14  ;;  %4594 = vmatpush.bf16.msra.mxu3 %v7079_v3  ;;  %v6947_v14 = vor.u32 %v7642_v9, %v6944_v48  ;;  %v7031_v3 = vor.u32 %v7663_v25, %v7028_v20  ;;  %v7016_v9 = vld [vmem:[%s11522_s3 + $0x84c] sm:$0xf0]  ;;  %v7503_v25 = vld [vmem:[%s11522_s3 + $0x358] sm:$0xf0] }
 0x1e6   :  { %v7019_v55 = vor.u32 %v7660_v13, %v7016_v9  ;;  %v6482_v20 = vld [vmem:[%s11522_s3 + $0x410] sm:$0xf]  ;;  %v6387_v8 = vor.u32 %v7503_v25, %v6386_v28  ;;  %v6470_v13 = vld [vmem:[%s11522_s3 + $0x3f8] sm:$0xf]  ;;  %v6254_v25 = vld [vmem:[%s11522_s3 + $0x248] sm:$0xf] }
 0x1e7   :  { %4583 = vmatpush.bf16.msra.mxu2 %v6947_v14  ;;  %v7461_v14 = vld [vmem:[%s11522_s3 + $0x208] sm:$0xf0]  ;;  %v6483_v59 = vor.u32 %v7527_v4, %v6482_v20  ;;  %v7470_v4 = vld [vmem:[%s11522_s3 + $0x250] sm:$0xf0] }
 0x1e8   :  { %4607 = vmatpush.bf16.msrb.mxu0 %v6039_v35  ;;  %v7401_v35 = vld [vmem:[%s11522_s3 + $0x28] sm:$0xf0] }
 0x1e9   :  { %4621 = vmatpush.bf16.msrb.mxu1 %v6135_v49  ;;  %4595 = vmatpush.bf16.msra.mxu3 %v7067_v30  ;;  %v7055_v49 = vor.u32 %v7669_v24, %v7052_v0  ;;  %v5979_v39 = vor.u32 %v7401_v35, %v5978_v42  ;;  %v6338_v30 = vld [vmem:[%s11522_s3 + $0x2f0] sm:$0xf]  ;;  %v6219_v24 = vor.u32 %v7461_v14, %v6218_v53  ;;  %v6410_v0 = vld [vmem:[%s11522_s3 + $0x380] sm:$0xf]  ;;  %v7533_v35 = vld [vmem:[%s11522_s3 + $0x448] sm:$0xf0] }
 0x1ea   :  { %v6339_v42 = vor.u32 %v7491_v23, %v6338_v30  ;;  %v6362_v53 = vld [vmem:[%s11522_s3 + $0x320] sm:$0xf]  ;;  %v7497_v23 = vld [vmem:[%s11522_s3 + $0x328] sm:$0xf0] }
 0x1eb   :  { %4584 = vmatpush.bf16.msra.mxu2 %v6935_v43  ;;  %v6206_v43 = vld [vmem:[%s11522_s3 + $0x1e8] sm:$0xf] }
 0x1ec   :  { %4608 = vmatpush.bf16.msrb.mxu0 %v6027_v6  ;;  %v5966_v6 = vld [vmem:[%s11522_s3 + $0x8] sm:$0xf] }
 0x1ed   :  { %4622 = vmatpush.bf16.msrb.mxu1 %v6123_v47  ;;  %v7398_v47 = vld [vmem:[%s11522_s3 + $0x10] sm:$0xf0]  ;;  %4596 = vmatpush.bf16.msra.mxu3 %v7055_v49 }
 0x1ee   :  { %v7458_v49 = vld [vmem:[%s11522_s3 + $0x1f0] sm:$0xf0] }
 0x1ef   :  { %4585 = vmatpush.bf16.msra.mxu2 %v6923_v62  ;;  %v6207_v41 = vor.u32 %v7458_v49, %v6206_v43  ;;  %v6495_v62 = vor.u32 %v7530_v56, %v6494_v50  ;;  %v6363_v43 = vor.u32 %v7497_v23, %v6362_v53  ;;  %v6350_v49 = vld [vmem:[%s11522_s3 + $0x308] sm:$0xf]  ;;  %v6266_v50 = vld [vmem:[%s11522_s3 + $0x260] sm:$0xf]  ;;  %v7611_v56 = vld [vmem:[%s11522_s3 + $0x6b8] sm:$0xf0] }
 0x1f0   :  { %4609 = vmatpush.bf16.msrb.mxu0 %v6015_v27  ;;  %v5967_v27 = vor.u32 %v7398_v47, %v5966_v6  ;;  %v6314_v6 = vld [vmem:[%s11522_s3 + $0x2c0] sm:$0xf]  ;;  %v7485_v47 = vld [vmem:[%s11522_s3 + $0x2c8] sm:$0xf0]  ;;  %v7584_v23 = vld [vmem:[%s11522_s3 + $0x5e0] sm:$0xf0] }
 0x1f1   :  { %4623 = vmatpush.bf16.msrb.mxu1 %v6111_v5  ;;  %v7539_v5 = vld [vmem:[%s11522_s3 + $0x478] sm:$0xf0]  ;;  %4597 = vmatpush.bf16.msra.mxu3 %v7043_v1  ;;  %v7629_v53 = vld [vmem:[%s11522_s3 + $0x748] sm:$0xf0] }
 0x1f2   :  { %v6531_v48 = vor.u32 %v7539_v5, %v6530_v11  ;;  %4586 = vmatmul.bf16.vlgmr.msra.gmra.mxu2 %v10604_v15  ;;  %v7452_v11 = vld [vmem:[%s11522_s3 + $0x1c0] sm:$0xf0]  ;;  %v7482_v5 = vld [vmem:[%s11522_s3 + $0x2b0] sm:$0xf0] }
 0x1f3   :  { %4634 = vmatpush.bf16.msrb.mxu2 %v6243_v46  ;;  %v6315_v46 = vor.u32 %v7485_v47, %v6314_v6  ;;  %v7635_v6 = vld [vmem:[%s11522_s3 + $0x778] sm:$0xf0] }
 0x1f4   :  { %4610 = vmatpush.bf16.msrb.mxu0 %v6003_v19  ;;  %v7512_v19 = vld [vmem:[%s11522_s3 + $0x3a0] sm:$0xf0] }
 0x1f5   :  { %4624 = vmatpush.bf16.msrb.mxu1 %v6099_v21  ;;  %v6518_v21 = vld [vmem:[%s11522_s3 + $0x458] sm:$0xf]  ;;  %4598 = vmatpush.bf16.msra.mxu3 %v7031_v3  ;;  %v6423_v33 = vor.u32 %v7512_v19, %v6422_v18  ;;  %v7449_v18 = vld [vmem:[%s11522_s3 + $0x1a8] sm:$0xf0]  ;;  %v6290_v19 = vld [vmem:[%s11522_s3 + $0x290] sm:$0xf] }
 0x1f6   :  { %v6519_v37 = vor.u32 %v7536_v22, %v6518_v21  ;;  %v6374_v3 = vld [vmem:[%s11522_s3 + $0x338] sm:$0xf]  ;;  %v7479_v21 = vld [vmem:[%s11522_s3 + $0x298] sm:$0xf0] }
 0x1f7   :  { %4635 = vmatpush.bf16.msrb.mxu2 %v6231_v63  ;;  %v6170_v63 = vld [vmem:[%s11522_s3 + $0x1a0] sm:$0xf] }
 0x1f8   :  { %4611 = vmatpush.bf16.msrb.mxu0 %v5991_v40  ;;  %v7509_v40 = vld [vmem:[%s11522_s3 + $0x388] sm:$0xf0]  ;;  %v6171_v30 = vor.u32 %v7449_v18, %v6170_v63  ;;  %v6794_v63 = vld [vmem:[%s11522_s3 + $0x680] sm:$0xf] }
 0x1f9   :  { %4625 = vmatpush.bf16.msrb.mxu1 %v6087_v34  ;;  %v6506_v34 = vld [vmem:[%s11522_s3 + $0x440] sm:$0xf]  ;;  %4599 = vmatpush.bf16.msra.mxu3 %v7019_v55  ;;  %v7605_v18 = vld [vmem:[%s11522_s3 + $0x688] sm:$0xf0] }
 0x1fa   :  { %v6507_v36 = vor.u32 %v7533_v35, %v6506_v34  ;;  %v6458_v55 = vld [vmem:[%s11522_s3 + $0x3e0] sm:$0xf]  ;;  %v7476_v34 = vld [vmem:[%s11522_s3 + $0x280] sm:$0xf0]  ;;  %v7563_v35 = vld [vmem:[%s11522_s3 + $0x538] sm:$0xf0] }
 0x1fb   :  { %4636 = vmatpush.bf16.msrb.mxu2 %v6219_v24  ;;  %v6158_v24 = vld [vmem:[%s11522_s3 + $0x188] sm:$0xf] }
 0x1fc   :  { %4612 = vmatpush.bf16.msrb.mxu0 %v5979_v39  ;;  %4600 = vmatmul.bf16.vlgmr.msra.gmra.mxu3 %v10658_v61 }
 0x1fd   :  { %4626 = vmatpush.bf16.msrb.mxu1 %v6075_v58  ;;  %4648 = vmatpush.bf16.msrb.mxu3 %v6339_v42  ;;  %v7455_v58 = vld [vmem:[%s11522_s3 + $0x1d8] sm:$0xf0]  ;;  %v6626_v42 = vld [vmem:[%s11522_s3 + $0x530] sm:$0xf] }
 0x1fe   :  { %v6195_v1 = vor.u32 %v7455_v58, %v6194_v2  ;;  %v6627_v45 = vor.u32 %v7563_v35, %v6626_v42  ;;  %v7473_v2 = vld [vmem:[%s11522_s3 + $0x268] sm:$0xf0]  ;;  %v6914_v58 = vld [vmem:[%s11522_s3 + $0x770] sm:$0xf]  ;;  %v6878_v42 = vld [vmem:[%s11522_s3 + $0x728] sm:$0xf] }
 0x1ff   :  { %4637 = vmatpush.bf16.msrb.mxu2 %v6207_v41  ;;  %v7518_v41 = vld [vmem:[%s11522_s3 + $0x3d0] sm:$0xf0]  ;;  %v6267_v20 = vor.u32 %v7473_v2, %v6266_v50 }
 0x200   :  { %4613 = vmatpush.bf16.msrb.mxu0 %v5967_v27  ;;  %v6302_v27 = vld [vmem:[%s11522_s3 + $0x2a8] sm:$0xf]  ;;  %v7626_v35 = vld [vmem:[%s11522_s3 + $0x730] sm:$0xf0] }
 0x201   :  { %4627 = vmatpush.bf16.msrb.mxu1 %v6063_v60  ;;  %v6183_v60 = vor.u32 %v7452_v11, %v6182_v52  ;;  %v6303_v9 = vor.u32 %v7482_v5, %v6302_v27  ;;  %v6806_v52 = vld [vmem:[%s11522_s3 + $0x698] sm:$0xf]  ;;  %v7608_v11 = vld [vmem:[%s11522_s3 + $0x6a0] sm:$0xf0] }
 0x202   :  { %v6902_v5 = vld [vmem:[%s11522_s3 + $0x758] sm:$0xf] }
 0x203   :  { %4614 = vmatmul.bf16.vlgmr.msrb.gmra.mxu0 %v9885_v26  ;;  %v7488_v26 = vld [vmem:[%s11522_s3 + $0x2e0] sm:$0xf0]  ;;  %4638 = vmatpush.bf16.msrb.mxu2 %v6195_v1 }
 0x204   :  { %4662 = vmatpush.bf16.msra.mxu0 %v6435_v7  ;;  %4628 = vmatmul.bf16.vlgmr.msrb.gmra.mxu1 %v9887_v31  ;;  %v6411_v31 = vor.u32 %v7509_v40, %v6410_v0  ;;  %v6327_v39 = vor.u32 %v7488_v26, %v6326_v10  ;;  %v7500_v7 = vld [vmem:[%s11522_s3 + $0x340] sm:$0xf0]  ;;  %v7446_v0 = vld [vmem:[%s11522_s3 + $0x190] sm:$0xf0]  ;;  %v6278_v40 = vld [vmem:[%s11522_s3 + $0x278] sm:$0xf] }
 0x205   :  { %4676 = vmatpush.bf16.msra.mxu1 %v6531_v48  ;;  %v7524_v48 = vld [vmem:[%s11522_s3 + $0x400] sm:$0xf0]  ;;  %v6375_v22 = vor.u32 %v7500_v7, %v6374_v3  ;;  %v6159_v26 = vor.u32 %v7446_v0, %v6158_v24  ;;  %v6279_v44 = vor.u32 %v7476_v34, %v6278_v40  ;;  %v6722_v3 = vld [vmem:[%s11522_s3 + $0x5f0] sm:$0xf]  ;;  %v7587_v7 = vld [vmem:[%s11522_s3 + $0x5f8] sm:$0xf0]  ;;  %v11274_v0 = vpop.f32.mrf.mxu2 }
 0x206   :  { %4649 = vmatpush.bf16.msrb.mxu3 %v6327_v39  ;;  %v6471_v14 = vor.u32 %v7524_v48, %v6470_v13  ;;  %v6818_v39 = vld [vmem:[%s11522_s3 + $0x6b0] sm:$0xf]  ;;  %v6807_v13 = vor.u32 %v7608_v11, %v6806_v52  ;;  %v7602_v24 = vld [vmem:[%s11522_s3 + $0x670] sm:$0xf0]  ;;  %v6854_v52 = vld [vmem:[%s11522_s3 + $0x6f8] sm:$0xf] }
 0x207   :  { %4639 = vmatpush.bf16.msrb.mxu2 %v6183_v60  ;;  %v6819_v28 = vor.u32 %v7611_v56, %v6818_v39  ;;  %v7557_v60 = vld [vmem:[%s11522_s3 + $0x508] sm:$0xf0]  ;;  %v7623_v39 = vld [vmem:[%s11522_s3 + $0x718] sm:$0xf0]  ;;  %v6566_v56 = vld [vmem:[%s11522_s3 + $0x4b8] sm:$0xf] }
 0x208   :  { %4663 = vmatpush.bf16.msra.mxu0 %v6423_v33  ;;  %v7521_v33 = vld [vmem:[%s11522_s3 + $0x3e8] sm:$0xf0]  ;;  %v7620_v11 = vld [vmem:[%s11522_s3 + $0x700] sm:$0xf0] }
 0x209   :  { %4677 = vmatpush.bf16.msra.mxu1 %v6519_v37  ;;  %v6291_v37 = vor.u32 %v7479_v21, %v6290_v19  ;;  %v6459_v10 = vor.u32 %v7521_v33, %v6458_v55  ;;  %v6723_v21 = vor.u32 %v7587_v7, %v6722_v3  ;;  %v11266_v55 = vpop.f32.mrf.mxu1  ;;  %v6795_v33 = vor.u32 %v7605_v18, %v6794_v63  ;;  %v6842_v18 = vld [vmem:[%s11522_s3 + $0x6e0] sm:$0xf] }
 0x20a   :  { %4650 = vmatpush.bf16.msrb.mxu3 %v6315_v46  ;;  %v6915_v46 = vor.u32 %v7635_v6, %v6914_v58  ;;  %v7548_v58 = vld [vmem:[%s11522_s3 + $0x4c0] sm:$0xf0]  ;;  %v6686_v6 = vld [vmem:[%s11522_s3 + $0x5a8] sm:$0xf]  ;;  %v6855_v7 = vor.u32 %v7620_v11, %v6854_v52 }
 0x20b   :  { %4640 = vmatpush.bf16.msrb.mxu2 %v6171_v30  ;;  %v6710_v30 = vld [vmem:[%s11522_s3 + $0x5d8] sm:$0xf] }
 0x20c   :  { %4664 = vmatpush.bf16.msra.mxu0 %v6411_v31  ;;  %v7494_v31 = vld [vmem:[%s11522_s3 + $0x310] sm:$0xf0]  ;;  %v6711_v34 = vor.u32 %v7584_v23, %v6710_v30  ;;  %v7010_v23 = vld [vmem:[%s11522_s3 + $0x830] sm:$0xf] }
 0x20d   :  { %4678 = vmatpush.bf16.msra.mxu1 %v6507_v36  ;;  %v6446_v36 = vld [vmem:[%s11522_s3 + $0x3c8] sm:$0xf]  ;;  %v6351_v47 = vor.u32 %v7494_v31, %v6350_v49  ;;  %v7551_v49 = vld [vmem:[%s11522_s3 + $0x4d8] sm:$0xf0] }
 0x20e   :  { %4651 = vmatpush.bf16.msrb.mxu3 %v6303_v9  ;;  %v6447_v1 = vor.u32 %v7518_v41, %v6446_v36  ;;  %v11238_v9 = vpop.f32.mrf.mxu0  ;;  %v6879_v36 = vor.u32 %v7626_v35, %v6878_v42  ;;  %v6770_v41 = vld [vmem:[%s11522_s3 + $0x650] sm:$0xf] }
 0x20f   :  { %4641 = vmatpush.bf16.msrb.mxu2 %v6159_v26  ;;  %v7581_v26 = vld [vmem:[%s11522_s3 + $0x5c8] sm:$0xf0] }
 0x210   :  { %4665 = vmatpush.bf16.msra.mxu0 %v6399_v38  ;;  %v6614_v38 = vld [vmem:[%s11522_s3 + $0x518] sm:$0xf] }
 0x211   :  { %4679 = vmatpush.bf16.msra.mxu1 %v6495_v62  ;;  %v7560_v62 = vld [vmem:[%s11522_s3 + $0x520] sm:$0xf0] }
 0x212   :  { %4652 = vmatpush.bf16.msrb.mxu3 %v6291_v37  ;;  %v6615_v27 = vor.u32 %v7560_v62, %v6614_v38  ;;  %4642 = vmatmul.bf16.vlgmr.msrb.gmra.mxu2 %v9889_v32  ;;  %v6255_v32 = vor.u32 %v7470_v4, %v6254_v25  ;;  %v11321_v38 = vpop.f32.mrf.mxu3  ;;  %v7596_v25 = vld [vmem:[%s11522_s3 + $0x640] sm:$0xf0] }
 0x213   :  { %4690 = vmatpush.bf16.msra.mxu2 %v6627_v45 }
 0x214   :  { %4666 = vmatpush.bf16.msra.mxu0 %v6387_v8  ;;  %v7632_v8 = vld [vmem:[%s11522_s3 + $0x760] sm:$0xf0] }
 0x215   :  { %4680 = vmatpush.bf16.msra.mxu1 %v6483_v59  ;;  %v6602_v59 = vld [vmem:[%s11522_s3 + $0x500] sm:$0xf]  ;;  %v6903_v48 = vor.u32 %v7632_v8, %v6902_v5  ;;  %v7545_v5 = vld [vmem:[%s11522_s3 + $0x4a8] sm:$0xf0]  ;;  %v6674_v8 = vld [vmem:[%s11522_s3 + $0x590] sm:$0xf] }
 0x216   :  { %4653 = vmatpush.bf16.msrb.mxu3 %v6279_v44  ;;  %v6603_v19 = vor.u32 %v7557_v60, %v6602_v59  ;;  %v7599_v44 = vld [vmem:[%s11522_s3 + $0x658] sm:$0xf0]  ;;  %v11310_v2 = vpop.f32.mrf.mxu0  ;;  %v11349_v60 = vpop.f32.mrf.mxu2 }
 0x217   :  { %4691 = vmatpush.bf16.msra.mxu2 %v6615_v27  ;;  %v6771_v62 = vor.u32 %v7599_v44, %v6770_v41  ;;  %v6554_v27 = vld [vmem:[%s11522_s3 + $0x4a0] sm:$0xf]  ;;  %v7575_v59 = vld [vmem:[%s11522_s3 + $0x598] sm:$0xf0] }
 0x218   :  { %4667 = vmatpush.bf16.msra.mxu0 %v6375_v22  ;;  %v6890_v22 = vld [vmem:[%s11522_s3 + $0x740] sm:$0xf]  ;;  %v6675_v63 = vor.u32 %v7575_v59, %v6674_v8 }
 0x219   :  { %4681 = vmatpush.bf16.msra.mxu1 %v6471_v14  ;;  %v6590_v14 = vld [vmem:[%s11522_s3 + $0x4e8] sm:$0xf]  ;;  %v6891_v37 = vor.u32 %v7629_v53, %v6890_v22  ;;  %v7542_v53 = vld [vmem:[%s11522_s3 + $0x490] sm:$0xf0] }
 0x21a   :  { %4654 = vmatpush.bf16.msrb.mxu3 %v6267_v20  ;;  %v11329_v20 = vpop.f32.mrf.mxu1 }
 0x21b   :  { %4692 = vmatpush.bf16.msra.mxu2 %v6603_v19  ;;  %v7617_v19 = vld [vmem:[%s11522_s3 + $0x6e8] sm:$0xf0] }
 0x21c   :  { %4668 = vmatpush.bf16.msra.mxu0 %v6363_v43  ;;  %v6578_v43 = vld [vmem:[%s11522_s3 + $0x4d0] sm:$0xf] }
 0x21d   :  { %4682 = vmatpush.bf16.msra.mxu1 %v6459_v10  ;;  %v6698_v10 = vld [vmem:[%s11522_s3 + $0x5c0] sm:$0xf]  ;;  %v6579_v45 = vor.u32 %v7551_v49, %v6578_v43  ;;  %v6830_v43 = vld [vmem:[%s11522_s3 + $0x6c8] sm:$0xf]  ;;  %v7614_v49 = vld [vmem:[%s11522_s3 + $0x6d0] sm:$0xf0] }
 0x21e   :  { %4655 = vmatpush.bf16.msrb.mxu3 %v6255_v32  ;;  %v6699_v50 = vor.u32 %v7581_v26, %v6698_v10  ;;  %v7593_v32 = vld [vmem:[%s11522_s3 + $0x628] sm:$0xf0]  ;;  %v4335_v22 = vpop.f32.mrf.mxu0  ;;  %v4294_v10 = vadd.f32 %v11266_v55, %v11238_v9  ;;  %v4363_v41 = vpop.f32.mrf.mxu2  ;;  %v7656_v9 = vld [vmem:[%s11522_s3 + $0x820] sm:$0xf0] }
 0x220   :  { %4669 = vmatpush.bf16.msra.mxu0 %v6351_v47  ;;  %v7578_v47 = vld [vmem:[%s11522_s3 + $0x5b0] sm:$0xf0]  ;;  %v4308_v55 = vadd.f32 %v11274_v0, %v4294_v10  ;;  %v7653_v0 = vld [vmem:[%s11522_s3 + $0x808] sm:$0xf0]  ;;  %v7058_v10 = vld [vmem:[%s11522_s3 + $0x890] sm:$0xf] }
 0x221   :  { %4683 = vmatpush.bf16.msra.mxu1 %v6447_v1  ;;  %4656 = vmatmul.bf16.vlgmr.msrb.gmra.mxu3 %v9897_v12  ;;  %v6866_v12 = vld [vmem:[%s11522_s3 + $0x710] sm:$0xf]  ;;  %v6687_v4 = vor.u32 %v7578_v47, %v6686_v6  ;;  %v6986_v6 = vld [vmem:[%s11522_s3 + $0x800] sm:$0xf] }
 0x222   :  { %4704 = vmatpush.bf16.msra.mxu3 %v6723_v21  ;;  %v6867_v1 = vor.u32 %v7623_v39, %v6866_v12  ;;  %v6542_v21 = vld [vmem:[%s11522_s3 + $0x488] sm:$0xf]  ;;  %v7106_v47 = vld [vmem:[%s11522_s3 + $0x8f0] sm:$0xf]  ;;  %v6987_v11 = vor.u32 %v7653_v0, %v6986_v6 }
 0x223   :  { %4670 = vmatmul.bf16.vlgmr.msra.gmra.mxu0 %v10122_v29  ;;  %v7554_v29 = vld [vmem:[%s11522_s3 + $0x4f0] sm:$0xf0]  ;;  %v6543_v42 = vor.u32 %v7542_v53, %v6542_v21  ;;  %v6950_v53 = vld [vmem:[%s11522_s3 + $0x7b8] sm:$0xf] }
 0x224   :  { %4718 = vmatpush.bf16.msrb.mxu0 %v6819_v28  ;;  %4684 = vmatmul.bf16.vlgmr.msra.gmra.mxu1 %v10124_v54  ;;  %v6782_v54 = vld [vmem:[%s11522_s3 + $0x668] sm:$0xf]  ;;  %v6591_v40 = vor.u32 %v7554_v29, %v6590_v14  ;;  %v6758_v28 = vld [vmem:[%s11522_s3 + $0x638] sm:$0xf]  ;;  %v7572_v29 = vld [vmem:[%s11522_s3 + $0x580] sm:$0xf0] }
 0x225   :  { %4732 = vmatpush.bf16.msrb.mxu1 %v6915_v46  ;;  %v6783_v31 = vor.u32 %v7602_v24, %v6782_v54  ;;  %v6567_v46 = vor.u32 %v7548_v58, %v6566_v56  ;;  %v6759_v3 = vor.u32 %v7596_v25, %v6758_v28  ;;  %v6662_v14 = vld [vmem:[%s11522_s3 + $0x578] sm:$0xf]  ;;  %v6734_v54 = vld [vmem:[%s11522_s3 + $0x608] sm:$0xf]  ;;  %v7590_v24 = vld [vmem:[%s11522_s3 + $0x610] sm:$0xf0]  ;;  %v4296_v25 = vadd.f32 %v11329_v20, %v11310_v2 }
 0x226   :  { %4693 = vmatpush.bf16.msra.mxu2 %v6591_v40  ;;  %4705 = vmatpush.bf16.msra.mxu3 %v6711_v34  ;;  %v4323_v40 = vpop.f32.mrf.mxu3  ;;  %v4349_v34 = vpop.f32.mrf.mxu1  ;;  %v6663_v35 = vor.u32 %v7572_v29, %v6662_v14  ;;  %v6735_v44 = vor.u32 %v7590_v24, %v6734_v54  ;;  %v6638_v56 = vld [vmem:[%s11522_s3 + $0x548] sm:$0xf]  ;;  %v7566_v58 = vld [vmem:[%s11522_s3 + $0x550] sm:$0xf0]  ;;  %v7094_v20 = vld [vmem:[%s11522_s3 + $0x8d8] sm:$0xf] }
 0x227   :  { %v4337_v28 = vpop.f32.mrf.mxu0  ;;  %v7650_v2 = vld [vmem:[%s11522_s3 + $0x7f0] sm:$0xf0]  ;;  %v4365_v8 = vpop.f32.mrf.mxu2 }
 0x228   :  { %4719 = vmatpush.bf16.msrb.mxu0 %v6807_v13  ;;  %v6746_v13 = vld [vmem:[%s11522_s3 + $0x620] sm:$0xf] }
 0x229   :  { %4733 = vmatpush.bf16.msrb.mxu1 %v6903_v48  ;;  %v6555_v48 = vor.u32 %v7545_v5, %v6554_v27  ;;  %v6747_v30 = vor.u32 %v7593_v32, %v6746_v13  ;;  %v4310_v5 = vadd.f32 %v11349_v60, %v4296_v25  ;;  %v7647_v13 = vld [vmem:[%s11522_s3 + $0x7d8] sm:$0xf0]  ;;  %v7082_v32 = vld [vmem:[%s11522_s3 + $0x8c0] sm:$0xf] }
 0x22a   :  { %4694 = vmatpush.bf16.msra.mxu2 %v6579_v45  ;;  %4706 = vmatpush.bf16.msra.mxu3 %v6699_v50  ;;  %v6998_v45 = vld [vmem:[%s11522_s3 + $0x818] sm:$0xf]  ;;  %v6831_v50 = vor.u32 %v7614_v49, %v6830_v43  ;;  %v11479_v49 = vld [vmem:[%s11523_s4] sm:$0x7] }
 0x22b   :  { %v6999_v39 = vor.u32 %v7656_v9, %v6998_v45 }
 0x22c   :  { %4720 = vmatpush.bf16.msrb.mxu0 %v6795_v33  ;;  %v7659_v33 = vld [vmem:[%s11522_s3 + $0x838] sm:$0xf0] }
 0x22d   :  { %4734 = vmatpush.bf16.msrb.mxu1 %v6891_v37  ;;  %v6843_v37 = vor.u32 %v7617_v19, %v6842_v18  ;;  %v7011_v26 = vor.u32 %v7659_v33, %v7010_v23  ;;  %v7070_v23 = vld [vmem:[%s11522_s3 + $0x8a8] sm:$0xf] }
 0x22e   :  { %4695 = vmatpush.bf16.msra.mxu2 %v6567_v46  ;;  %4707 = vmatpush.bf16.msra.mxu3 %v6687_v4  ;;  %v4377_v46 = vpop.f32.mrf.mxu3  ;;  %v6639_v4 = vor.u32 %v7566_v58, %v6638_v56  ;;  %v7046_v56 = vld [vmem:[%s11522_s3 + $0x878] sm:$0xf]  ;;  %v7668_v58 = vld [vmem:[%s11522_s3 + $0x880] sm:$0xf0] }
 0x22f   :  { %v4391_v18 = vpop.f32.mrf.mxu0 }
 0x230   :  { %4721 = vmatpush.bf16.msrb.mxu0 %v6783_v31  ;;  %v6650_v31 = vld [vmem:[%s11522_s3 + $0x560] sm:$0xf] }
 0x231   :  { %4735 = vmatpush.bf16.msrb.mxu1 %v6879_v36  ;;  %v7569_v36 = vld [vmem:[%s11522_s3 + $0x568] sm:$0xf0] }
 0x232   :  { %4696 = vmatpush.bf16.msra.mxu2 %v6555_v48  ;;  %4708 = vmatpush.bf16.msra.mxu3 %v6675_v63  ;;  %v6651_v12 = vor.u32 %v7569_v36, %v6650_v31  ;;  %v7677_v48 = vld [vmem:[%s11522_s3 + $0x8c8] sm:$0xf0]  ;;  %v4419_v54 = vpop.f32.mrf.mxu2 }
 0x234   :  { %4722 = vmatpush.bf16.msrb.mxu0 %v6771_v62  ;;  %v7683_v62 = vld [vmem:[%s11522_s3 + $0x8f8] sm:$0xf0] }
 0x235   :  { %4736 = vmatpush.bf16.msrb.mxu1 %v6867_v1  ;;  %v4322_v1 = vadd.f32 %v11321_v38, %v4308_v55  ;;  %v7107_v27 = vor.u32 %v7683_v62, %v7106_v47  ;;  %v6974_v38 = vld [vmem:[%s11522_s3 + $0x7e8] sm:$0xf] }
 0x236   :  { %4697 = vmatpush.bf16.msra.mxu2 %v6543_v42  ;;  %4709 = vmatpush.bf16.msra.mxu3 %v6663_v35  ;;  %v6975_v60 = vor.u32 %v7650_v2, %v6974_v38  ;;  %v4379_v14 = vpop.f32.mrf.mxu3  ;;  %v6938_v42 = vld [vmem:[%s11522_s3 + $0x7a0] sm:$0xf]  ;;  %v7641_v35 = vld [vmem:[%s11522_s3 + $0x7a8] sm:$0xf0]  ;;  %v6926_v55 = vld [vmem:[%s11522_s3 + $0x788] sm:$0xf] }
 0x237   :  { %v4336_v52 = vadd.f32 %v4335_v22, %v4322_v1  ;;  %v7083_v22 = vor.u32 %v7677_v48, %v7082_v32  ;;  %v4393_v36 = vpop.f32.mrf.mxu0  ;;  %v6939_v45 = vor.u32 %v7641_v35, %v6938_v42 }
 0x238   :  { %4723 = vmatpush.bf16.msrb.mxu0 %v6759_v3 }
 0x239   :  { %4737 = vmatpush.bf16.msrb.mxu1 %v6855_v7  ;;  %4698 = vmatmul.bf16.vlgmr.msra.gmra.mxu2 %v10126_v57  ;;  %v4351_v57 = vpop.f32.mrf.mxu1  ;;  %v4350_v59 = vadd.f32 %v4349_v34, %v4336_v52  ;;  %v4324_v7 = vadd.f32 %v4323_v40, %v4310_v5  ;;  %v7022_v5 = vld [vmem:[%s11522_s3 + $0x848] sm:$0xf] }
 0x23a   :  { %4746 = vmatpush.bf16.msrb.mxu2 %v7011_v26  ;;  %4710 = vmatpush.bf16.msra.mxu3 %v6651_v12  ;;  %v7671_v26 = vld [vmem:[%s11522_s3 + $0x898] sm:$0xf0]  ;;  %v4421_v25 = vpop.f32.mrf.mxu2 }
 0x23b   :  { %v4364_v63 = vadd.f32 %v4363_v41, %v4350_v59  ;;  %v4338_v19 = vadd.f32 %v4337_v28, %v4324_v7  ;;  %v7059_v9 = vor.u32 %v7671_v26, %v7058_v10  ;;  %v7047_v28 = vor.u32 %v7668_v58, %v7046_v56 }
 0x23c   :  { %4724 = vmatpush.bf16.msrb.mxu0 %v6747_v30  ;;  %v7644_v30 = vld [vmem:[%s11522_s3 + $0x7c0] sm:$0xf0] }
 0x23d   :  { %4738 = vmatpush.bf16.msrb.mxu1 %v6843_v37  ;;  %v4378_v33 = vadd.f32 %v4377_v46, %v4364_v63  ;;  %v4352_v37 = vadd.f32 %v4351_v57, %v4338_v19  ;;  %v6951_v40 = vor.u32 %v7644_v30, %v6950_v53  ;;  %v7034_v46 = vld [vmem:[%s11522_s3 + $0x860] sm:$0xf]  ;;  %v7662_v57 = vld [vmem:[%s11522_s3 + $0x850] sm:$0xf0] }
 0x23e   :  { %4747 = vmatpush.bf16.msrb.mxu2 %v6999_v39  ;;  %4711 = vmatpush.bf16.msra.mxu3 %v6639_v4  ;;  %v4433_v12 = vpop.f32.mrf.mxu3  ;;  %v7638_v39 = vld [vmem:[%s11522_s3 + $0x790] sm:$0xf0]  ;;  %v7665_v4 = vld [vmem:[%s11522_s3 + $0x868] sm:$0xf0] }
 0x23f   :  { %v4392_v24 = vadd.f32 %v4391_v18, %v4378_v33  ;;  %v4366_v43 = vadd.f32 %v4365_v8, %v4352_v37  ;;  %v6927_v1 = vor.u32 %v7638_v39, %v6926_v55  ;;  %v4447_v8 = vpop.f32.mrf.mxu0 }
 0x240   :  { %4725 = vmatpush.bf16.msrb.mxu0 %v6735_v44  ;;  %v27_v44 = vperm.slane %v11479_v49, 0 }
 0x241   :  { %4739 = vmatpush.bf16.msrb.mxu1 %v6831_v50  ;;  %4712 = vmatmul.bf16.vlgmr.msra.gmra.mxu3 %v10147_v16  ;;  %v4405_v29 = vpop.f32.mrf.mxu1  ;;  %v7674_v16 = vld [vmem:[%s11522_s3 + $0x8b0] sm:$0xf0]  ;;  %v4380_v50 = vadd.f32 %v4379_v14, %v4366_v43 }
 0x242   :  { %4748 = vmatpush.bf16.msrb.mxu2 %v6987_v11  ;;  %4760 = vmatpush.bf16.msrb.mxu3 %v7107_v27  ;;  %v7071_v34 = vor.u32 %v7674_v16, %v7070_v23  ;;  %v4406_v31 = vadd.f32 %v4405_v29, %v4392_v24  ;;  %v7035_v27 = vor.u32 %v7665_v4, %v7034_v46 }
 0x243   :  { %4726 = vmatmul.bf16.vlgmr.msrb.gmra.mxu0 %v10320_v17  ;;  %v7680_v17 = vld [vmem:[%s11522_s3 + $0x8e0] sm:$0xf0]  ;;  %v4394_v0 = vadd.f32 %v4393_v36, %v4380_v50 }
 0x244   :  { %4740 = vmatmul.bf16.vlgmr.msrb.gmra.mxu1 %v10486_v51  ;;  %v7095_v3 = vor.u32 %v7680_v17, %v7094_v20  ;;  %v6962_v51 = vld [vmem:[%s11522_s3 + $0x7d0] sm:$0xf]  ;;  %v4420_v41 = vadd.f32 %v4419_v54, %v4406_v31  ;;  %v7023_v17 = vor.u32 %v7662_v57, %v7022_v5  ;;  %s7713_s3 = smov [#allocation2]  }
 0x245   :  { %v6963_v21 = vor.u32 %v7647_v13, %v6962_v51  ;;  %s4790_s12 = sshll.u32 %s7713_s3, 4  ;;  %s4791_s12 = int_to_ptr.vmem [resolvable:$true] %s4790_s12 }
 0x246   :  { %4749 = vmatpush.bf16.msrb.mxu2 %v6975_v60  ;;  %4761 = vmatpush.bf16.msrb.mxu3 %v7095_v3  ;;  %v4434_v6 = vadd.f32 %v4433_v12, %v4420_v41  ;;  %v4435_v38 = vpop.f32.mrf.mxu3  ;;  %v4475_v60 = vpop.f32.mrf.mxu2 }
 0x247   :  { %v4449_v51 = vpop.f32.mrf.mxu0 }
 0x248   :  { %v4774_v62 = vadd.f32 %v4434_v6, %v27_v44 }
 0x249   :  { %v4407_v47 = vpop.f32.mrf.mxu1 }
 0x24a   :  { %4750 = vmatpush.bf16.msrb.mxu2 %v6963_v21  ;;  %4762 = vmatpush.bf16.msrb.mxu3 %v7083_v22  ;;  %v4408_v52 = vadd.f32 %v4407_v47, %v4394_v0  ;;  %4780 = vst [vmem:[#allocation2] sm:$0xff] %v4774_v62 }
 0x24c   :  { %v4422_v11 = vadd.f32 %v4421_v25, %v4408_v52 }
 0x24e   :  { %4751 = vmatpush.bf16.msrb.mxu2 %v6951_v40  ;;  %4763 = vmatpush.bf16.msrb.mxu3 %v7071_v34  ;;  %v4436_v2 = vadd.f32 %v4435_v38, %v4422_v11  ;;  %v4489_v3 = vpop.f32.mrf.mxu3  ;;  %v4477_v13 = vpop.f32.mrf.mxu2 }
 0x24f   :  { %v4503_v32 = vpop.f32.mrf.mxu0 }
 0x250   :  { %v4777_v20 = vadd.f32 %v4436_v2, %v27_v44  ;;  %v28_v44 = vperm.slane %v11479_v49, 1 }
 0x251   :  { %v4461_v59 = vpop.f32.mrf.mxu1 }
 0x252   :  { %4752 = vmatpush.bf16.msrb.mxu2 %v6939_v45  ;;  %4764 = vmatpush.bf16.msrb.mxu3 %v7059_v9  ;;  %4783 = vst [vmem:[#allocation2 + $0x18] sm:$0xff] %v4777_v20  ;;  %v4462_v63 = vadd.f32 %v4461_v59, %v4447_v8 }
 0x254   :  { %v4476_v18 = vadd.f32 %v4475_v60, %v4462_v63 }
 0x256   :  { %4753 = vmatpush.bf16.msrb.mxu2 %v6927_v1  ;;  %4765 = vmatpush.bf16.msrb.mxu3 %v7047_v28  ;;  %v4491_v48 = vpop.f32.mrf.mxu3  ;;  %v4490_v21 = vadd.f32 %v4489_v3, %v4476_v18 }
 0x257   :  { %v4505_v14 = vpop.f32.mrf.mxu0 }
 0x258   :  { %v4504_v53 = vadd.f32 %v4503_v32, %v4490_v21 }
 0x259   :  { %4754 = vmatmul.bf16.vlgmr.msrb.gmra.mxu2 %v10604_v15  ;;  %v4463_v7 = vpop.f32.mrf.mxu1  ;;  %v4531_v15 = vpop.f32.mrf.mxu2 }
 0x25a   :  { %4766 = vmatpush.bf16.msrb.mxu3 %v7035_v27  ;;  %v4464_v22 = vadd.f32 %v4463_v7, %v4449_v51 }
 0x25c   :  { %v4478_v30 = vadd.f32 %v4477_v13, %v4464_v22 }
 0x25e   :  { %4767 = vmatpush.bf16.msrb.mxu3 %v7023_v17  ;;  %v4492_v23 = vadd.f32 %v4491_v48, %v4478_v30 }
 0x25f   :  { %v4545_v29 = vpop.f32.mrf.mxu3 }
 0x260   :  { %v4506_v54 = vadd.f32 %v4505_v14, %v4492_v23  ;;  %v4559_v40 = vpop.f32.mrf.mxu0 }
 0x261   :  { %4768 = vmatmul.bf16.vlgmr.msrb.gmra.mxu3 %v10658_v61  ;;  %v4517_v19 = vpop.f32.mrf.mxu1  ;;  %v4533_v61 = vpop.f32.mrf.mxu2 }
 0x262   :  { %v4518_v16 = vadd.f32 %v4517_v19, %v4504_v53 }
 0x264   :  { %v4532_v37 = vadd.f32 %v4531_v15, %v4518_v16 }
 0x266   :  { %v4546_v24 = vadd.f32 %v4545_v29, %v4532_v37 }
 0x267   :  { %v4547_v34 = vpop.f32.mrf.mxu3 }
 0x268   :  { %v4560_v35 = vadd.f32 %v4559_v40, %v4546_v24  ;;  %v4561_v45 = vpop.f32.mrf.mxu0 }
 0x269   :  { %v4519_v33 = vpop.f32.mrf.mxu1 }
 0x26a   :  { %v4520_v42 = vadd.f32 %v4519_v33, %v4506_v54 }
 0x26c   :  { %v4534_v26 = vadd.f32 %v4533_v61, %v4520_v42  ;;  %v29_v61 = vperm.slane %v11479_v49, 2 }
 0x26e   :  { %v4548_v31 = vadd.f32 %v4547_v34, %v4534_v26 }
 0x270   :  { %v4562_v55 = vadd.f32 %v4561_v45, %v4548_v31 }
 0x271   :  { %v4573_v43 = vpop.f32.mrf.mxu1 }
 0x272   :  { %v4574_v36 = vadd.f32 %v4573_v43, %v4560_v35 }
 0x275   :  { %v4587_v10 = vpop.f32.mrf.mxu2 }
 0x276   :  { %v4588_v41 = vadd.f32 %v4587_v10, %v4574_v36 }
 0x279   :  { %v4575_v39 = vpop.f32.mrf.mxu1 }
 0x27a   :  { %v4576_v58 = vadd.f32 %v4575_v39, %v4562_v55 }
 0x27d   :  { %v4589_v56 = vpop.f32.mrf.mxu2 }
 0x27e   :  { %v4590_v6 = vadd.f32 %v4589_v56, %v4576_v58 }
 0x27f   :  { %v4601_v9 = vpop.f32.mrf.mxu3 }
 0x280   :  { %v4602_v50 = vadd.f32 %v4601_v9, %v4588_v41  ;;  %v4615_v1 = vpop.f32.mrf.mxu0 }
 0x281   :  { %v4629_v28 = vpop.f32.mrf.mxu1 }
 0x282   :  { %v4775_v12 = vadd.f32 %v4602_v50, %v28_v44  ;;  %v4630_v38 = vadd.f32 %v4629_v28, %v4615_v1 }
 0x284   :  { %4781 = vst [vmem:[#allocation2 + $0x8] sm:$0xff] %v4775_v12 }
 0x287   :  { %v4603_v0 = vpop.f32.mrf.mxu3 }
 0x288   :  { %v4604_v47 = vadd.f32 %v4603_v0, %v4590_v6  ;;  %v4617_v46 = vpop.f32.mrf.mxu0 }
 0x289   :  { %v4631_v52 = vpop.f32.mrf.mxu1 }
 0x28a   :  { %v4778_v62 = vadd.f32 %v4604_v47, %v28_v44  ;;  %v4632_v8 = vadd.f32 %v4631_v52, %v4617_v46 }
 0x28c   :  { %4784 = vst [vmem:[#allocation2 + $0x20] sm:$0xff] %v4778_v62 }
 0x295   :  { %v4643_v25 = vpop.f32.mrf.mxu2 }
 0x296   :  { %v4644_v57 = vadd.f32 %v4643_v25, %v4630_v38 }
 0x29d   :  { %v4645_v11 = vpop.f32.mrf.mxu2 }
 0x29e   :  { %v4646_v51 = vadd.f32 %v4645_v11, %v4632_v8 }
 0x2a0   :  { %v4671_v27 = vpop.f32.mrf.mxu0 }
 0x2a1   :  { %v4685_v2 = vpop.f32.mrf.mxu1 }
 0x2a4   :  { %v4657_v4 = vpop.f32.mrf.mxu3 }
 0x2a5   :  { %v4658_v17 = vadd.f32 %v4657_v4, %v4644_v57 }
 0x2a7   :  { %v4672_v59 = vadd.f32 %v4671_v27, %v4658_v17 }
 0x2a8   :  { %v4673_v60 = vpop.f32.mrf.mxu0 }
 0x2a9   :  { %v4686_v13 = vadd.f32 %v4685_v2, %v4672_v59  ;;  %v4687_v32 = vpop.f32.mrf.mxu1 }
 0x2ac   :  { %v4659_v5 = vpop.f32.mrf.mxu3 }
 0x2ad   :  { %v4660_v7 = vadd.f32 %v4659_v5, %v4646_v51 }
 0x2af   :  { %v4674_v18 = vadd.f32 %v4673_v60, %v4660_v7 }
 0x2b1   :  { %v4688_v22 = vadd.f32 %v4687_v32, %v4674_v18 }
 0x2bc   :  { %v4699_v20 = vpop.f32.mrf.mxu2 }
 0x2bd   :  { %v4700_v63 = vadd.f32 %v4699_v20, %v4686_v13 }
 0x2c0   :  { %v4727_v15 = vpop.f32.mrf.mxu0 }
 0x2c1   :  { %v4741_v14 = vpop.f32.mrf.mxu1 }
 0x2c4   :  { %v4713_v3 = vpop.f32.mrf.mxu3  ;;  %v4701_v48 = vpop.f32.mrf.mxu2 }
 0x2c5   :  { %v4714_v19 = vadd.f32 %v4713_v3, %v4700_v63  ;;  %v4702_v30 = vadd.f32 %v4701_v48, %v4688_v22 }
 0x2c7   :  { %v4728_v53 = vadd.f32 %v4727_v15, %v4714_v19 }
 0x2c8   :  { %v4729_v37 = vpop.f32.mrf.mxu0 }
 0x2c9   :  { %v4742_v16 = vadd.f32 %v4741_v14, %v4728_v53  ;;  %v4743_v42 = vpop.f32.mrf.mxu1 }
 0x2cc   :  { %v4715_v21 = vpop.f32.mrf.mxu3 }
 0x2cd   :  { %v4716_v23 = vadd.f32 %v4715_v21, %v4702_v30 }
 0x2cf   :  { %v4730_v24 = vadd.f32 %v4729_v37, %v4716_v23 }
 0x2d1   :  { %v4744_v43 = vadd.f32 %v4743_v42, %v4730_v24 }
 0x2dc   :  { %v4755_v29 = vpop.f32.mrf.mxu2 }
 0x2dd   :  { %v4756_v33 = vadd.f32 %v4755_v29, %v4742_v16 }
 0x2e4   :  { %v4769_v54 = vpop.f32.mrf.mxu3  ;;  %v4757_v35 = vpop.f32.mrf.mxu2 }
 0x2e5   :  { %v4770_v40 = vadd.f32 %v4769_v54, %v4756_v33  ;;  %v4758_v10 = vadd.f32 %v4757_v35, %v4744_v43 }
 0x2e7   :  { %v4776_v34 = vadd.f32 %v4770_v40, %v29_v61 }
 0x2e9   :  { %4782 = vst [vmem:[#allocation2 + $0x10] sm:$0xff] %v4776_v34 }
 0x2ec   :  { %v4771_v26 = vpop.f32.mrf.mxu3 }
 0x2ed   :  { %v4772_v31 = vadd.f32 %v4771_v26, %v4758_v10 }
 0x2ef   :  { %v4779_v49 = vadd.f32 %v4772_v31, %v29_v61 }
 0x2f1   :  { %4785 = vst [vmem:[#allocation2 + $0x28] sm:$0xff] %v4779_v49 }
 0x2f2   :  { %4798 = dma.vmem_to_hbm [thread:$0]  %s4791_s12, 768, %s4793_s15, [#allocation3], %s7714_s16, %s7714_s16, %s7715_s17  }
 0x2f3   :  { %7711 = dma.done.wait [#allocation3], 768  }
 0x2f4   :  { %7712 = vsyncadd [#allocation3], 4294966528 }
 0x2f5   :  { %4803 = vsyncpa [#allocation3], 1 }

</bundles_post_ra>
